<compile_context>
chip_gen: v5e
topology: v5e:2x2
jax: 0.10.0
libtpu: 0.0.40
codegen_flags: <defaults>
</compile_context>

<pallas_src>
import jax
import jax.numpy as jnp
from jax.experimental import pallas as pl
from jax.experimental.pallas import tpu as pltpu


def _make_attnpool_kernel(num_heads: int, hw_real: int):
    inv_hw = 1.0 / float(hw_real)

    def kernel(x_ref, pos0_ref, possp_ref, bias_ref,
               wq_ref, bq_ref, wkv_ref, bkv_ref, wc_ref, bc_ref,
               mch_ref, mhc_ref, o_ref):
        B, C, HW = x_ref.shape
        H = num_heads

        # Channel-major tile straight from the NCHW activation.
        x_cm = x_ref[...].astype(jnp.float32)                       # (B, C, HW)

        # Mean (query) token over the *real* spatial tokens (padded cols are
        # zero) plus its positional embedding.
        mean_tok = jnp.sum(x_cm, axis=2) * inv_hw + pos0_ref[...]   # (B, C)

        # Token-major view built in VMEM (XLU transpose, hidden behind DMA).
        x_tok = jnp.transpose(x_cm, (0, 2, 1))                      # (B, HW, C)
        xs = x_tok + possp_ref[...][None, :, :]                     # f32
        xs_b = xs.reshape(B * HW, C).astype(jnp.bfloat16)
        mean_b = mean_tok.astype(jnp.bfloat16)

        # Query projection (scale already folded into wq/bq by the wrapper).
        q = jnp.dot(mean_b, wq_ref[...],
                    preferred_element_type=jnp.float32) + bq_ref[...]         # (B, C)

        # Fused K/V projections: bf16 operands, f32 accumulation.
        kv0 = jnp.dot(mean_b, wkv_ref[...],
                      preferred_element_type=jnp.float32) + bkv_ref[...]      # (B, 2C)
        kvs = jnp.dot(xs_b, wkv_ref[...],
                      preferred_element_type=jnp.float32) + bkv_ref[...]      # (B*HW, 2C)
        k0, v0 = kv0[:, :C], kv0[:, C:]
        ks3 = kvs[:, :C].reshape(B, HW, C)
        vs3 = kvs[:, C:].reshape(B, HW, C)

        m_ch = mch_ref[...]                                         # (C, H) bf16
        m_hc = mhc_ref[...]                                         # (H, C) bf16

        # Per-head attention scores of the mean-token query vs all tokens.
        s0 = jnp.dot((q * k0).astype(jnp.bfloat16), m_ch,
                     preferred_element_type=jnp.float32)                      # (B, H)
        qk = (q[:, None, :] * ks3).reshape(B * HW, C).astype(jnp.bfloat16)
        ss = jnp.dot(qk, m_ch,
                     preferred_element_type=jnp.float32).reshape(B, HW, H)    # (B, HW, H)
        # Mask padded spatial tokens out of the softmax.
        ss = ss + bias_ref[...][None, :, :]

        # Numerically stable softmax over the (1 + HW) tokens, f32 throughout.
        m = jnp.maximum(s0, jnp.max(ss, axis=1))                    # (B, H)
        e0 = jnp.exp(s0 - m)                                        # (B, H)
        es = jnp.exp(ss - m[:, None, :])                            # (B, HW, H)
        r = pl.reciprocal(e0 + jnp.sum(es, axis=1), approx=True)    # (B, H)

        # Broadcast per-head probabilities back to channels, weight V, reduce.
        p0c = jnp.dot((e0 * r).astype(jnp.bfloat16), m_hc,
                      preferred_element_type=jnp.float32)                     # (B, C)
        psc = jnp.dot((es * r[:, None, :]).reshape(B * HW, H).astype(jnp.bfloat16),
                      m_hc, preferred_element_type=jnp.float32).reshape(B, HW, C)
        attn = p0c * v0 + jnp.sum(psc * vs3, axis=1)                # (B, C)

        # Output projection -> dense, lane-aligned (B, Dout_pad) store.
        out = jnp.dot(attn.astype(jnp.bfloat16), wc_ref[...],
                      preferred_element_type=jnp.float32) + bc_ref[...]
        o_ref[...] = out.astype(o_ref.dtype)

    return kernel


def attention_pool_2d(x_nchw, params, num_heads, *, batch_tile=None):
    """Pallas implementation of AttentionPool2d.forward; returns (N, output_dim)."""
    N, C, Hs, Ws = x_nchw.shape
    HW = Hs * Ws
    assert C % num_heads == 0
    head_dim = C // num_heads
    Dout = params["wc"].shape[0]
    scale = float(head_dim) ** -0.5

    # Pad the token axis to a sublane multiple (8) and the output axis to a
    # lane multiple (128): keeps in-kernel reshapes/reductions tile aligned
    # and makes the output store dense.
    HW_pad = max(8, -(-HW // 8) * 8)
    Dout_pad = max(128, -(-Dout // 128) * 128)

    # Generation-aware VMEM budget (v5e/v6e: 128 MiB, v7x: 64 MiB per core).
    try:
        vmem_cap = int(pltpu.get_tpu_info().vmem_capacity_bytes)
    except Exception:
        vmem_cap = 128 << 20
    vmem_usable = max(vmem_cap - (12 << 20), 16 << 20)

    x_bytes = jnp.dtype(x_nchw.dtype).itemsize
    # Single-buffered bf16 weights + small f32 constants.
    weight_bytes = (2 * (C * C + 2 * C * C + C * Dout_pad + 2 * C * num_heads)
                    + 4 * (3 * C + Dout_pad + (HW_pad + 1) * C + HW_pad))

    def footprint(bt):
        rows = bt * HW_pad
        inp = 2 * bt * C * HW_pad * x_bytes       # double-buffered input blocks
        outp = 2 * bt * Dout_pad * x_bytes        # double-buffered output blocks
        temps = rows * C * 30                     # x_tok/xs/kvs/ks/vs/qk/psc ...
        return weight_bytes + inp + outp + temps

    if batch_tile is None:
        batch_tile = min(32, max(8, pl.next_power_of_2(pl.cdiv(N, 2))))
        while batch_tile > 8 and footprint(batch_tile) > vmem_usable:
            batch_tile //= 2

    # At least 2 grid steps so ("parallel",) can use both v7x TensorCores.
    n_steps = max(2, pl.cdiv(N, batch_tile))
    n_pad = n_steps * batch_tile

    # NCHW -> (N, C, HW) is a free reshape; the token-major transpose happens
    # inside the kernel (no extra HBM pass).  Padding rows/cols are zeros.
    x_cm = x_nchw.reshape(N, C, HW)
    if n_pad != N or HW_pad != HW:
        x_cm = jnp.pad(x_cm, ((0, n_pad - N), (0, 0), (0, HW_pad - HW)))

    f32, bf16 = jnp.float32, jnp.bfloat16
    # Pre-transposed linear weights (bf16); q scale folded in; K/V fused.
    wq_t = (params["wq"].astype(f32) * scale).T.astype(bf16)                 # (C, C)
    bq = (params["bq"].astype(f32) * scale).reshape(1, C)
    wkv_t = jnp.concatenate([params["wk"].T, params["wv"].T],
                            axis=1).astype(bf16)                             # (C, 2C)
    bkv = jnp.concatenate([params["bk"], params["bv"]]).astype(f32).reshape(1, 2 * C)
    wc_t = params["wc"].astype(f32).T                                        # (C, Dout)
    bc = params["bc"].astype(f32).reshape(1, Dout)
    if Dout_pad != Dout:
        wc_t = jnp.pad(wc_t, ((0, 0), (0, Dout_pad - Dout)))
        bc = jnp.pad(bc, ((0, 0), (0, Dout_pad - Dout)))
    wc_t = wc_t.astype(bf16)

    pos = params["pos"].astype(f32)
    pos0 = pos[0:1, :]                                      # (1, C)  mean token
    pos_sp = pos[1:, :]                                     # (HW, C) spatial
    if HW_pad != HW:
        pos_sp = jnp.pad(pos_sp, ((0, HW_pad - HW), (0, 0)))

    # Additive softmax bias: 0 for real spatial tokens, -1e30 for padded ones.
    tok_bias = jnp.where(jnp.arange(HW_pad) < HW, 0.0, -1e30)
    tok_bias = tok_bias.astype(f32).reshape(HW_pad, 1)

    # Head-selection masks (hoisted out of the kernel, DMA'd once, bf16).
    head_of_c = jnp.arange(C, dtype=jnp.int32) // head_dim
    m_ch = (head_of_c[:, None] ==
            jnp.arange(num_heads, dtype=jnp.int32)[None, :]).astype(bf16)    # (C, H)
    m_hc = m_ch.T                                                            # (H, C)

    def const_spec(shape):
        nd = len(shape)
        # Constant index map + single buffering: fetched once, half the VMEM.
        return pl.BlockSpec(shape, lambda b, _nd=nd: (0,) * _nd,
                            pipeline_mode=pl.Buffered(1))

    kernel = _make_attnpool_kernel(num_heads, HW)

    vmem_limit = int(min(vmem_usable, max(2 * footprint(batch_tile), 32 << 20)))

    out = pl.pallas_call(
        kernel,
        out_shape=jax.ShapeDtypeStruct((n_pad, Dout_pad), x_nchw.dtype),
        grid_spec=pltpu.PrefetchScalarGridSpec(
            num_scalar_prefetch=0,
            grid=(n_steps,),
            in_specs=[
                pl.BlockSpec((batch_tile, C, HW_pad), lambda b: (b, 0, 0)),  # x (NCHW)
                const_spec((1, C)),                                  # pos (mean token)
                const_spec((HW_pad, C)),                             # pos (spatial)
                const_spec((HW_pad, 1)),                             # softmax token bias
                const_spec((C, C)), const_spec((1, C)),              # q proj (pre-scaled)
                const_spec((C, 2 * C)), const_spec((1, 2 * C)),      # fused k/v proj
                const_spec((C, Dout_pad)), const_spec((1, Dout_pad)),  # c proj
                const_spec((C, num_heads)), const_spec((num_heads, C)),  # head masks
            ],
            out_specs=pl.BlockSpec((batch_tile, Dout_pad), lambda b: (b, 0)),
        ),
        compiler_params=pltpu.CompilerParams(
            dimension_semantics=("parallel",),
            vmem_limit_bytes=vmem_limit),
    )(x_cm, pos0, pos_sp, tok_bias, wq_t, bq, wkv_t, bkv, wc_t, bc, m_ch, m_hc)

    return out[:N, :Dout]


def reference(x_nchw, params, num_heads):
    """Pure-JAX f32 reference mirroring F.multi_head_attention_forward semantics."""
    N, C, H, W = x_nchw.shape
    HW = H * W
    x = jnp.transpose(x_nchw.reshape(N, C, HW), (2, 0, 1))           # (HW, N, C)
    x = jnp.concatenate([x.mean(axis=0, keepdims=True), x], axis=0)  # (L, N, C)
    x = x + params["pos"][:, None, :]
    L = x.shape[0]
    head_dim = C // num_heads
    scale = head_dim ** -0.5
    q = (x @ params["wq"].T + params["bq"]) * scale
    k = x @ params["wk"].T + params["bk"]
    v = x @ params["wv"].T + params["bv"]
    q = q.reshape(L, N, num_heads, head_dim)
    k = k.reshape(L, N, num_heads, head_dim)
    v = v.reshape(L, N, num_heads, head_dim)
    scores = jnp.einsum("qnhd,knhd->nhqk", q, k)
    p = jax.nn.softmax(scores, axis=-1)
    o = jnp.einsum("nhqk,knhd->qnhd", p, v).reshape(L, N, C)
    out = o @ params["wc"].T + params["bc"]
    return out[0]


def _run_case(key, N, embed_dim, spacial_dim, num_heads, output_dim):
    HW = spacial_dim ** 2
    out_dim = output_dim or embed_dim
    keys = jax.random.split(key, 10)
    x = jax.random.normal(keys[0], (N, embed_dim, spacial_dim, spacial_dim),
                          dtype=jnp.float32)
    std = embed_dim ** -0.5
    params = {
        "pos": jax.random.normal(keys[1], (HW + 1, embed_dim), jnp.float32) * std,
        "wq": jax.random.normal(keys[2], (embed_dim, embed_dim), jnp.float32) * std,
        "bq": jax.random.normal(keys[3], (embed_dim,), jnp.float32) * 0.02,
        "wk": jax.random.normal(keys[4], (embed_dim, embed_dim), jnp.float32) * std,
        "bk": jax.random.normal(keys[5], (embed_dim,), jnp.float32) * 0.02,
        "wv": jax.random.normal(keys[6], (embed_dim, embed_dim), jnp.float32) * std,
        "bv": jax.random.normal(keys[7], (embed_dim,), jnp.float32) * 0.02,
        "wc": jax.random.normal(keys[8], (out_dim, embed_dim), jnp.float32) * std,
        "bc": jax.random.normal(keys[9], (out_dim,), jnp.float32) * 0.02,
    }

    out = attention_pool_2d(x, params, num_heads)
    out = jax.block_until_ready(out)

    ref = reference(x, params, num_heads)
    assert out.shape == (N, out_dim), out.shape
    err = float(jnp.max(jnp.abs(out - ref)))
    rel = float(jnp.linalg.norm(out - ref) / jnp.linalg.norm(ref))
    # bf16 MXU operands (with f32 accumulation) need a looser tolerance than f32.
    assert err < 5e-2, ("max abs err", err)
    assert rel < 2.5e-2, ("rel fro err", rel)


if __name__ == "__main__":
    key = jax.random.PRNGKey(0)
    k1, k2 = jax.random.split(key)
    # Even spatial grid, Dout < 128 (exercises the Dout lane padding path).
    _run_case(k1, N=2, embed_dim=128, spacial_dim=4, num_heads=4, output_dim=64)
    # Odd spatial grid (HW=9 -> padded to 16 + softmax mask) and default output_dim.
    _run_case(k2, N=3, embed_dim=128, spacial_dim=3, num_heads=8, output_dim=None)
    print("KERNEL_OK")
</pallas_src>

<mosaic_0001>
module attributes {stable_mosaic.version = 11 : i64} {
  func.func @kernel(%arg0: i32, %arg1: memref<8x128x16xf32, #tpu.memory_space<vmem>>, %arg2: memref<1x128xf32, #tpu.memory_space<vmem>>, %arg3: memref<16x128xf32, #tpu.memory_space<vmem>>, %arg4: memref<16x1xf32, #tpu.memory_space<vmem>>, %arg5: memref<128x128xbf16, #tpu.memory_space<vmem>>, %arg6: memref<1x128xf32, #tpu.memory_space<vmem>>, %arg7: memref<128x256xbf16, #tpu.memory_space<vmem>>, %arg8: memref<1x256xf32, #tpu.memory_space<vmem>>, %arg9: memref<128x128xbf16, #tpu.memory_space<vmem>>, %arg10: memref<1x128xf32, #tpu.memory_space<vmem>>, %arg11: memref<128x4xbf16, #tpu.memory_space<vmem>>, %arg12: memref<4x128xbf16, #tpu.memory_space<vmem>>, %arg13: memref<8x128xf32, #tpu.memory_space<vmem>>) attributes {dimension_semantics = [#tpu.dimension_semantics<parallel>], iteration_bounds = array<i64: 2>, scalar_prefetch = 0 : i64, scratch_operands = 0 : i64, tpu.core_type = #tpu.core_type<tc>, window_params = [{transform_indices = @transform_0, window_bounds = array<i64: 8, 128, 16>}, {pipeline_mode = #tpu.pipeline_mode<synchronous>, transform_indices = @transform_1, window_bounds = array<i64: 1, 128>}, {pipeline_mode = #tpu.pipeline_mode<synchronous>, transform_indices = @transform_2, window_bounds = array<i64: 16, 128>}, {pipeline_mode = #tpu.pipeline_mode<synchronous>, transform_indices = @transform_3, window_bounds = array<i64: 16, 1>}, {pipeline_mode = #tpu.pipeline_mode<synchronous>, transform_indices = @transform_4, window_bounds = array<i64: 128, 128>}, {pipeline_mode = #tpu.pipeline_mode<synchronous>, transform_indices = @transform_5, window_bounds = array<i64: 1, 128>}, {pipeline_mode = #tpu.pipeline_mode<synchronous>, transform_indices = @transform_6, window_bounds = array<i64: 128, 256>}, {pipeline_mode = #tpu.pipeline_mode<synchronous>, transform_indices = @transform_7, window_bounds = array<i64: 1, 256>}, {pipeline_mode = #tpu.pipeline_mode<synchronous>, transform_indices = @transform_8, window_bounds = array<i64: 128, 128>}, {pipeline_mode = #tpu.pipeline_mode<synchronous>, transform_indices = @transform_9, window_bounds = array<i64: 1, 128>}, {pipeline_mode = #tpu.pipeline_mode<synchronous>, transform_indices = @transform_10, window_bounds = array<i64: 128, 4>}, {pipeline_mode = #tpu.pipeline_mode<synchronous>, transform_indices = @transform_11, window_bounds = array<i64: 4, 128>}, {transform_indices = @transform_12, window_bounds = array<i64: 8, 128>}]} {
    %c0 = arith.constant 0 : index
    %c0_0 = arith.constant 0 : index
    %c0_1 = arith.constant 0 : index
    %0 = vector.load %arg1[%c0, %c0_0, %c0_1] : memref<8x128x16xf32, #tpu.memory_space<vmem>>, vector<8x128x16xf32>
    %cst = arith.constant dense<0.000000e+00> : vector<8x128xf32>
    %1 = vector.multi_reduction <add>, %0, %cst [2] : vector<8x128x16xf32> to vector<8x128xf32>
    %cst_2 = arith.constant 6.250000e-02 : f32
    %2 = vector.broadcast %cst_2 : f32 to vector<8x128xf32>
    %3 = arith.mulf %1, %2 : vector<8x128xf32>
    %c0_3 = arith.constant 0 : index
    %c0_4 = arith.constant 0 : index
    %4 = vector.load %arg2[%c0_3, %c0_4] : memref<1x128xf32, #tpu.memory_space<vmem>>, vector<1x128xf32>
    %5 = vector.broadcast %4 : vector<1x128xf32> to vector<8x128xf32>
    %6 = arith.addf %3, %5 : vector<8x128xf32>
    %7 = tpu.transpose %0, [0, 2, 1] : vector<8x128x16xf32> -> vector<8x16x128xf32>
    %c0_5 = arith.constant 0 : index
    %c0_6 = arith.constant 0 : index
    %8 = vector.load %arg3[%c0_5, %c0_6] : memref<16x128xf32, #tpu.memory_space<vmem>>, vector<16x128xf32>
    %9 = vector.shape_cast %8 : vector<16x128xf32> to vector<1x16x128xf32>
    %10 = vector.broadcast %9 : vector<1x16x128xf32> to vector<8x16x128xf32>
    %11 = arith.addf %7, %10 : vector<8x16x128xf32>
    %12 = vector.shape_cast %11 : vector<8x16x128xf32> to vector<128x128xf32>
    %13 = arith.truncf %12 : vector<128x128xf32> to vector<128x128xbf16>
    %14 = arith.truncf %6 : vector<8x128xf32> to vector<8x128xbf16>
    %c0_7 = arith.constant 0 : index
    %c0_8 = arith.constant 0 : index
    %15 = vector.load %arg5[%c0_7, %c0_8] : memref<128x128xbf16, #tpu.memory_space<vmem>>, vector<128x128xbf16>
    %cst_9 = arith.constant dense<0.000000e+00> : vector<8x128xf32>
    %16 = tpu.matmul %14, %15, %cst_9 {dimension_numbers = #tpu.dot_dimension_numbers<[1], [0], [0], [1], [0, 0, 1, 1], [], []>} : vector<8x128xbf16>, vector<128x128xbf16>, vector<8x128xf32> -> vector<8x128xf32>
    %c0_10 = arith.constant 0 : index
    %c0_11 = arith.constant 0 : index
    %17 = vector.load %arg6[%c0_10, %c0_11] : memref<1x128xf32, #tpu.memory_space<vmem>>, vector<1x128xf32>
    %18 = vector.broadcast %17 : vector<1x128xf32> to vector<8x128xf32>
    %19 = arith.addf %16, %18 : vector<8x128xf32>
    %c0_12 = arith.constant 0 : index
    %c0_13 = arith.constant 0 : index
    %20 = vector.load %arg7[%c0_12, %c0_13] : memref<128x256xbf16, #tpu.memory_space<vmem>>, vector<128x256xbf16>
    %cst_14 = arith.constant dense<0.000000e+00> : vector<8x256xf32>
    %21 = tpu.matmul %14, %20, %cst_14 {dimension_numbers = #tpu.dot_dimension_numbers<[1], [0], [0], [1], [0, 0, 1, 1], [], []>} : vector<8x128xbf16>, vector<128x256xbf16>, vector<8x256xf32> -> vector<8x256xf32>
    %c0_15 = arith.constant 0 : index
    %c0_16 = arith.constant 0 : index
    %22 = vector.load %arg8[%c0_15, %c0_16] : memref<1x256xf32, #tpu.memory_space<vmem>>, vector<1x256xf32>
    %23 = vector.broadcast %22 : vector<1x256xf32> to vector<8x256xf32>
    %24 = arith.addf %21, %23 : vector<8x256xf32>
    %c0_17 = arith.constant 0 : index
    %c0_18 = arith.constant 0 : index
    %25 = vector.load %arg7[%c0_17, %c0_18] : memref<128x256xbf16, #tpu.memory_space<vmem>>, vector<128x256xbf16>
    %cst_19 = arith.constant dense<0.000000e+00> : vector<128x256xf32>
    %26 = tpu.matmul %13, %25, %cst_19 {dimension_numbers = #tpu.dot_dimension_numbers<[1], [0], [0], [1], [0, 0, 1, 1], [], []>} : vector<128x128xbf16>, vector<128x256xbf16>, vector<128x256xf32> -> vector<128x256xf32>
    %c0_20 = arith.constant 0 : index
    %c0_21 = arith.constant 0 : index
    %27 = vector.load %arg8[%c0_20, %c0_21] : memref<1x256xf32, #tpu.memory_space<vmem>>, vector<1x256xf32>
    %28 = vector.broadcast %27 : vector<1x256xf32> to vector<128x256xf32>
    %29 = arith.addf %26, %28 : vector<128x256xf32>
    %30 = vector.extract_strided_slice %24 {offsets = [0, 0], sizes = [8, 128], strides = [1, 1]} : vector<8x256xf32> to vector<8x128xf32>
    %31 = vector.extract_strided_slice %24 {offsets = [0, 128], sizes = [8, 128], strides = [1, 1]} : vector<8x256xf32> to vector<8x128xf32>
    %32 = vector.extract_strided_slice %29 {offsets = [0, 0], sizes = [128, 128], strides = [1, 1]} : vector<128x256xf32> to vector<128x128xf32>
    %33 = vector.shape_cast %32 : vector<128x128xf32> to vector<8x16x128xf32>
    %34 = vector.extract_strided_slice %29 {offsets = [0, 128], sizes = [128, 128], strides = [1, 1]} : vector<128x256xf32> to vector<128x128xf32>
    %35 = vector.shape_cast %34 : vector<128x128xf32> to vector<8x16x128xf32>
    %c0_22 = arith.constant 0 : index
    %c0_23 = arith.constant 0 : index
    %36 = vector.load %arg11[%c0_22, %c0_23] : memref<128x4xbf16, #tpu.memory_space<vmem>>, vector<128x4xbf16>
    %c0_24 = arith.constant 0 : index
    %c0_25 = arith.constant 0 : index
    %37 = vector.load %arg12[%c0_24, %c0_25] : memref<4x128xbf16, #tpu.memory_space<vmem>>, vector<4x128xbf16>
    %38 = arith.mulf %19, %30 : vector<8x128xf32>
    %39 = arith.truncf %38 : vector<8x128xf32> to vector<8x128xbf16>
    %cst_26 = arith.constant dense<0.000000e+00> : vector<8x4xf32>
    %40 = tpu.matmul %39, %36, %cst_26 {dimension_numbers = #tpu.dot_dimension_numbers<[1], [0], [0], [1], [0, 0, 1, 1], [], []>} : vector<8x128xbf16>, vector<128x4xbf16>, vector<8x4xf32> -> vector<8x4xf32>
    %41 = vector.shape_cast %19 : vector<8x128xf32> to vector<8x1x128xf32>
    %42 = vector.broadcast %41 : vector<8x1x128xf32> to vector<8x16x128xf32>
    %43 = arith.mulf %42, %33 : vector<8x16x128xf32>
    %44 = vector.shape_cast %43 : vector<8x16x128xf32> to vector<128x128xf32>
    %45 = arith.truncf %44 : vector<128x128xf32> to vector<128x128xbf16>
    %cst_27 = arith.constant dense<0.000000e+00> : vector<128x4xf32>
    %46 = tpu.matmul %45, %36, %cst_27 {dimension_numbers = #tpu.dot_dimension_numbers<[1], [0], [0], [1], [0, 0, 1, 1], [], []>} : vector<128x128xbf16>, vector<128x4xbf16>, vector<128x4xf32> -> vector<128x4xf32>
    %47 = vector.shape_cast %46 : vector<128x4xf32> to vector<8x16x4xf32>
    %c0_28 = arith.constant 0 : index
    %c0_29 = arith.constant 0 : index
    %48 = vector.load %arg4[%c0_28, %c0_29] : memref<16x1xf32, #tpu.memory_space<vmem>>, vector<16x1xf32>
    %49 = vector.shape_cast %48 : vector<16x1xf32> to vector<1x16x1xf32>
    %50 = vector.broadcast %49 : vector<1x16x1xf32> to vector<8x16x4xf32>
    %51 = arith.addf %47, %50 : vector<8x16x4xf32>
    %cst_30 = arith.constant dense<0xFF800000> : vector<8x4xf32>
    %52 = vector.multi_reduction <maximumf>, %51, %cst_30 [1] : vector<8x16x4xf32> to vector<8x4xf32>
    %53 = arith.maximumf %40, %52 : vector<8x4xf32>
    %54 = arith.subf %40, %53 : vector<8x4xf32>
    %55 = math.exp %54 : vector<8x4xf32>
    %56 = vector.shape_cast %53 : vector<8x4xf32> to vector<8x1x4xf32>
    %57 = vector.broadcast %56 : vector<8x1x4xf32> to vector<8x16x4xf32>
    %58 = arith.subf %51, %57 : vector<8x16x4xf32>
    %59 = math.exp %58 : vector<8x16x4xf32>
    %cst_31 = arith.constant dense<0.000000e+00> : vector<8x4xf32>
    %60 = vector.multi_reduction <add>, %59, %cst_31 [1] : vector<8x16x4xf32> to vector<8x4xf32>
    %61 = arith.addf %55, %60 : vector<8x4xf32>
    %62 = tpu.reciprocal %61 {approx = true} : vector<8x4xf32> -> vector<8x4xf32>
    %63 = arith.mulf %55, %62 : vector<8x4xf32>
    %64 = arith.truncf %63 : vector<8x4xf32> to vector<8x4xbf16>
    %cst_32 = arith.constant dense<0.000000e+00> : vector<8x128xf32>
    %65 = tpu.matmul %64, %37, %cst_32 {dimension_numbers = #tpu.dot_dimension_numbers<[1], [0], [0], [1], [0, 0, 1, 1], [], []>} : vector<8x4xbf16>, vector<4x128xbf16>, vector<8x128xf32> -> vector<8x128xf32>
    %66 = vector.shape_cast %62 : vector<8x4xf32> to vector<8x1x4xf32>
    %67 = vector.broadcast %66 : vector<8x1x4xf32> to vector<8x16x4xf32>
    %68 = arith.mulf %59, %67 : vector<8x16x4xf32>
    %69 = vector.shape_cast %68 : vector<8x16x4xf32> to vector<128x4xf32>
    %70 = arith.truncf %69 : vector<128x4xf32> to vector<128x4xbf16>
    %cst_33 = arith.constant dense<0.000000e+00> : vector<128x128xf32>
    %71 = tpu.matmul %70, %37, %cst_33 {dimension_numbers = #tpu.dot_dimension_numbers<[1], [0], [0], [1], [0, 0, 1, 1], [], []>} : vector<128x4xbf16>, vector<4x128xbf16>, vector<128x128xf32> -> vector<128x128xf32>
    %72 = vector.shape_cast %71 : vector<128x128xf32> to vector<8x16x128xf32>
    %73 = arith.mulf %65, %31 : vector<8x128xf32>
    %74 = arith.mulf %72, %35 : vector<8x16x128xf32>
    %cst_34 = arith.constant dense<0.000000e+00> : vector<8x128xf32>
    %75 = vector.multi_reduction <add>, %74, %cst_34 [1] : vector<8x16x128xf32> to vector<8x128xf32>
    %76 = arith.addf %73, %75 : vector<8x128xf32>
    %77 = arith.truncf %76 : vector<8x128xf32> to vector<8x128xbf16>
    %c0_35 = arith.constant 0 : index
    %c0_36 = arith.constant 0 : index
    %78 = vector.load %arg9[%c0_35, %c0_36] : memref<128x128xbf16, #tpu.memory_space<vmem>>, vector<128x128xbf16>
    %cst_37 = arith.constant dense<0.000000e+00> : vector<8x128xf32>
    %79 = tpu.matmul %77, %78, %cst_37 {dimension_numbers = #tpu.dot_dimension_numbers<[1], [0], [0], [1], [0, 0, 1, 1], [], []>} : vector<8x128xbf16>, vector<128x128xbf16>, vector<8x128xf32> -> vector<8x128xf32>
    %c0_38 = arith.constant 0 : index
    %c0_39 = arith.constant 0 : index
    %80 = vector.load %arg10[%c0_38, %c0_39] : memref<1x128xf32, #tpu.memory_space<vmem>>, vector<1x128xf32>
    %81 = vector.broadcast %80 : vector<1x128xf32> to vector<8x128xf32>
    %82 = arith.addf %79, %81 : vector<8x128xf32>
    %c0_40 = arith.constant 0 : index
    %c0_41 = arith.constant 0 : index
    %83 = vector.load %arg13[%c0_40, %c0_41] : memref<8x128xf32, #tpu.memory_space<vmem>>, vector<8x128xf32>
    tpu.vector_store %arg13[%c0_40, %c0_41], %82 {strides = array<i32>} : memref<8x128xf32, #tpu.memory_space<vmem>>, vector<8x128xf32>,
    return
  }
  func.func @transform_0(%arg0: i32) -> (i32, i32, i32) {
    %c0_i32 = arith.constant 0 : i32
    %c0_i32_0 = arith.constant 0 : i32
    %c0_i32_1 = arith.constant 0 : i32
    return %arg0, %c0_i32, %c0_i32_0 : i32, i32, i32
  }
  func.func @transform_1(%arg0: i32) -> (i32, i32) {
    %c0_i32 = arith.constant 0 : i32
    %c0_i32_0 = arith.constant 0 : i32
    %c0_i32_1 = arith.constant 0 : i32
    return %c0_i32, %c0_i32_0 : i32, i32
  }
  func.func @transform_2(%arg0: i32) -> (i32, i32) {
    %c0_i32 = arith.constant 0 : i32
    %c0_i32_0 = arith.constant 0 : i32
    %c0_i32_1 = arith.constant 0 : i32
    return %c0_i32, %c0_i32_0 : i32, i32
  }
  func.func @transform_3(%arg0: i32) -> (i32, i32) {
    %c0_i32 = arith.constant 0 : i32
    %c0_i32_0 = arith.constant 0 : i32
    %c0_i32_1 = arith.constant 0 : i32
    return %c0_i32, %c0_i32_0 : i32, i32
  }
  func.func @transform_4(%arg0: i32) -> (i32, i32) {
    %c0_i32 = arith.constant 0 : i32
    %c0_i32_0 = arith.constant 0 : i32
    %c0_i32_1 = arith.constant 0 : i32
    return %c0_i32, %c0_i32_0 : i32, i32
  }
  func.func @transform_5(%arg0: i32) -> (i32, i32) {
    %c0_i32 = arith.constant 0 : i32
    %c0_i32_0 = arith.constant 0 : i32
    %c0_i32_1 = arith.constant 0 : i32
    return %c0_i32, %c0_i32_0 : i32, i32
  }
  func.func @transform_6(%arg0: i32) -> (i32, i32) {
    %c0_i32 = arith.constant 0 : i32
    %c0_i32_0 = arith.constant 0 : i32
    %c0_i32_1 = arith.constant 0 : i32
    return %c0_i32, %c0_i32_0 : i32, i32
  }
  func.func @transform_7(%arg0: i32) -> (i32, i32) {
    %c0_i32 = arith.constant 0 : i32
    %c0_i32_0 = arith.constant 0 : i32
    %c0_i32_1 = arith.constant 0 : i32
    return %c0_i32, %c0_i32_0 : i32, i32
  }
  func.func @transform_8(%arg0: i32) -> (i32, i32) {
    %c0_i32 = arith.constant 0 : i32
    %c0_i32_0 = arith.constant 0 : i32
    %c0_i32_1 = arith.constant 0 : i32
    return %c0_i32, %c0_i32_0 : i32, i32
  }
  func.func @transform_9(%arg0: i32) -> (i32, i32) {
    %c0_i32 = arith.constant 0 : i32
    %c0_i32_0 = arith.constant 0 : i32
    %c0_i32_1 = arith.constant 0 : i32
    return %c0_i32, %c0_i32_0 : i32, i32
  }
  func.func @transform_10(%arg0: i32) -> (i32, i32) {
    %c0_i32 = arith.constant 0 : i32
    %c0_i32_0 = arith.constant 0 : i32
    %c0_i32_1 = arith.constant 0 : i32
    return %c0_i32, %c0_i32_0 : i32, i32
  }
  func.func @transform_11(%arg0: i32) -> (i32, i32) {
    %c0_i32 = arith.constant 0 : i32
    %c0_i32_0 = arith.constant 0 : i32
    %c0_i32_1 = arith.constant 0 : i32
    return %c0_i32, %c0_i32_0 : i32, i32
  }
  func.func @transform_12(%arg0: i32) -> (i32, i32) {
    %c0_i32 = arith.constant 0 : i32
    %c0_i32_0 = arith.constant 0 : i32
    return %arg0, %c0_i32 : i32, i32
  }
}

</mosaic_0001>

<bundles_post_ra>
// kernel: tpu_custom_call.1
= control target key start
LH: loop header
LB: loop body
LE: loop exit
PB: predicated region body
PF: predicated region fallthrough
CT: control target
= control target key end

     0   :  { %s6854_s0 = inlined_call_operand.vmem [shape: f32[16,128,16], index: 0, kind: input, shape index: {}]   ;;  %s6855_s1 = inlined_call_operand.vmem [shape: f32[1,128], index: 1, kind: input, shape index: {}]   ;;  %s6856_s2 = inlined_call_operand.vmem [shape: f32[16,128], index: 2, kind: input, shape index: {}]   ;;  %s6857_s3 = inlined_call_operand.vmem [shape: f32[16,1], index: 3, kind: input, shape index: {}]   ;;  %s6858_s4 = inlined_call_operand.vmem [shape: bf16[128,128], index: 4, kind: input, shape index: {}]   ;;  %s6859_s5 = inlined_call_operand.vmem [shape: f32[1,128], index: 5, kind: input, shape index: {}]   ;;  %s6860_s6 = inlined_call_operand.vmem [shape: bf16[128,256], index: 6, kind: input, shape index: {}]   ;;  %s6861_s7 = inlined_call_operand.vmem [shape: f32[1,256], index: 7, kind: input, shape index: {}]   ;;  %s6862_s8 = inlined_call_operand.vmem [shape: bf16[128,128], index: 8, kind: input, shape index: {}]   ;;  %s6863_s9 = inlined_call_operand.vmem [shape: f32[1,128], index: 9, kind: input, shape index: {}]   ;;  %s6864_s10 = inlined_call_operand.vmem [shape: bf16[128,4], index: 10, kind: input, shape index: {}]   ;;  %s6865_s11 = inlined_call_operand.vmem [shape: bf16[4,128], index: 11, kind: input, shape index: {}]   ;;  %s6866_s12 = inlined_call_operand.hbm [shape: f32[16,128], index: 12, kind: output, shape index: {}]  }
   0x1   :  { %6883 = sst [smem:[#allocation84_spill]] %s6854_s0 }
   0x2   :  { %6884 = sst [smem:[#allocation85_spill]] %s6855_s1 }
   0x3   :  { %6885 = sst [smem:[#allocation86_spill]] %s6856_s2 }
   0x4   :  { %6886 = sst [smem:[#allocation87_spill]] %s6857_s3 }
   0x5   :  { %17 = vsyncpa [#allocation3], 0 }
   0x6   :  { %19 = vsyncpa [#allocation3 + $0x1], 0  ;;  %s4256_s21 = smov 0   ;;  %s4258_s22 = smov 0  }
   0x7   :  { %s4260_s23 = smov 0   ;;  %s4262_s24 = smov 0  }
   0x8 LB: > { %s3677_s25 = sadd.s32 4294967295, %s4188_s24   ;;  %s3678_s26 = sadd.s32 4294967294, %s4188_s24   ;;  %s4188_s24 = sphi %s4262_s24, %s7136_s24   ;;  %s4184_s23 = sphi %s4260_s23, %s7135_s23   ;;  %s4180_s22 = sphi %s4258_s22, %s7134_s22   ;;  %s4176_s21 = sphi %s4256_s21, %s7133_s21  }
   0x9   : > { %s4279_s27 = sadd.s32 1, %s4188_s24   ;;  %s289_s28 = sadd.s32 1, %s4184_s23 }
   0xa   : > { %s286_s29 = ssub.s32 %s4188_s24, %s4279_s27  ;;  %p299_p0 = scmp.ne.s32.totalorder %s4184_s23, %s4180_s22 }
   0xb   : > { %p287_p1 = scmp.eq.s32.totalorder %s286_s29, 0  ;;  %p300_p2 = scmp.eq.s32.totalorder %s3677_s25, 1 }
   0xc   : > { %p305_p3 = scmp.ne.s32.totalorder %s4180_s22, %s4176_s21  ;;  %p306_p4 = scmp.eq.s32.totalorder %s3678_s26, 1 }
   0xd   : > { %s4289_s30 = scalar_select %p287_p1, %s4184_s23, %s289_s28  }
   0xe   : > { %p4291_p5 = por %p300_p2, %p299_p0  ;;  %p4295_p6 = por %p306_p4, %p305_p3 }
   0xf   : > { %p3681_p7 = scmp.ge.s32.totalorder %s4188_s24, 1  ;;  %p367_p8 = scmp.lt.s32.totalorder %s4188_s24, 3 }
  0x11   : > { %p368_p9 = pnand %p3681_p7, %p367_p8 }
  0x13   : > { %371 = sbr.rel (%p368_p9) target bundleno = 2105 (0x839), region = 68 }
  0x18   : > { %s4301_s15 = sshll.u32 %s3677_s25, 3  ;;  %vm546_vm0 = vcmask 130048   ;;  %s6889_s0 = sld [smem:[#allocation84_spill]]  ;;  %vm2249_vm1 = vcmask 130112   ;;  %vm2253_vm2 = vcmask 195712   ;;  %vm2257_vm3 = vcmask 261312  }
  0x19   : > { %p411_p10 = scmp.lt.s32.totalorder %s4301_s15, 15  ;;  %s6942_s1 = sld [smem:[#allocation85_spill]]  ;;  %vm2261_vm4 = vcmask 326912   ;;  %vm2265_vm5 = vcmask 392512   ;;  %vm2269_vm6 = vcmask 458112   ;;  %vm2273_vm7 = vcmask 523712  }
  0x1a   : > { %vm2277_vm8 = vcmask 589312   ;;  %vm2281_vm9 = vcmask 654912   ;;  %vm2285_vm10 = vcmask 720512   ;;  %vm2289_vm11 = vcmask 786112   ;;  %s7131_s2 = sld [smem:[#allocation86_spill]]  ;;  %s3614_s29 = scalar_lea.hbm %s6866_s12, %s4301_s15 }
  0x1b   : > { %s412_s16 = scalar_select %p411_p10, %s4301_s15, 15  ;;  %vm2293_vm12 = vcmask 851712   ;;  %vm2297_vm13 = vcmask 917312   ;;  %vm2301_vm14 = vcmask 982912   ;;  %vm2305_vm15 = vcmask 1048512  }
  0x1c   : > { %s7132_s3 = sld [smem:[#allocation87_spill]]  ;;  %s3618_s25 = sshll.u32 %s3614_s29, 4  ;;  %s3619_s25 = int_to_ptr.hbm [resolvable:$true] %s3618_s25 }
  0x1d   : > { %s3859_s17 = sshll.u32 %s412_s16, 7  ;;  %s4146_s28 = scalar_lea.hbm %s6866_s12, 16 }
  0x1e   : > { %s4308_s20 = scalar_lea.vmem %s6889_s0, %s3859_s17 }
  0x1f   : > { %v422_v0 = vld [vmem:[%s4308_s20 + $0x20] sm:$0xff]  ;;  %v420_v1 = vld [vmem:[%s4308_s20 + $0x10] sm:$0xff]  ;;  %v423_v6 = vld [vmem:[%s4308_s20 + $0x28] sm:$0xff] }
  0x20   : > { %v418_v2 = vld [vmem:[%s4308_s20] sm:$0xff]  ;;  %v559_v3 = vsel %vm546_vm0, %v422_v0, 0.0  ;;  %v553_v4 = vsel %vm546_vm0, %v420_v1, 0.0  ;;  %v421_v7 = vld [vmem:[%s4308_s20 + $0x18] sm:$0xff]  ;;  %v419_v8 = vld [vmem:[%s4308_s20 + $0x8] sm:$0xff]  ;;  %v562_v9 = vsel %vm546_vm0, %v423_v6, 0.0 }
  0x21   : > { %v547_v5 = vsel %vm546_vm0, %v418_v2, 0.0  ;;  %560 = vadd.xlane.f32.xlu2 %v559_v3  ;;  %554 = vadd.xlane.f32.xlu1 %v553_v4  ;;  %v556_v10 = vsel %vm546_vm0, %v421_v7, 0.0  ;;  %v550_v11 = vsel %vm546_vm0, %v419_v8, 0.0  ;;  %v426_v12 = vld [vmem:[%s4308_s20 + $0x40] sm:$0xff]  ;;  %v425_v13 = vld [vmem:[%s4308_s20 + $0x38] sm:$0xff]  ;;  %v424_v14 = vld [vmem:[%s4308_s20 + $0x30] sm:$0xff] }
  0x22   : > { %548 = vadd.xlane.f32.xlu0 %v547_v5  ;;  %v571_v15 = vsel %vm546_vm0, %v426_v12, 0.0  ;;  %v568_v16 = vsel %vm546_vm0, %v425_v13, 0.0  ;;  %v565_v17 = vsel %vm546_vm0, %v424_v14, 0.0  ;;  %v429_v18 = vld [vmem:[%s4308_s20 + $0x58] sm:$0xff]  ;;  %v428_v19 = vld [vmem:[%s4308_s20 + $0x50] sm:$0xff]  ;;  %v427_v20 = vld [vmem:[%s4308_s20 + $0x48] sm:$0xff] }
  0x23   : > { %v580_v21 = vsel %vm546_vm0, %v429_v18, 0.0  ;;  %v577_v22 = vsel %vm546_vm0, %v428_v19, 0.0  ;;  %v574_v23 = vsel %vm546_vm0, %v427_v20, 0.0  ;;  %v432_v24 = vld [vmem:[%s4308_s20 + $0x70] sm:$0xff]  ;;  %v431_v25 = vld [vmem:[%s4308_s20 + $0x68] sm:$0xff]  ;;  %v430_v26 = vld [vmem:[%s4308_s20 + $0x60] sm:$0xff] }
  0x24   : > { %v589_v27 = vsel %vm546_vm0, %v432_v24, 0.0  ;;  %v586_v28 = vsel %vm546_vm0, %v431_v25, 0.0  ;;  %v583_v29 = vsel %vm546_vm0, %v430_v26, 0.0  ;;  %v435_v30 = vld [vmem:[%s4308_s20 + $0x88] sm:$0xff]  ;;  %v434_v31 = vld [vmem:[%s4308_s20 + $0x80] sm:$0xff]  ;;  %v433_v32 = vld [vmem:[%s4308_s20 + $0x78] sm:$0xff] }
  0x25   : > { %v598_v33 = vsel %vm546_vm0, %v435_v30, 0.0  ;;  %v595_v34 = vsel %vm546_vm0, %v434_v31, 0.0  ;;  %v592_v35 = vsel %vm546_vm0, %v433_v32, 0.0  ;;  %v438_v36 = vld [vmem:[%s4308_s20 + $0xa0] sm:$0xff]  ;;  %v437_v37 = vld [vmem:[%s4308_s20 + $0x98] sm:$0xff]  ;;  %v436_v38 = vld [vmem:[%s4308_s20 + $0x90] sm:$0xff] }
  0x26   : > { %v607_v39 = vsel %vm546_vm0, %v438_v36, 0.0  ;;  %v604_v40 = vsel %vm546_vm0, %v437_v37, 0.0  ;;  %v601_v41 = vsel %vm546_vm0, %v436_v38, 0.0  ;;  %v441_v42 = vld [vmem:[%s4308_s20 + $0xb8] sm:$0xff]  ;;  %v440_v43 = vld [vmem:[%s4308_s20 + $0xb0] sm:$0xff]  ;;  %v439_v44 = vld [vmem:[%s4308_s20 + $0xa8] sm:$0xff] }
  0x27   : > { %v616_v45 = vsel %vm546_vm0, %v441_v42, 0.0  ;;  %v613_v46 = vsel %vm546_vm0, %v440_v43, 0.0  ;;  %v610_v47 = vsel %vm546_vm0, %v439_v44, 0.0  ;;  %v444_v48 = vld [vmem:[%s4308_s20 + $0xd0] sm:$0xff]  ;;  %v443_v49 = vld [vmem:[%s4308_s20 + $0xc8] sm:$0xff]  ;;  %v442_v50 = vld [vmem:[%s4308_s20 + $0xc0] sm:$0xff] }
  0x28   : > { %v625_v51 = vsel %vm546_vm0, %v444_v48, 0.0  ;;  %v622_v52 = vsel %vm546_vm0, %v443_v49, 0.0  ;;  %v619_v53 = vsel %vm546_vm0, %v442_v50, 0.0  ;;  %v447_v54 = vld [vmem:[%s4308_s20 + $0xe8] sm:$0xff]  ;;  %v446_v55 = vld [vmem:[%s4308_s20 + $0xe0] sm:$0xff]  ;;  %v445_v56 = vld [vmem:[%s4308_s20 + $0xd8] sm:$0xff] }
  0x29   : > { %563 = vadd.xlane.f32.xlu2 %v562_v9  ;;  %557 = vadd.xlane.f32.xlu1 %v556_v10  ;;  %v634_v57 = vsel %vm546_vm0, %v447_v54, 0.0  ;;  %v631_v58 = vsel %vm546_vm0, %v446_v55, 0.0  ;;  %v628_v59 = vsel %vm546_vm0, %v445_v56, 0.0  ;;  %v450_v60 = vld [vmem:[%s4308_s20 + $0x100] sm:$0xff]  ;;  %v449_v61 = vld [vmem:[%s4308_s20 + $0xf8] sm:$0xff]  ;;  %v448_v62 = vld [vmem:[%s4308_s20 + $0xf0] sm:$0xff] }
  0x2a   : > { %551 = vadd.xlane.f32.xlu0 %v550_v11  ;;  %v643_v63 = vsel %vm546_vm0, %v450_v60, 0.0  ;;  %v640_v0 = vsel %vm546_vm0, %v449_v61, 0.0  ;;  %v637_v1 = vsel %vm546_vm0, %v448_v62, 0.0  ;;  %v453_v2 = vld [vmem:[%s4308_s20 + $0x118] sm:$0xff]  ;;  %v452_v3 = vld [vmem:[%s4308_s20 + $0x110] sm:$0xff]  ;;  %v451_v4 = vld [vmem:[%s4308_s20 + $0x108] sm:$0xff] }
  0x2b   : > { %v652_v5 = vsel %vm546_vm0, %v453_v2, 0.0  ;;  %v649_v6 = vsel %vm546_vm0, %v452_v3, 0.0  ;;  %v646_v7 = vsel %vm546_vm0, %v451_v4, 0.0  ;;  %v456_v8 = vld [vmem:[%s4308_s20 + $0x130] sm:$0xff]  ;;  %v455_v9 = vld [vmem:[%s4308_s20 + $0x128] sm:$0xff]  ;;  %v454_v10 = vld [vmem:[%s4308_s20 + $0x120] sm:$0xff] }
  0x2c   : > { %v661_v11 = vsel %vm546_vm0, %v456_v8, 0.0  ;;  %v658_v12 = vsel %vm546_vm0, %v455_v9, 0.0  ;;  %v655_v13 = vsel %vm546_vm0, %v454_v10, 0.0  ;;  %v459_v14 = vld [vmem:[%s4308_s20 + $0x148] sm:$0xff]  ;;  %v462_v20 = vld [vmem:[%s4308_s20 + $0x160] sm:$0xff]  ;;  %v465_v26 = vld [vmem:[%s4308_s20 + $0x178] sm:$0xff] }
  0x2d   : > { %v688_v32 = vsel %vm546_vm0, %v465_v26, 0.0  ;;  %v467_v36 = vld [vmem:[%s4308_s20 + $0x188] sm:$0xff]  ;;  %v466_v38 = vld [vmem:[%s4308_s20 + $0x180] sm:$0xff]  ;;  %v473_v54 = vld [vmem:[%s4308_s20 + $0x1b8] sm:$0xff] }
  0x2e   : > { %v694_v42 = vsel %vm546_vm0, %v467_v36, 0.0  ;;  %v691_v43 = vsel %vm546_vm0, %v466_v38, 0.0  ;;  %v471_v44 = vld [vmem:[%s4308_s20 + $0x1a8] sm:$0xff]  ;;  %v472_v56 = vld [vmem:[%s4308_s20 + $0x1b0] sm:$0xff]  ;;  %v712_v60 = vsel %vm546_vm0, %v473_v54, 0.0  ;;  %v477_v62 = vld [vmem:[%s4308_s20 + $0x1d8] sm:$0xff] }
  0x2f   : > { %v706_v50 = vsel %vm546_vm0, %v471_v44, 0.0  ;;  %v709_v61 = vsel %vm546_vm0, %v472_v56, 0.0  ;;  %v724_v4 = vsel %vm546_vm0, %v477_v62, 0.0  ;;  %v479_v8 = vld [vmem:[%s4308_s20 + $0x1e8] sm:$0xff]  ;;  %v478_v10 = vld [vmem:[%s4308_s20 + $0x1e0] sm:$0xff]  ;;  %v485_v26 = vld [vmem:[%s4308_s20 + $0x218] sm:$0xff] }
  0x30   : > { %v489_v38 = vld [vmem:[%s4308_s20 + $0x238] sm:$0xff]  ;;  %v490_v56 = vld [vmem:[%s4308_s20 + $0x240] sm:$0xff] }
  0x31   : > { %572 = vadd.xlane.f32.xlu2 %v571_v15  ;;  %569 = vadd.xlane.f32.xlu1 %v568_v16  ;;  %v458_v15 = vld [vmem:[%s4308_s20 + $0x140] sm:$0xff]  ;;  %v457_v16 = vld [vmem:[%s4308_s20 + $0x138] sm:$0xff] }
  0x32   : > { %566 = vadd.xlane.f32.xlu0 %v565_v17  ;;  %v670_v17 = vsel %vm546_vm0, %v459_v14, 0.0  ;;  %v667_v18 = vsel %vm546_vm0, %v458_v15, 0.0  ;;  %v664_v19 = vsel %vm546_vm0, %v457_v16, 0.0  ;;  %v730_v14 = vsel %vm546_vm0, %v479_v8, 0.0  ;;  %v483_v16 = vld [vmem:[%s4308_s20 + $0x208] sm:$0xff] }
  0x33   : > { %v727_v15 = vsel %vm546_vm0, %v478_v10, 0.0 }
  0x39   : > { %581 = vadd.xlane.f32.xlu2 %v580_v21  ;;  %578 = vadd.xlane.f32.xlu1 %v577_v22  ;;  %v461_v21 = vld [vmem:[%s4308_s20 + $0x158] sm:$0xff]  ;;  %v460_v22 = vld [vmem:[%s4308_s20 + $0x150] sm:$0xff] }
  0x3a   : > { %575 = vadd.xlane.f32.xlu0 %v574_v23  ;;  %v679_v23 = vsel %vm546_vm0, %v462_v20, 0.0  ;;  %v676_v24 = vsel %vm546_vm0, %v461_v21, 0.0  ;;  %v673_v25 = vsel %vm546_vm0, %v460_v22, 0.0  ;;  %v742_v22 = vsel %vm546_vm0, %v483_v16, 0.0  ;;  %v497_v16 = vld [vmem:[%s4308_s20 + $0x278] sm:$0xff] }
  0x41   : > { %590 = vadd.xlane.f32.xlu2 %v589_v27  ;;  %587 = vadd.xlane.f32.xlu1 %v586_v28  ;;  %v464_v27 = vld [vmem:[%s4308_s20 + $0x170] sm:$0xff] }
  0x42   : > { %584 = vadd.xlane.f32.xlu0 %v583_v29  ;;  %v463_v29 = vld [vmem:[%s4308_s20 + $0x168] sm:$0xff] }
  0x49   : > { %599 = vadd.xlane.f32.xlu2 %v598_v33  ;;  %596 = vadd.xlane.f32.xlu1 %v595_v34  ;;  %v685_v33 = vsel %vm546_vm0, %v464_v27, 0.0  ;;  %v682_v34 = vsel %vm546_vm0, %v463_v29, 0.0  ;;  %v484_v29 = vld [vmem:[%s4308_s20 + $0x210] sm:$0xff] }
  0x4a   : > { %593 = vadd.xlane.f32.xlu0 %v592_v35  ;;  %v468_v35 = vld [vmem:[%s4308_s20 + $0x190] sm:$0xff]  ;;  %v745_v36 = vsel %vm546_vm0, %v484_v29, 0.0  ;;  %v501_v29 = vld [vmem:[%s4308_s20 + $0x298] sm:$0xff] }
  0x51   : > { %608 = vadd.xlane.f32.xlu2 %v607_v39  ;;  %605 = vadd.xlane.f32.xlu1 %v604_v40 }
  0x52   : > { %602 = vadd.xlane.f32.xlu0 %v601_v41  ;;  %v697_v41 = vsel %vm546_vm0, %v468_v35, 0.0  ;;  %v748_v35 = vsel %vm546_vm0, %v485_v26, 0.0 }
  0x59   : > { %617 = vadd.xlane.f32.xlu2 %v616_v45  ;;  %614 = vadd.xlane.f32.xlu1 %v613_v46  ;;  %v470_v45 = vld [vmem:[%s4308_s20 + $0x1a0] sm:$0xff] }
  0x5a   : > { %611 = vadd.xlane.f32.xlu0 %v610_v47  ;;  %v469_v47 = vld [vmem:[%s4308_s20 + $0x198] sm:$0xff] }
  0x61   : > { %626 = vadd.xlane.f32.xlu2 %v625_v51  ;;  %623 = vadd.xlane.f32.xlu1 %v622_v52  ;;  %v703_v51 = vsel %vm546_vm0, %v470_v45, 0.0  ;;  %v700_v52 = vsel %vm546_vm0, %v469_v47, 0.0  ;;  %v760_v47 = vsel %vm546_vm0, %v489_v38, 0.0 }
  0x62   : > { %620 = vadd.xlane.f32.xlu0 %v619_v53  ;;  %v474_v53 = vld [vmem:[%s4308_s20 + $0x1c0] sm:$0xff] }
  0x69   : > { %635 = vadd.xlane.f32.xlu2 %v634_v57  ;;  %632 = vadd.xlane.f32.xlu1 %v631_v58 }
  0x6a   : > { %629 = vadd.xlane.f32.xlu0 %v628_v59  ;;  %v715_v59 = vsel %vm546_vm0, %v474_v53, 0.0  ;;  %v491_v53 = vld [vmem:[%s4308_s20 + $0x248] sm:$0xff] }
  0x6b   : > { %v766_v62 = vsel %vm546_vm0, %v491_v53, 0.0 }
  0x71   : > { %644 = vadd.xlane.f32.xlu2 %v643_v63  ;;  %641 = vadd.xlane.f32.xlu1 %v640_v0  ;;  %v476_v63 = vld [vmem:[%s4308_s20 + $0x1d0] sm:$0xff] }
  0x72   : > { %638 = vadd.xlane.f32.xlu0 %v637_v1  ;;  %v475_v1 = vld [vmem:[%s4308_s20 + $0x1c8] sm:$0xff] }
  0x79   : > { %653 = vadd.xlane.f32.xlu2 %v652_v5  ;;  %650 = vadd.xlane.f32.xlu1 %v649_v6  ;;  %v721_v5 = vsel %vm546_vm0, %v476_v63, 0.0  ;;  %v718_v6 = vsel %vm546_vm0, %v475_v1, 0.0  ;;  %v763_v63 = vsel %vm546_vm0, %v490_v56, 0.0  ;;  %v495_v1 = vld [vmem:[%s4308_s20 + $0x268] sm:$0xff]  ;;  %v502_v56 = vld [vmem:[%s4308_s20 + $0x2a0] sm:$0xff] }
  0x7a   : > { %647 = vadd.xlane.f32.xlu0 %v646_v7  ;;  %v480_v7 = vld [vmem:[%s4308_s20 + $0x1f0] sm:$0xff]  ;;  %v778_v10 = vsel %vm546_vm0, %v495_v1, 0.0 }
  0x81   : > { %662 = vadd.xlane.f32.xlu2 %v661_v11  ;;  %659 = vadd.xlane.f32.xlu1 %v658_v12 }
  0x82   : > { %656 = vadd.xlane.f32.xlu0 %v655_v13  ;;  %v733_v13 = vsel %vm546_vm0, %v480_v7, 0.0 }
  0x89   : > { %671 = vadd.xlane.f32.xlu2 %v670_v17  ;;  %668 = vadd.xlane.f32.xlu1 %v667_v18  ;;  %v482_v17 = vld [vmem:[%s4308_s20 + $0x200] sm:$0xff] }
  0x8a   : > { %665 = vadd.xlane.f32.xlu0 %v664_v19  ;;  %v481_v19 = vld [vmem:[%s4308_s20 + $0x1f8] sm:$0xff] }
  0x91   : > { %680 = vadd.xlane.f32.xlu2 %v679_v23  ;;  %677 = vadd.xlane.f32.xlu1 %v676_v24  ;;  %v739_v23 = vsel %vm546_vm0, %v482_v17, 0.0  ;;  %v736_v24 = vsel %vm546_vm0, %v481_v19, 0.0  ;;  %v496_v19 = vld [vmem:[%s4308_s20 + $0x270] sm:$0xff] }
  0x92   : > { %674 = vadd.xlane.f32.xlu0 %v673_v25  ;;  %v486_v25 = vld [vmem:[%s4308_s20 + $0x220] sm:$0xff]  ;;  %v781_v26 = vsel %vm546_vm0, %v496_v19, 0.0 }
  0x94   : > { %v4402_v28 = vpop.xlane.xlu2 %560  ;;  %v4405_v30 = vpop.xlane.xlu1 %554 }
  0x95   : > { %v4407_v31 = vpop.xlane.xlu0 %548 }
  0x99   : > { %689 = vadd.xlane.f32.xlu2 %v688_v32  ;;  %686 = vadd.xlane.f32.xlu1 %v685_v33 }
  0x9a   : > { %683 = vadd.xlane.f32.xlu0 %v682_v34  ;;  %v751_v34 = vsel %vm546_vm0, %v486_v25, 0.0  ;;  %v784_v25 = vsel %vm546_vm0, %v497_v16, 0.0 }
  0x9c   : > { %v4414_v37 = vpop.xlane.xlu2 %563  ;;  %v4417_v39 = vpop.xlane.xlu1 %557 }
  0x9d   : > { %v4419_v40 = vpop.xlane.xlu0 %551 }
  0xa1   : > { %698 = vadd.xlane.f32.xlu2 %v697_v41  ;;  %695 = vadd.xlane.f32.xlu1 %v694_v42  ;;  %v488_v41 = vld [vmem:[%s4308_s20 + $0x230] sm:$0xff] }
  0xa2   : > { %692 = vadd.xlane.f32.xlu0 %v691_v43  ;;  %v487_v43 = vld [vmem:[%s4308_s20 + $0x228] sm:$0xff] }
  0xa4   : > { %v4426_v46 = vpop.xlane.xlu2 %572  ;;  %v4429_v48 = vpop.xlane.xlu1 %569 }
  0xa5   : > { %6890 = vst [vmem:[#allocation5_spill] sm:$0xff] %v4426_v46  ;;  %v4431_v49 = vpop.xlane.xlu0 %566 }
  0xa9   : > { %707 = vadd.xlane.f32.xlu2 %v706_v50  ;;  %704 = vadd.xlane.f32.xlu1 %v703_v51  ;;  %v757_v50 = vsel %vm546_vm0, %v488_v41, 0.0  ;;  %v754_v51 = vsel %vm546_vm0, %v487_v43, 0.0  ;;  %v796_v43 = vsel %vm546_vm0, %v501_v29, 0.0  ;;  %v509_v29 = vld [vmem:[%s4308_s20 + $0x2d8] sm:$0xff] }
  0xaa   : > { %701 = vadd.xlane.f32.xlu0 %v700_v52  ;;  %v492_v52 = vld [vmem:[%s4308_s20 + $0x250] sm:$0xff] }
  0xac   : > { %v4438_v55 = vpop.xlane.xlu2 %581  ;;  %v4441_v57 = vpop.xlane.xlu1 %578 }
  0xad   : > { %6891 = vst [vmem:[#allocation6_spill] sm:$0xff] %v4438_v55  ;;  %v4443_v58 = vpop.xlane.xlu0 %575 }
  0xae   : > { %6892 = vst [vmem:[#allocation7_spill] sm:$0xff] %v4441_v57 }
  0xaf   : > { %6893 = vst [vmem:[#allocation8_spill] sm:$0xff] %v4443_v58 }
  0xb1   : > { %716 = vadd.xlane.f32.xlu2 %v715_v59  ;;  %713 = vadd.xlane.f32.xlu1 %v712_v60 }
  0xb2   : > { %710 = vadd.xlane.f32.xlu0 %v709_v61  ;;  %v769_v61 = vsel %vm546_vm0, %v492_v52, 0.0  ;;  %v503_v52 = vld [vmem:[%s4308_s20 + $0x2a8] sm:$0xff] }
  0xb3   : > { %v802_v1 = vsel %vm546_vm0, %v503_v52, 0.0 }
  0xb4   : > { %v4450_v0 = vpop.xlane.xlu2 %590  ;;  %v4453_v2 = vpop.xlane.xlu1 %587 }
  0xb5   : > { %6894 = vst [vmem:[#allocation9_spill] sm:$0xff] %v4450_v0  ;;  %v4455_v3 = vpop.xlane.xlu0 %584 }
  0xb6   : > { %6895 = vst [vmem:[#allocation10_spill] sm:$0xff] %v4453_v2 }
  0xb7   : > { %6896 = vst [vmem:[#allocation11_spill] sm:$0xff] %v4455_v3 }
  0xb9   : > { %725 = vadd.xlane.f32.xlu2 %v724_v4  ;;  %722 = vadd.xlane.f32.xlu1 %v721_v5  ;;  %v494_v4 = vld [vmem:[%s4308_s20 + $0x260] sm:$0xff] }
  0xba   : > { %719 = vadd.xlane.f32.xlu0 %v718_v6  ;;  %v493_v6 = vld [vmem:[%s4308_s20 + $0x258] sm:$0xff] }
  0xbc   : > { %v4462_v9 = vpop.xlane.xlu2 %599  ;;  %v4465_v11 = vpop.xlane.xlu1 %596 }
  0xbd   : > { %v4467_v12 = vpop.xlane.xlu0 %593 }
  0xbe   : > { %6897 = vst [vmem:[#allocation12_spill] sm:$0xff] %v4467_v12  ;;  %v523_v12 = vld [vmem:[%s4308_s20 + $0x348] sm:$0xff] }
  0xc1   : > { %734 = vadd.xlane.f32.xlu2 %v733_v13  ;;  %731 = vadd.xlane.f32.xlu1 %v730_v14  ;;  %v775_v13 = vsel %vm546_vm0, %v494_v4, 0.0  ;;  %v772_v14 = vsel %vm546_vm0, %v493_v6, 0.0  ;;  %v799_v4 = vsel %vm546_vm0, %v502_v56, 0.0  ;;  %v507_v6 = vld [vmem:[%s4308_s20 + $0x2c8] sm:$0xff]  ;;  %v513_v56 = vld [vmem:[%s4308_s20 + $0x2f8] sm:$0xff] }
  0xc2   : > { %728 = vadd.xlane.f32.xlu0 %v727_v15  ;;  %v498_v15 = vld [vmem:[%s4308_s20 + $0x280] sm:$0xff]  ;;  %v814_v19 = vsel %vm546_vm0, %v507_v6, 0.0 }
  0xc4   : > { %v4474_v18 = vpop.xlane.xlu2 %608  ;;  %v4477_v20 = vpop.xlane.xlu1 %605 }
  0xc5   : > { %6898 = vst [vmem:[#allocation13_spill] sm:$0xff] %v4474_v18  ;;  %v4479_v21 = vpop.xlane.xlu0 %602 }
  0xc9   : > { %743 = vadd.xlane.f32.xlu2 %v742_v22  ;;  %740 = vadd.xlane.f32.xlu1 %v739_v23 }
  0xca   : > { %737 = vadd.xlane.f32.xlu0 %v736_v24  ;;  %v787_v24 = vsel %vm546_vm0, %v498_v15, 0.0 }
  0xcc   : > { %v4486_v27 = vpop.xlane.xlu2 %617  ;;  %v4489_v32 = vpop.xlane.xlu1 %614 }
  0xcd   : > { %v4491_v33 = vpop.xlane.xlu0 %611 }
  0xce   : > { %6899 = vst [vmem:[#allocation14_spill] sm:$0xff] %v4491_v33 }
  0xd1   : > { %752 = vadd.xlane.f32.xlu2 %v751_v34  ;;  %749 = vadd.xlane.f32.xlu1 %v748_v35  ;;  %v500_v34 = vld [vmem:[%s4308_s20 + $0x290] sm:$0xff] }
  0xd2   : > { %746 = vadd.xlane.f32.xlu0 %v745_v36  ;;  %v499_v36 = vld [vmem:[%s4308_s20 + $0x288] sm:$0xff] }
  0xd4   : > { %v4498_v42 = vpop.xlane.xlu2 %626  ;;  %v4501_v44 = vpop.xlane.xlu1 %623 }
  0xd5   : > { %6900 = vst [vmem:[#allocation15_spill] sm:$0xff] %v4498_v42  ;;  %v4503_v45 = vpop.xlane.xlu0 %620 }
  0xd6   : > { %6901 = vst [vmem:[#allocation16_spill] sm:$0xff] %v4501_v44 }
  0xd7   : > { %6902 = vst [vmem:[#allocation17_spill] sm:$0xff] %v4503_v45 }
  0xd9   : > { %761 = vadd.xlane.f32.xlu2 %v760_v47  ;;  %758 = vadd.xlane.f32.xlu1 %v757_v50  ;;  %v793_v47 = vsel %vm546_vm0, %v500_v34, 0.0  ;;  %v790_v50 = vsel %vm546_vm0, %v499_v36, 0.0  ;;  %v508_v36 = vld [vmem:[%s4308_s20 + $0x2d0] sm:$0xff] }
  0xda   : > { %755 = vadd.xlane.f32.xlu0 %v754_v51  ;;  %v504_v51 = vld [vmem:[%s4308_s20 + $0x2b0] sm:$0xff]  ;;  %v817_v52 = vsel %vm546_vm0, %v508_v36, 0.0  ;;  %v514_v36 = vld [vmem:[%s4308_s20 + $0x300] sm:$0xff] }
  0xdc   : > { %v4510_v54 = vpop.xlane.xlu2 %635  ;;  %v4513_v59 = vpop.xlane.xlu1 %632 }
  0xdd   : > { %6903 = vst [vmem:[#allocation18_spill] sm:$0xff] %v4510_v54  ;;  %v4515_v60 = vpop.xlane.xlu0 %629 }
  0xde   : > { %6904 = vst [vmem:[#allocation19_spill] sm:$0xff] %v4513_v59 }
  0xdf   : > { %6905 = vst [vmem:[#allocation20_spill] sm:$0xff] %v4515_v60 }
  0xe1   : > { %770 = vadd.xlane.f32.xlu2 %v769_v61  ;;  %767 = vadd.xlane.f32.xlu1 %v766_v62 }
  0xe2   : > { %764 = vadd.xlane.f32.xlu0 %v763_v63  ;;  %v805_v63 = vsel %vm546_vm0, %v504_v51, 0.0  ;;  %v820_v51 = vsel %vm546_vm0, %v509_v29, 0.0 }
  0xe4   : > { %v4522_v5 = vpop.xlane.xlu2 %644  ;;  %v4525_v7 = vpop.xlane.xlu1 %641 }
  0xe5   : > { %6906 = vst [vmem:[#allocation21_spill] sm:$0xff] %v4525_v7  ;;  %v4527_v8 = vpop.xlane.xlu0 %638 }
  0xe6   : > { %6907 = vst [vmem:[#allocation22_spill] sm:$0xff] %v4527_v8  ;;  %v520_v8 = vld [vmem:[%s4308_s20 + $0x330] sm:$0xff] }
  0xe9   : > { %779 = vadd.xlane.f32.xlu2 %v778_v10  ;;  %776 = vadd.xlane.f32.xlu1 %v775_v13  ;;  %v506_v10 = vld [vmem:[%s4308_s20 + $0x2c0] sm:$0xff] }
  0xea   : > { %773 = vadd.xlane.f32.xlu0 %v772_v14  ;;  %v505_v14 = vld [vmem:[%s4308_s20 + $0x2b8] sm:$0xff] }
  0xec   : > { %v4534_v17 = vpop.xlane.xlu2 %653  ;;  %v4537_v22 = vpop.xlane.xlu1 %650 }
  0xed   : > { %6908 = vst [vmem:[#allocation23_spill] sm:$0xff] %v4534_v17  ;;  %v4539_v23 = vpop.xlane.xlu0 %647 }
  0xee   : > { %6909 = vst [vmem:[#allocation24_spill] sm:$0xff] %v4537_v22  ;;  %v964_v17 = vmul.f32 0.0625, %v4539_v23 }
  0xf1   : > { %788 = vadd.xlane.f32.xlu2 %v787_v24  ;;  %785 = vadd.xlane.f32.xlu1 %v784_v25  ;;  %v811_v24 = vsel %vm546_vm0, %v506_v10, 0.0  ;;  %v808_v25 = vsel %vm546_vm0, %v505_v14, 0.0  ;;  %v832_v14 = vsel %vm546_vm0, %v513_v56, 0.0 }
  0xf2   : > { %782 = vadd.xlane.f32.xlu0 %v781_v26  ;;  %v510_v26 = vld [vmem:[%s4308_s20 + $0x2e0] sm:$0xff] }
  0xf4   : > { %v4546_v35 = vpop.xlane.xlu2 %662  ;;  %v4549_v38 = vpop.xlane.xlu1 %659 }
  0xf5   : > { %6910 = vst [vmem:[#allocation25_spill] sm:$0xff] %v4546_v35  ;;  %v4551_v41 = vpop.xlane.xlu0 %656  ;;  %v931_v35 = vmul.f32 0.0625, %v4407_v31  ;;  %v934_v31 = vmul.f32 0.0625, %v4417_v39 }
  0xf9   : > { %797 = vadd.xlane.f32.xlu2 %v796_v43  ;;  %794 = vadd.xlane.f32.xlu1 %v793_v47 }
  0xfa   : > { %791 = vadd.xlane.f32.xlu0 %v790_v50  ;;  %v823_v50 = vsel %vm546_vm0, %v510_v26, 0.0  ;;  %v515_v26 = vld [vmem:[%s4308_s20 + $0x308] sm:$0xff] }
  0xfb   : > { %v838_v56 = vsel %vm546_vm0, %v515_v26, 0.0 }
  0xfc   : > { %v4558_v53 = vpop.xlane.xlu2 %671  ;;  %v4561_v61 = vpop.xlane.xlu1 %668 }
  0xfd   : > { %6911 = vst [vmem:[#allocation26_spill] sm:$0xff] %v4558_v53  ;;  %v4563_v62 = vpop.xlane.xlu0 %665 }
  0xfe   : > { %6912 = vst [vmem:[#allocation27_spill] sm:$0xff] %v4561_v61 }
  0xff   : > { %6913 = vst [vmem:[#allocation28_spill] sm:$0xff] %v4563_v62  ;;  %v932_v62 = vmul.f32 0.0625, %v4419_v40  ;;  %v933_v40 = vmul.f32 0.0625, %v4405_v30 }
 0x101   : > { %806 = vadd.xlane.f32.xlu2 %v805_v63  ;;  %803 = vadd.xlane.f32.xlu1 %v802_v1  ;;  %v512_v63 = vld [vmem:[%s4308_s20 + $0x2f0] sm:$0xff] }
 0x102   : > { %800 = vadd.xlane.f32.xlu0 %v799_v4  ;;  %v511_v4 = vld [vmem:[%s4308_s20 + $0x2e8] sm:$0xff] }
 0x104   : > { %v4570_v13 = vpop.xlane.xlu2 %680  ;;  %v4573_v15 = vpop.xlane.xlu1 %677 }
 0x105   : > { %6914 = vst [vmem:[#allocation29_spill] sm:$0xff] %v4570_v13  ;;  %v4575_v16 = vpop.xlane.xlu0 %674 }
 0x106   : > { %6915 = vst [vmem:[#allocation30_spill] sm:$0xff] %v4573_v15  ;;  %v535_v15 = vld [vmem:[%s4308_s20 + $0x3a8] sm:$0xff] }
 0x107   : > { %6916 = vst [vmem:[#allocation31_spill] sm:$0xff] %v4575_v16 }
 0x109   : > { %815 = vadd.xlane.f32.xlu2 %v814_v19  ;;  %812 = vadd.xlane.f32.xlu1 %v811_v24  ;;  %v829_v19 = vsel %vm546_vm0, %v512_v63, 0.0  ;;  %v826_v24 = vsel %vm546_vm0, %v511_v4, 0.0  ;;  %v835_v63 = vsel %vm546_vm0, %v514_v36, 0.0  ;;  %v519_v4 = vld [vmem:[%s4308_s20 + $0x328] sm:$0xff] }
 0x10a   : > { %809 = vadd.xlane.f32.xlu0 %v808_v25  ;;  %v516_v25 = vld [vmem:[%s4308_s20 + $0x310] sm:$0xff] }
 0x10c   : > { %v4582_v34 = vpop.xlane.xlu2 %689  ;;  %v4585_v43 = vpop.xlane.xlu1 %686 }
 0x10d   : > { %6917 = vst [vmem:[#allocation32_spill] sm:$0xff] %v4582_v34  ;;  %v4587_v47 = vpop.xlane.xlu0 %683 }
 0x10e   : > { %6918 = vst [vmem:[#allocation33_spill] sm:$0xff] %v4585_v43 }
 0x10f   : > { %6919 = vst [vmem:[#allocation34_spill] sm:$0xff] %v4587_v47  ;;  %v529_v47 = vld [vmem:[%s4308_s20 + $0x378] sm:$0xff] }
 0x111   : > { %824 = vadd.xlane.f32.xlu2 %v823_v50  ;;  %821 = vadd.xlane.f32.xlu1 %v820_v51 }
 0x112   : > { %818 = vadd.xlane.f32.xlu0 %v817_v52  ;;  %v841_v52 = vsel %vm546_vm0, %v516_v25, 0.0  ;;  %v850_v25 = vsel %vm546_vm0, %v519_v4, 0.0 }
 0x114   : > { %v4594_v1 = vpop.xlane.xlu2 %698  ;;  %v4597_v6 = vpop.xlane.xlu1 %695 }
 0x115   : > { %v4599_v10 = vpop.xlane.xlu0 %692 }
 0x119   : > { %833 = vadd.xlane.f32.xlu2 %v832_v14  ;;  %830 = vadd.xlane.f32.xlu1 %v829_v19  ;;  %v518_v14 = vld [vmem:[%s4308_s20 + $0x320] sm:$0xff] }
 0x11a   : > { %827 = vadd.xlane.f32.xlu0 %v826_v24  ;;  %v517_v24 = vld [vmem:[%s4308_s20 + $0x318] sm:$0xff]  ;;  %v847_v26 = vsel %vm546_vm0, %v518_v14, 0.0 }
 0x11b   : > { %v844_v36 = vsel %vm546_vm0, %v517_v24, 0.0  ;;  %v853_v24 = vsel %vm546_vm0, %v520_v8, 0.0  ;;  %v862_v8 = vsel %vm546_vm0, %v523_v12, 0.0 }
 0x11c   : > { %v4606_v29 = vpop.xlane.xlu2 %707  ;;  %v4609_v50 = vpop.xlane.xlu1 %704 }
 0x11d   : > { %v4611_v51 = vpop.xlane.xlu0 %701 }
 0x11e   : > { %v982_v22 = vmul.f32 0.0625, %v4611_v51 }
 0x121   : > { %842 = vadd.xlane.f32.xlu2 %v841_v52  ;;  %839 = vadd.xlane.f32.xlu1 %v838_v56  ;;  %v522_v52 = vld [vmem:[%s4308_s20 + $0x340] sm:$0xff]  ;;  %v521_v56 = vld [vmem:[%s4308_s20 + $0x338] sm:$0xff] }
 0x122   : > { %836 = vadd.xlane.f32.xlu0 %v835_v63  ;;  %v859_v4 = vsel %vm546_vm0, %v522_v52, 0.0  ;;  %v856_v14 = vsel %vm546_vm0, %v521_v56, 0.0 }
 0x124   : > { %v4618_v19 = vpop.xlane.xlu2 %716  ;;  %v4621_v43 = vpop.xlane.xlu1 %713 }
 0x125   : > { %6920 = vst [vmem:[#allocation35_spill] sm:$0xff] %v4621_v43  ;;  %v4623_v34 = vpop.xlane.xlu0 %710 }
 0x126   : > { %6921 = vst [vmem:[#allocation36_spill] sm:$0xff] %v4623_v34 }
 0x129   : > { %851 = vadd.xlane.f32.xlu2 %v850_v25  ;;  %848 = vadd.xlane.f32.xlu1 %v847_v26  ;;  %v525_v25 = vld [vmem:[%s4308_s20 + $0x358] sm:$0xff]  ;;  %v524_v26 = vld [vmem:[%s4308_s20 + $0x350] sm:$0xff] }
 0x12a   : > { %845 = vadd.xlane.f32.xlu0 %v844_v36  ;;  %v868_v52 = vsel %vm546_vm0, %v525_v25, 0.0  ;;  %v865_v56 = vsel %vm546_vm0, %v524_v26, 0.0 }
 0x12c   : > { %v4630_v63 = vpop.xlane.xlu2 %725  ;;  %v4633_v7 = vpop.xlane.xlu1 %722 }
 0x12d   : > { %6922 = vst [vmem:[#allocation37_spill] sm:$0xff] %v4630_v63  ;;  %v4635_v0 = vpop.xlane.xlu0 %719 }
 0x12e   : > { %6923 = vst [vmem:[#allocation38_spill] sm:$0xff] %v4633_v7 }
 0x131   : > { %860 = vadd.xlane.f32.xlu2 %v859_v4  ;;  %857 = vadd.xlane.f32.xlu1 %v856_v14  ;;  %v528_v4 = vld [vmem:[%s4308_s20 + $0x370] sm:$0xff]  ;;  %v527_v14 = vld [vmem:[%s4308_s20 + $0x368] sm:$0xff] }
 0x132   : > { %854 = vadd.xlane.f32.xlu0 %v853_v24  ;;  %v877_v25 = vsel %vm546_vm0, %v528_v4, 0.0  ;;  %v874_v26 = vsel %vm546_vm0, %v527_v14, 0.0 }
 0x134   : > { %v4642_v36 = vpop.xlane.xlu2 %734  ;;  %v4645_v7 = vpop.xlane.xlu1 %731 }
 0x135   : > { %6924 = vst [vmem:[#allocation39_spill] sm:$0xff] %v4642_v36  ;;  %v4647_v63 = vpop.xlane.xlu0 %728  ;;  %v526_v36 = vld [vmem:[%s4308_s20 + $0x360] sm:$0xff] }
 0x136   : > { %6925 = vst [vmem:[#allocation40_spill] sm:$0xff] %v4645_v7  ;;  %v871_v12 = vsel %vm546_vm0, %v526_v36, 0.0  ;;  %v880_v36 = vsel %vm546_vm0, %v529_v47, 0.0 }
 0x137   : > { %6926 = vst [vmem:[#allocation41_spill] sm:$0xff] %v4647_v63 }
 0x139   : > { %869 = vadd.xlane.f32.xlu2 %v868_v52  ;;  %866 = vadd.xlane.f32.xlu1 %v865_v56  ;;  %v531_v52 = vld [vmem:[%s4308_s20 + $0x388] sm:$0xff]  ;;  %v530_v56 = vld [vmem:[%s4308_s20 + $0x380] sm:$0xff] }
 0x13a   : > { %863 = vadd.xlane.f32.xlu0 %v862_v8  ;;  %v886_v4 = vsel %vm546_vm0, %v531_v52, 0.0  ;;  %v883_v14 = vsel %vm546_vm0, %v530_v56, 0.0 }
 0x13c   : > { %v4654_v24 = vpop.xlane.xlu2 %743  ;;  %v4657_v7 = vpop.xlane.xlu1 %740 }
 0x13d   : > { %v4659_v63 = vpop.xlane.xlu0 %737 }
 0x13e   : > { %6927 = vst [vmem:[#allocation42_spill] sm:$0xff] %v4659_v63 }
 0x141   : > { %878 = vadd.xlane.f32.xlu2 %v877_v25  ;;  %875 = vadd.xlane.f32.xlu1 %v874_v26  ;;  %v534_v25 = vld [vmem:[%s4308_s20 + $0x3a0] sm:$0xff]  ;;  %v533_v26 = vld [vmem:[%s4308_s20 + $0x398] sm:$0xff] }
 0x142   : > { %872 = vadd.xlane.f32.xlu0 %v871_v12  ;;  %v895_v52 = vsel %vm546_vm0, %v534_v25, 0.0  ;;  %v892_v56 = vsel %vm546_vm0, %v533_v26, 0.0 }
 0x144   : > { %v4666_v8 = vpop.xlane.xlu2 %752  ;;  %v4669_v13 = vpop.xlane.xlu1 %749 }
 0x145   : > { %6928 = vst [vmem:[#allocation43_spill] sm:$0xff] %v4666_v8  ;;  %v4671_v63 = vpop.xlane.xlu0 %746  ;;  %v532_v8 = vld [vmem:[%s4308_s20 + $0x390] sm:$0xff] }
 0x146   : > { %v889_v47 = vsel %vm546_vm0, %v532_v8, 0.0  ;;  %v6867_v8 = vlaneseq }
 0x149   : > { %887 = vadd.xlane.f32.xlu2 %v886_v4  ;;  %884 = vadd.xlane.f32.xlu1 %v883_v14  ;;  %v537_v4 = vld [vmem:[%s4308_s20 + $0x3b8] sm:$0xff]  ;;  %v536_v14 = vld [vmem:[%s4308_s20 + $0x3b0] sm:$0xff] }
 0x14a   : > { %881 = vadd.xlane.f32.xlu0 %v880_v36  ;;  %v904_v25 = vsel %vm546_vm0, %v537_v4, 0.0  ;;  %v901_v26 = vsel %vm546_vm0, %v536_v14, 0.0  ;;  %v538_v4 = vld [vmem:[%s4308_s20 + $0x3c0] sm:$0xff] }
 0x14c   : > { %v4678_v12 = vpop.xlane.xlu2 %761  ;;  %v4681_v2 = vpop.xlane.xlu1 %758 }
 0x14d   : > { %6929 = vst [vmem:[#allocation44_spill] sm:$0xff] %v4678_v12  ;;  %v4683_v3 = vpop.xlane.xlu0 %755 }
 0x14e   : > { %6930 = vst [vmem:[#allocation45_spill] sm:$0xff] %v4681_v2 }
 0x14f   : > { %6931 = vst [vmem:[#allocation46_spill] sm:$0xff] %v4683_v3 }
 0x151   : > { %896 = vadd.xlane.f32.xlu2 %v895_v52  ;;  %893 = vadd.xlane.f32.xlu1 %v892_v56  ;;  %v898_v52 = vsel %vm546_vm0, %v535_v15, 0.0  ;;  %v4701_v56 = vshrl.u32 %v6867_v8, 7 }
 0x152   : > { %890 = vadd.xlane.f32.xlu0 %v889_v47  ;;  %v540_v47 = vld [vmem:[%s4308_s20 + $0x3d0] sm:$0xff] }
 0x153   : > { %3940 = vset.pattern.permute.xlu2 %v4701_v56  ;;  %v1070_v15 = vadd.s32 8, %v4701_v56  ;;  %v1076_v8 = vadd.s32 16, %v4701_v56  ;;  %v1082_v55 = vadd.s32 24, %v4701_v56  ;;  %v1100_v18 = vadd.s32 48, %v4701_v56 }
 0x154   : > { %v4690_v36 = vpop.xlane.xlu2 %770  ;;  %v4693_v16 = vpop.xlane.xlu1 %767  ;;  %v1118_v33 = vadd.s32 72, %v4701_v56  ;;  %v1136_v45 = vadd.s32 96, %v4701_v56 }
 0x155   : > { %6932 = vst [vmem:[#allocation47_spill] sm:$0xff] %v4690_v36  ;;  %v4695_v3 = vpop.xlane.xlu0 %764  ;;  %v539_v36 = vld [vmem:[%s4308_s20 + $0x3c8] sm:$0xff]  ;;  %3941 = vset.pattern.permute.xlu0 %v1070_v15  ;;  %3942 = vset.pattern.permute.xlu1 %v1076_v8  ;;  %v544_v8 = vld [vmem:[%s4308_s20 + $0x3f0] sm:$0xff] }
 0x159   : > { %905 = vadd.xlane.f32.xlu2 %v904_v25  ;;  %902 = vadd.xlane.f32.xlu1 %v901_v26  ;;  %v913_v25 = vsel %vm546_vm0, %v540_v47, 0.0  ;;  %v910_v26 = vsel %vm546_vm0, %v539_v36, 0.0 }
 0x15a   : > { %899 = vadd.xlane.f32.xlu0 %v898_v52  ;;  %v907_v52 = vsel %vm546_vm0, %v538_v4, 0.0 }
 0x15c   : > { %v4706_v54 = vpop.xlane.xlu2 %779  ;;  %v4709_v14 = vpop.xlane.xlu1 %776 }
 0x15d   : > { %6933 = vst [vmem:[#allocation48_spill] sm:$0xff] %v4706_v54  ;;  %v4712_v59 = vpop.xlane.xlu0 %773  ;;  %v543_v54 = vld [vmem:[%s4308_s20 + $0x3e8] sm:$0xff] }
 0x15e   : > { %6934 = vst [vmem:[#allocation49_spill] sm:$0xff] %v4709_v14  ;;  %v542_v14 = vld [vmem:[%s4308_s20 + $0x3e0] sm:$0xff]  ;;  %v922_v36 = vsel %vm546_vm0, %v543_v54, 0.0 }
 0x15f   : > { %6935 = vst [vmem:[#allocation50_spill] sm:$0xff] %v4712_v59  ;;  %v541_v59 = vld [vmem:[%s4308_s20 + $0x3d8] sm:$0xff]  ;;  %v919_v4 = vsel %vm546_vm0, %v542_v14, 0.0 }
 0x160   : > { %v916_v15 = vsel %vm546_vm0, %v541_v59, 0.0 }
 0x161   : > { %914 = vadd.xlane.f32.xlu2 %v913_v25  ;;  %911 = vadd.xlane.f32.xlu1 %v910_v26  ;;  %v545_v25 = vld [vmem:[%s4308_s20 + $0x3f8] sm:$0xff] }
 0x162   : > { %908 = vadd.xlane.f32.xlu0 %v907_v52 }
 0x164   : > { %v4720_v60 = vpop.xlane.xlu2 %788  ;;  %v4723_v42 = vpop.xlane.xlu1 %785 }
 0x165   : > { %6936 = vst [vmem:[#allocation51_spill] sm:$0xff] %v4723_v42  ;;  %v4725_v47 = vpop.xlane.xlu0 %782  ;;  %v928_v42 = vsel %vm546_vm0, %v545_v25, 0.0  ;;  %v4755_v25 = vld [vmem:[%s6942_s1] ss:$0 sm:$0xff] }
 0x166   : > { %6937 = vst [vmem:[#allocation52_spill] sm:$0xff] %v4725_v47  ;;  %v925_v47 = vsel %vm546_vm0, %v544_v8, 0.0  ;;  %vm2524_vm0 = vcmask 1041409  }
 0x169   : > { %923 = vadd.xlane.f32.xlu2 %v922_v36  ;;  %920 = vadd.xlane.f32.xlu1 %v919_v4 }
 0x16a   : > { %917 = vadd.xlane.f32.xlu0 %v916_v15 }
 0x16c   : > { %v4731_v26 = vpop.xlane.xlu2 %797  ;;  %v4734_v52 = vpop.xlane.xlu1 %794 }
 0x16d   : > { %v4736_v57 = vpop.xlane.xlu0 %791 }
 0x171   : > { %929 = vadd.xlane.f32.xlu1 %v928_v42 }
 0x172   : > { %926 = vadd.xlane.f32.xlu0 %v925_v47 }
 0x174   : > { %v4740_v54 = vpop.xlane.xlu2 %806  ;;  %v4742_v59 = vpop.xlane.xlu1 %803 }
 0x175   : > { %6938 = vst [vmem:[#allocation53_spill] sm:$0xff] %v4740_v54  ;;  %v4744_v14 = vpop.xlane.xlu0 %800  ;;  %v1112_v54 = vadd.s32 64, %v4701_v56 }
 0x176   : > { %6939 = vst [vmem:[#allocation54_spill] sm:$0xff] %v4742_v59 }
 0x177   : > { %6940 = vst [vmem:[#allocation55_spill] sm:$0xff] %v4744_v14  ;;  %v1088_v14 = vadd.s32 32, %v4701_v56 }
 0x17c   : > { %v4746_v36 = vpop.xlane.xlu2 %815  ;;  %v4748_v4 = vpop.xlane.xlu1 %812 }
 0x17d   : > { %v4750_v15 = vpop.xlane.xlu0 %809 }
 0x17e   : > { %6941 = vst [vmem:[#allocation56_spill] sm:$0xff] %v4750_v15 }
 0x181   : > { %1066 = vperm.xlu2 %3940, %v4755_v25  }
 0x184   : > { %v4758_v42 = vpop.xlane.xlu2 %824  ;;  %v4760_v47 = vpop.xlane.xlu1 %821 }
 0x185   : > { %6943 = vst [vmem:[#allocation57_spill] sm:$0xff] %v4758_v42  ;;  %v4762_v8 = vpop.xlane.xlu0 %818  ;;  %v1094_v42 = vadd.s32 40, %v4701_v56 }
 0x186   : > { %6944 = vst [vmem:[#allocation58_spill] sm:$0xff] %v4760_v47  ;;  %1072 = vperm.xlu0 %3941, %v4755_v25  }
 0x187   : > { %6945 = vst [vmem:[#allocation59_spill] sm:$0xff] %v4762_v8 }
 0x189   : > { %3943 = vset.pattern.permute.xlu2 %v1082_v55 }
 0x18a   : > { %1078 = vperm.xlu1 %3942, %v4755_v25  }
 0x18c   : > { %v4768_v15 = vpop.xlane.xlu2 %833  ;;  %v4770_v61 = vpop.xlane.xlu1 %830 }
 0x18d   : > { %6946 = vst [vmem:[#allocation60_spill] sm:$0xff] %v4768_v15  ;;  %v4772_v53 = vpop.xlane.xlu0 %827 }
 0x18e   : > { %6947 = vst [vmem:[#allocation61_spill] sm:$0xff] %v4770_v61  ;;  %3948 = vset.pattern.permute.xlu0 %v1112_v54  ;;  %v1142_v54 = vadd.s32 104, %v4701_v56 }
 0x18f   : > { %6948 = vst [vmem:[#allocation62_spill] sm:$0xff] %v4772_v53  ;;  %v1106_v53 = vadd.s32 56, %v4701_v56 }
 0x191   : > { %1084 = vperm.xlu2 %3943, %v4755_v25  }
 0x192   : > { %3945 = vset.pattern.permute.xlu1 %v1094_v42 }
 0x194   : > { %v4776_v47 = vpop.xlane.xlu2 %842  ;;  %v4778_v8 = vpop.xlane.xlu1 %839 }
 0x195   : > { %v4780_v55 = vpop.xlane.xlu0 %836 }
 0x196   : > { %1114 = vperm.xlu0 %3948, %v4755_v25  }
 0x199   : > { %3944 = vset.pattern.permute.xlu2 %v1088_v14 }
 0x19a   : > { %1096 = vperm.xlu1 %3945, %v4755_v25  }
 0x19c   : > { %v4786_v61 = vpop.xlane.xlu2 %851  ;;  %v4788_v15 = vpop.xlane.xlu1 %848 }
 0x19d   : > { %6949 = vst [vmem:[#allocation63_spill] sm:$0xff] %v4786_v61  ;;  %v4790_v42 = vpop.xlane.xlu0 %845 }
 0x19e   : > { %6950 = vst [vmem:[#allocation64_spill] sm:$0xff] %v4788_v15  ;;  %3953 = vset.pattern.permute.xlu0 %v1142_v54 }
 0x1a1   : > { %1090 = vperm.xlu2 %3944, %v4755_v25  }
 0x1a2   : > { %3947 = vset.pattern.permute.xlu1 %v1106_v53  ;;  %v1124_v53 = vadd.s32 80, %v4701_v56 }
 0x1a4   : > { %v4794_v59 = vpop.xlane.xlu2 %860  ;;  %v4796_v2 = vpop.xlane.xlu1 %857 }
 0x1a5   : > { %6951 = vst [vmem:[#allocation65_spill] sm:$0xff] %v4796_v2  ;;  %v4798_v14 = vpop.xlane.xlu0 %854 }
 0x1a6   : > { %1144 = vperm.xlu0 %3953, %v4755_v25  }
 0x1a9   : > { %3946 = vset.pattern.permute.xlu2 %v1100_v18 }
 0x1aa   : > { %1108 = vperm.xlu1 %3947, %v4755_v25  }
 0x1ac   : > { %v4803_v15 = vpop.xlane.xlu2 %869  ;;  %v4805_v54 = vpop.xlane.xlu1 %866 }
 0x1ad   : > { %6952 = vst [vmem:[#allocation66_spill] sm:$0xff] %v4803_v15  ;;  %v4807_v61 = vpop.xlane.xlu0 %863 }
 0x1ae   : > { %6953 = vst [vmem:[#allocation67_spill] sm:$0xff] %v4805_v54 }
 0x1b1   : > { %1102 = vperm.xlu2 %3946, %v4755_v25  }
 0x1b2   : > { %3950 = vset.pattern.permute.xlu1 %v1124_v53  ;;  %v1130_v53 = vadd.s32 88, %v4701_v56 }
 0x1b4   : > { %v4811_v2 = vpop.xlane.xlu2 %878  ;;  %v4816_v18 = vpop.xlane.xlu1 %875 }
 0x1b5   : > { %6954 = vst [vmem:[#allocation68_spill] sm:$0xff] %v4811_v2  ;;  %v4813_v12 = vpop.xlane.xlu0 %872 }
 0x1b6   : > { %6955 = vst [vmem:[#allocation69_spill] sm:$0xff] %v4813_v12 }
 0x1b7   : > { %6956 = vst [vmem:[#allocation70_spill] sm:$0xff] %v4816_v18 }
 0x1b9   : > { %3949 = vset.pattern.permute.xlu2 %v1118_v33 }
 0x1ba   : > { %1126 = vperm.xlu1 %3950, %v4755_v25  }
 0x1bc   : > { %v4819_v15 = vpop.xlane.xlu2 %887  ;;  %v4824_v44 = vpop.xlane.xlu1 %884 }
 0x1bd   : > { %v4821_v54 = vpop.xlane.xlu0 %881 }
 0x1be   : > { %6957 = vst [vmem:[#allocation71_spill] sm:$0xff] %v4821_v54  ;;  %v1154_v54 = vadd.s32 120, %v4701_v56 }
 0x1c1   : > { %1120 = vperm.xlu2 %3949, %v4755_v25  }
 0x1c2   : > { %3952 = vset.pattern.permute.xlu1 %v1136_v45 }
 0x1c4   : > { %v4828_v2 = vpop.xlane.xlu2 %896  ;;  %v4833_v33 = vpop.xlane.xlu1 %893 }
 0x1c5   : > { %6958 = vst [vmem:[#allocation72_spill] sm:$0xff] %v4828_v2  ;;  %v4830_v12 = vpop.xlane.xlu0 %890  ;;  %v1148_v2 = vadd.s32 112, %v4701_v56 }
 0x1c6   : > { %6959 = vst [vmem:[#allocation73_spill] sm:$0xff] %v4830_v12 }
 0x1c7   : > { %6960 = vst [vmem:[#allocation74_spill] sm:$0xff] %v4833_v33  ;;  %v4190_v33 = vmov 0  }
 0x1c8   : > { %3958 = vset.pattern.permute.xlu0 %v4190_v33 }
 0x1c9   : > { %3951 = vset.pattern.permute.xlu2 %v1130_v53 }
 0x1ca   : > { %1138 = vperm.xlu1 %3952, %v4755_v25  }
 0x1cc   : > { %v4836_v18 = vpop.xlane.xlu2 %905  ;;  %v4841_v45 = vpop.xlane.xlu1 %902 }
 0x1cd   : > { %6961 = vst [vmem:[#allocation75_spill] sm:$0xff] %v4836_v18  ;;  %v4839_v34 = vpop.xlane.xlu0 %899 }
 0x1ce   : > { %6962 = vst [vmem:[#allocation76_spill] sm:$0xff] %v4839_v34 }
 0x1cf   : > { %6963 = vst [vmem:[#allocation77_spill] sm:$0xff] %v4841_v45 }
 0x1d1   : > { %1132 = vperm.xlu2 %3951, %v4755_v25  }
 0x1d2   : > { %3955 = vset.pattern.permute.xlu1 %v1154_v54 }
 0x1d4   : > { %v4845_v53 = vpop.xlane.xlu2 %914  ;;  %v4849_v43 = vpop.xlane.xlu1 %911 }
 0x1d5   : > { %v4847_v12 = vpop.xlane.xlu0 %908 }
 0x1d9   : > { %3954 = vset.pattern.permute.xlu2 %v1148_v2 }
 0x1da   : > { %1156 = vperm.xlu1 %3955, %v4755_v25  }
 0x1dc   : > { %v4852_v18 = vpop.xlane.xlu2 %923  ;;  %v4856_v45 = vpop.xlane.xlu1 %920 }
 0x1dd   : > { %6964 = vst [vmem:[#allocation78_spill] sm:$0xff] %v4852_v18  ;;  %v4854_v54 = vpop.xlane.xlu0 %917 }
 0x1de   : > { %6965 = vst [vmem:[#allocation79_spill] sm:$0xff] %v4854_v54  ;;  %v980_v54 = vmul.f32 0.0625, %v4597_v6 }
 0x1df   : > { %6966 = vst [vmem:[#allocation80_spill] sm:$0xff] %v4856_v45 }
 0x1e1   : > { %1150 = vperm.xlu2 %3954, %v4755_v25   ;;  %v963_v25 = vmul.f32 0.0625, %v4522_v5  ;;  %v981_v5 = vmul.f32 0.0625, %v4594_v1  ;;  %v979_v1 = vmul.f32 0.0625, %v4599_v10  ;;  %v995_v10 = vmul.f32 0.0625, %v4657_v7 }
 0x1e2   : > { %3956 = vset.pattern.permute.xlu1 %v4190_v33 }
 0x1e4   : > { %v4858_v2 = vpop.permute.xlu2 %1066  ;;  %v4862_v34 = vpop.xlane.xlu1 %929 }
 0x1e5   : > { %v4860_v56 = vpop.xlane.xlu0 %926  ;;  %6968 = vst [vmem:[#allocation82_spill] sm:$0xff] %v4862_v34  ;;  %v1238_v7 = vadd.f32 %v4858_v2, %v995_v10  ;;  %v967_v10 = vmul.f32 0.0625, %v4551_v41 }
 0x1e6   : > { %6967 = vst [vmem:[#allocation81_spill] sm:$0xff] %v4860_v56  ;;  %v1174_v56 = vadd.f32 %v4858_v2, %v931_v35 }
 0x1e9   : > { %3957 = vset.pattern.permute.xlu2 %v4190_v33  ;;  %v1206_v33 = vadd.f32 %v4858_v2, %v963_v25 }
 0x1ec   : > { %v4870_v46 = vpop.permute.xlu2 %1084 }
 0x1ed   : > { %v1225_v51 = vadd.f32 %v4870_v46, %v982_v22  ;;  %v948_v22 = vmul.f32 0.0625, %v4462_v9 }
 0x1f8   : > { %v4868_v18 = vpop.permute.xlu0 %1072 }
 0x1f9   : > { %v1207_v45 = vadd.f32 %v4868_v18, %v964_v17  ;;  %v1175_v34 = vadd.f32 %v4868_v18, %v932_v62  ;;  %v1177_v17 = vadd.f32 %v4870_v46, %v934_v31  ;;  %v1223_v6 = vadd.f32 %v4868_v18, %v980_v54 }
 0x1fa   : > { %v1012_v54 = vmul.f32 0.0625, %v4736_v57 }
 0x1fb   : > { %v4879_v58 = vpack.c.bf16 %v1207_v45, %v1206_v33  ;;  %v1584_v23 = vpack.c.bf16 %v1175_v34, %v1174_v56  ;;  %v1044_v45 = vmul.f32 0.0625, %v4819_v15  ;;  %v996_v56 = vmul.f32 0.0625, %v4654_v24 }
 0x1fc   : > { %v4883_v25 = vpop.permute.xlu1 %1078  ;;  %v1255_v57 = vadd.f32 %v4868_v18, %v1012_v54 }
 0x1fd   : > { %v1764_v35 = vunpack.c.l.b16 %v4879_v58  ;;  %v1732_v62 = vunpack.c.l.b16 %v1584_v23  ;;  %v1176_v39 = vadd.f32 %v4883_v25, %v933_v40  ;;  %v1224_v30 = vadd.f32 %v4883_v25, %v981_v5 }
 0x1fe   : > { %v1222_v40 = vadd.f32 %v4858_v2, %v979_v1  ;;  %v1043_v5 = vmul.f32 0.0625, %v4824_v44  ;;  %v1239_v24 = vadd.f32 %v4868_v18, %v996_v56  ;;  %v4912_v44 = vpop.permute.xlu2 %1090  ;;  %v1733_v9 = vunpack.c.h.b16 %v1584_v23 }
 0x1ff   : > { %1957 = vperm.xlu0 %3958, %v1764_v35   ;;  %1861 = vperm.xlu1 %3956, %v1732_v62   ;;  %v4890_v34 = vpack.c.bf16 %v1177_v17, %v1176_v39  ;;  %v4897_v31 = vpack.c.bf16 %v1225_v51, %v1224_v30  ;;  %v1287_v17 = vadd.f32 %v4868_v18, %v1044_v45  ;;  %v947_v35 = vmul.f32 0.0625, %v4465_v11 }
 0x200   : > { %v4905_v15 = vpack.c.bf16 %v1223_v6, %v1222_v40  ;;  %v1011_v62 = vmul.f32 0.0625, %v4720_v60  ;;  %v1286_v39 = vadd.f32 %v4858_v2, %v1043_v5  ;;  %v1191_v1 = vadd.f32 %v4868_v18, %v948_v22 }
 0x201   : > { %v1734_v33 = vunpack.c.l.b16 %v4890_v34  ;;  %v1783_v30 = vunpack.c.h.b16 %v4897_v31  ;;  %v1190_v60 = vadd.f32 %v4858_v2, %v947_v35  ;;  %v4921_v6 = vpack.c.bf16 %v1239_v24, %v1238_v7 }
 0x202   : > { %v4917_v51 = vpack.c.bf16 %v1287_v17, %v1286_v39  ;;  %v1254_v11 = vadd.f32 %v4858_v2, %v1011_v62  ;;  %v936_v23 = vmul.f32 0.0625, %v4414_v37  ;;  %v968_v40 = vmul.f32 0.0625, %v4549_v38 }
 0x203   : > { %1867 = vperm.xlu2 %3957, %v1734_v33   ;;  %v1592_v56 = vpack.c.bf16 %v1191_v1, %v1190_v60  ;;  %v935_v33 = vmul.f32 0.0625, %v4402_v28  ;;  %v1033_v28 = vmul.f32 0.0625, %v4798_v14  ;;  %v1210_v38 = vadd.f32 %v4912_v44, %v967_v10 }
 0x204   : > { %v4923_v45 = vpack.c.bf16 %v1255_v57, %v1254_v11  ;;  %v950_v57 = vmul.f32 0.0625, %v4477_v20  ;;  %v1014_v14 = vmul.f32 0.0625, %v4731_v26  ;;  %v938_v20 = vmul.f32 0.0625, %v4429_v48 }
 0x205   : > { %v1178_v17 = vadd.f32 %v4912_v44, %v935_v33  ;;  %v1748_v24 = vunpack.c.l.b16 %v1592_v56  ;;  %v1749_v11 = vunpack.c.h.b16 %v1592_v56  ;;  %v937_v26 = vmul.f32 0.0625, %v4431_v49 }
 0x206   : > { %v1813_v54 = vunpack.c.h.b16 %v4923_v45  ;;  %v987_v48 = vmul.f32 0.0625, %v4618_v19 }
 0x207   : > { %2014 = vperm.xlu0 %3958, %v1783_v30   ;;  %1864 = vperm.xlu1 %3956, %v1733_v9   ;;  %v949_v30 = vmul.f32 0.0625, %v4479_v21  ;;  %v1013_v9 = vmul.f32 0.0625, %v4734_v52 }
 0x209   : > { %v1256_v60 = vadd.f32 %v4883_v25, %v1013_v9  ;;  %v1192_v33 = vadd.f32 %v4883_v25, %v949_v30  ;;  %v983_v30 = vmul.f32 0.0625, %v4609_v50  ;;  %v1812_v9 = vunpack.c.l.b16 %v4923_v45 }
 0x20a   : > { %v1036_v50 = vmul.f32 0.0625, %v4807_v61 }
 0x20b   : > { %v4932_v22 = vpop.permute.xlu2 %1102 }
 0x20c   : > { %v4929_v5 = vpop.permute.xlu1 %1096  ;;  %v4942_v41 = vadd.f32 %v4932_v22, %v1033_v28  ;;  %v4967_v28 = vpop.permute.xlu0 %1114  ;;  %v1180_v49 = vadd.f32 %v4932_v22, %v937_v26 }
 0x20d   : > { %v1179_v35 = vadd.f32 %v4929_v5, %v936_v23  ;;  %v1211_v62 = vadd.f32 %v4929_v5, %v968_v40  ;;  %v1257_v23 = vadd.f32 %v4870_v46, %v1014_v14  ;;  %v1193_v40 = vadd.f32 %v4870_v46, %v950_v57 }
 0x20e   : > { %v1230_v19 = vadd.f32 %v4967_v28, %v987_v48  ;;  %v1003_v14 = vmul.f32 0.0625, %v4695_v3 }
 0x20f   : > { %2104 = vperm.xlu0 %3958, %v1813_v54   ;;  %1909 = vperm.xlu1 %3956, %v1748_v24   ;;  %v4938_v37 = vpack.c.bf16 %v1179_v35, %v1178_v17  ;;  %v1602_v7 = vpack.c.bf16 %v1211_v62, %v1210_v38  ;;  %v4953_v10 = vpack.c.bf16 %v1257_v23, %v1256_v60  ;;  %v988_v54 = vmul.f32 0.0625, %v4635_v0 }
 0x210   : > { %v4955_v52 = vpack.c.bf16 %v1193_v40, %v1192_v33  ;;  %v954_v38 = vmul.f32 0.0625, %v4486_v27  ;;  %v953_v0 = vmul.f32 0.0625, %v4489_v32  ;;  %v1019_v32 = vmul.f32 0.0625, %v4748_v4 }
 0x211   : > { %v1737_v39 = vunpack.c.h.b16 %v4938_v37  ;;  %v1769_v1 = vunpack.c.h.b16 %v1602_v7  ;;  %v1768_v21 = vunpack.c.l.b16 %v1602_v7  ;;  %v1814_v24 = vunpack.c.l.b16 %v4953_v10 }
 0x212   : > { %v1750_v35 = vunpack.c.l.b16 %v4955_v52  ;;  %v984_v7 = vmul.f32 0.0625, %v4606_v29  ;;  %v1035_v29 = vmul.f32 0.0625, %v4794_v59  ;;  %v1196_v45 = vadd.f32 %v4932_v22, %v953_v0 }
 0x213   : > { %1876 = vperm.xlu2 %3957, %v1737_v39   ;;  %v1765_v33 = vunpack.c.h.b16 %v4879_v58  ;;  %v1246_v23 = vadd.f32 %v4967_v28, %v1003_v14  ;;  %v1226_v40 = vadd.f32 %v4912_v44, %v983_v30  ;;  %v997_v58 = vmul.f32 0.0625, %v4671_v63 }
 0x214   : > { %v1227_v59 = vadd.f32 %v4929_v5, %v984_v7  ;;  %v1278_v26 = vadd.f32 %v4967_v28, %v1035_v29  ;;  %v1052_v63 = vmul.f32 0.0625, %v4849_v43  ;;  %v1030_v0 = vmul.f32 0.0625, %v4790_v42  ;;  %v6970_v29 = vld [vmem:[#allocation79_spill] sm:$0xff] }
 0x215   : > { %v1051_v7 = vmul.f32 0.0625, %v4847_v12  ;;  %v1028_v43 = vmul.f32 0.0625, %v4778_v8  ;;  %v1027_v12 = vmul.f32 0.0625, %v4780_v55  ;;  %v1054_v8 = vmul.f32 0.0625, %v6970_v29  ;;  %v6972_v55 = vld [vmem:[#allocation8_spill] sm:$0xff] }
 0x216   : > { %v1273_v42 = vadd.f32 %v4870_v46, %v1030_v0  ;;  %v6976_v0 = vld [vmem:[#allocation25_spill] sm:$0xff] }
 0x217   : > { %1972 = vperm.xlu0 %3958, %v1769_v1   ;;  %1912 = vperm.xlu1 %3956, %v1749_v11   ;;  %v1004_v1 = vmul.f32 0.0625, %v4693_v16  ;;  %v1020_v11 = vmul.f32 0.0625, %v4746_v36  ;;  %v1262_v16 = vadd.f32 %v4967_v28, %v1019_v32  ;;  %v1053_v32 = vmul.f32 0.0625, %v4845_v53 }
 0x21b   : > { %1969 = vperm.xlu2 %3957, %v1768_v21   ;;  %v4959_v56 = vpop.permute.xlu2 %1120 }
 0x21c   : > { %v4961_v17 = vpop.permute.xlu1 %1108  ;;  %v1231_v39 = vadd.f32 %v4959_v56, %v988_v54  ;;  %v1247_v3 = vadd.f32 %v4959_v56, %v1004_v1  ;;  %v1263_v61 = vadd.f32 %v4959_v56, %v1020_v11  ;;  %v1279_v54 = vadd.f32 %v4959_v56, %v1036_v50 }
 0x21d   : > { %v1181_v62 = vadd.f32 %v4961_v17, %v938_v20  ;;  %v1197_v27 = vadd.f32 %v4961_v17, %v954_v38  ;;  %v1240_v38 = vadd.f32 %v4883_v25, %v997_v58 }
 0x21e   : > { %v4988_v60 = vpack.c.bf16 %v1231_v39, %v1230_v19  ;;  %v5000_v21 = vpack.c.bf16 %v1247_v3, %v1246_v23  ;;  %v5003_v20 = vpack.c.bf16 %v1263_v61, %v1262_v16  ;;  %v5012_v48 = vpack.c.bf16 %v1279_v54, %v1278_v26 }
 0x21f   : > { %2107 = vperm.xlu0 %3958, %v1814_v24   ;;  %1915 = vperm.xlu1 %3956, %v1750_v35   ;;  %v4977_v57 = vpack.c.bf16 %v1181_v62, %v1180_v49  ;;  %v4995_v4 = vpack.c.bf16 %v1197_v27, %v1196_v45  ;;  %v998_v24 = vmul.f32 0.0625, %v4669_v13  ;;  %v5009_v62 = vpack.c.bf16 %v1227_v59, %v1226_v40  ;;  %v6973_v59 = vld [vmem:[#allocation5_spill] sm:$0xff]  ;;  %v6974_v40 = vld [vmem:[#allocation23_spill] sm:$0xff] }
 0x220   : > { %6969 = vst [vmem:[#allocation83_spill] sm:$0xff] %v5003_v20  ;;  %v1029_v49 = vmul.f32 0.0625, %v4776_v47  ;;  %v1295_v13 = vadd.f32 %v4959_v56, %v1052_v63  ;;  %v1294_v47 = vadd.f32 %v4967_v28, %v1051_v7  ;;  %v1270_v3 = vadd.f32 %v4858_v2, %v1027_v12  ;;  %v6978_v12 = vld [vmem:[#allocation36_spill] sm:$0xff] }
 0x221   : > { %v1739_v36 = vunpack.c.h.b16 %v4977_v57  ;;  %v1754_v35 = vunpack.c.l.b16 %v4995_v4  ;;  %v1241_v39 = vadd.f32 %v4870_v46, %v998_v24  ;;  %v1785_v30 = vunpack.c.h.b16 %v5009_v62 }
 0x222   : > { %v1272_v19 = vadd.f32 %v4883_v25, %v1029_v49  ;;  %v5034_v11 = vpack.c.bf16 %v1295_v13, %v1294_v47  ;;  %v940_v16 = vmul.f32 0.0625, %v6972_v55  ;;  %v939_v61 = vmul.f32 0.0625, %v6973_v59 }
 0x223   : > { %2101 = vperm.xlu2 %3957, %v1812_v9   ;;  %v1735_v9 = vunpack.c.h.b16 %v4890_v34  ;;  %v5022_v27 = vpack.c.bf16 %v1241_v39, %v1240_v38  ;;  %v1271_v34 = vadd.f32 %v4868_v18, %v1028_v43  ;;  %v966_v53 = vmul.f32 0.0625, %v6974_v40  ;;  %v6975_v38 = vld [vmem:[#allocation28_spill] sm:$0xff] }
 0x224   : > { %v1633_v45 = vpack.c.bf16 %v1273_v42, %v1272_v19  ;;  %v1751_v24 = vunpack.c.h.b16 %v4955_v52  ;;  %v1183_v2 = vadd.f32 %v4959_v56, %v940_v16  ;;  %v970_v63 = vmul.f32 0.0625, %v6975_v38  ;;  %v6977_v19 = vld [vmem:[#allocation35_spill] sm:$0xff]  ;;  %v6981_v40 = vld [vmem:[#allocation16_spill] sm:$0xff] }
 0x225   : > { %v1799_v50 = vunpack.c.h.b16 %v5022_v27  ;;  %v5046_v58 = vpack.c.bf16 %v1271_v34, %v1270_v3  ;;  %v1209_v49 = vadd.f32 %v4870_v46, %v966_v53  ;;  %v1182_v39 = vadd.f32 %v4967_v28, %v939_v61 }
 0x226   : > { %v1830_v54 = vunpack.c.l.b16 %v1633_v45  ;;  %v969_v7 = vmul.f32 0.0625, %v6976_v0  ;;  %v1213_v52 = vadd.f32 %v4961_v17, %v970_v63  ;;  %v986_v43 = vmul.f32 0.0625, %v6977_v19  ;;  %v6983_v0 = vld [vmem:[#allocation14_spill] sm:$0xff] }
 0x227   : > { %1882 = vperm.xlu0 %3958, %v1739_v36   ;;  %1960 = vperm.xlu1 %3956, %v1765_v33   ;;  %v6971_v33 = vld [vmem:[#allocation24_spill] sm:$0xff]  ;;  %v1829_v13 = vunpack.c.h.b16 %v5046_v58  ;;  %v985_v34 = vmul.f32 0.0625, %v6978_v12  ;;  %v1815_v61 = vunpack.c.h.b16 %v4953_v10  ;;  %v956_v53 = vmul.f32 0.0625, %v6981_v40 }
 0x228   : > { %v965_v23 = vmul.f32 0.0625, %v6971_v33  ;;  %v1212_v42 = vadd.f32 %v4932_v22, %v969_v7  ;;  %v952_v10 = vmul.f32 0.0625, %v6983_v0  ;;  %v6984_v7 = vld [vmem:[#allocation44_spill] sm:$0xff] }
 0x229   : > { %v1228_v55 = vadd.f32 %v4932_v22, %v985_v34  ;;  %v1199_v38 = vadd.f32 %v4959_v56, %v956_v53 }
 0x22a   : > { %v1208_v26 = vadd.f32 %v4883_v25, %v965_v23  ;;  %v1603_v33 = vpack.c.bf16 %v1213_v52, %v1212_v42  ;;  %v1229_v23 = vadd.f32 %v4961_v17, %v986_v43  ;;  %v6985_v52 = vld [vmem:[#allocation13_spill] sm:$0xff]  ;;  %v1195_v12 = vadd.f32 %v4929_v5, %v952_v10 }
 0x22b   : > { %1927 = vperm.xlu2 %3957, %v1754_v35   ;;  %v5029_v14 = vpop.permute.xlu2 %1132  ;;  %v951_v19 = vmul.f32 0.0625, %v6985_v52  ;;  %v6986_v43 = vld [vmem:[#allocation45_spill] sm:$0xff] }
 0x22c   : > { %v5031_v1 = vpop.permute.xlu1 %1126  ;;  %v1297_v18 = vadd.f32 %v5029_v14, %v1054_v8  ;;  %v1770_v16 = vunpack.c.l.b16 %v1603_v33 }
 0x22d   : > { %v1296_v36 = vadd.f32 %v5031_v1, %v1053_v32  ;;  %v6979_v32 = vld [vmem:[#allocation81_spill] sm:$0xff] }
 0x22e   : > { %v1057_v29 = vmul.f32 0.0625, %v6979_v32  ;;  %v6987_v32 = vlaneseq }
 0x22f   : > { %2020 = vperm.xlu0 %3958, %v1785_v30   ;;  %1870 = vperm.xlu1 %3956, %v1735_v9   ;;  %v5051_v35 = vpack.c.bf16 %v1297_v18, %v1296_v36  ;;  %v5058_v30 = vpack.c.bf16 %v1209_v49, %v1208_v26  ;;  %v5060_v9 = vpack.c.bf16 %v1183_v2, %v1182_v39  ;;  %v1780_v18 = vunpack.c.l.b16 %v4905_v15  ;;  %v6982_v26 = vld [vmem:[#allocation17_spill] sm:$0xff] }
 0x230   : > { %v5076_v36 = vpack.c.bf16 %v1229_v23, %v1228_v55  ;;  %v1831_v2 = vunpack.c.h.b16 %v1633_v45  ;;  %v1845_v49 = vunpack.c.h.b16 %v4917_v51  ;;  %v1736_v45 = vunpack.c.l.b16 %v4938_v37 }
 0x231   : > { %v1766_v8 = vunpack.c.l.b16 %v5058_v30  ;;  %v1194_v23 = vadd.f32 %v4912_v44, %v951_v19  ;;  %v1771_v37 = vunpack.c.h.b16 %v1603_v33 }
 0x232   : > { %v1786_v59 = vunpack.c.l.b16 %v5076_v36 }
 0x233   : > { %2062 = vperm.xlu2 %3957, %v1799_v50   ;;  %v1740_v50 = vunpack.c.l.b16 %v5060_v9 }
 0x237   : > { %2155 = vperm.xlu0 %3958, %v1830_v54   ;;  %1918 = vperm.xlu1 %3956, %v1751_v24   ;;  %v955_v54 = vmul.f32 0.0625, %v6982_v26  ;;  %v1781_v24 = vunpack.c.h.b16 %v4905_v15  ;;  %v1001_v15 = vmul.f32 0.0625, %v6986_v43  ;;  %v6990_v26 = vld [vmem:[#allocation73_spill] sm:$0xff] }
 0x239   : > { %v1198_v63 = vadd.f32 %v4967_v28, %v955_v54  ;;  %v1244_v55 = vadd.f32 %v4932_v22, %v1001_v15  ;;  %v1045_v54 = vmul.f32 0.0625, %v6990_v26  ;;  %v6992_v15 = vld [vmem:[#allocation26_spill] sm:$0xff] }
 0x23b   : > { %v5064_v47 = vpop.permute.xlu2 %1150  ;;  %2152 = vperm.xlu2 %3957, %v1829_v13   ;;  %v5087_v39 = vpack.c.bf16 %v1199_v38, %v1198_v63  ;;  %v1002_v13 = vmul.f32 0.0625, %v6984_v7  ;;  %v1288_v10 = vadd.f32 %v4883_v25, %v1045_v54  ;;  %v1767_v25 = vunpack.c.h.b16 %v5058_v30  ;;  %v6994_v30 = vld [vmem:[#allocation56_spill] sm:$0xff] }
 0x23c   : > { %v5073_v3 = vadd.f32 %v5064_v47, %v1057_v29  ;;  %v5098_v29 = vand.u32 127, %v6987_v32  ;;  %v5125_v52 = vpop.permute.xlu1 %1138 }
 0x23d   : > { %v1757_v42 = vunpack.c.h.b16 %v5087_v39  ;;  %v1245_v34 = vadd.f32 %v4961_v17, %v1002_v13 }
 0x23e   : > { %6980 = vst [vmem:[#allocation79_spill] sm:$0xff] %v5073_v3  ;;  %v5110_v53 = vadd.s32 4294967280, %v5098_v29  ;;  %v7010_v3 = vld [vmem:[#allocation30_spill] sm:$0xff] }
 0x23f   : > { %1963 = vperm.xlu1 %3956, %v1766_v8   ;;  %1885 = vperm.xlu0 %3958, %v1740_v50   ;;  %v6988_v8 = vld [vmem:[#allocation54_spill] sm:$0xff] }
 0x240   : > { %v1016_v50 = vmul.f32 0.0625, %v6988_v8  ;;  %v5136_v8 = vpop.permute.xlu0 %1144 }
 0x242   : > { %v1259_v40 = vadd.f32 %v4929_v5, %v1016_v50 }
 0x243   : > { %1975 = vperm.xlu2 %3957, %v1770_v16   ;;  %v6989_v16 = vld [vmem:[#allocation55_spill] sm:$0xff] }
 0x247   : > { %2005 = vperm.xlu1 %3956, %v1780_v18   ;;  %2023 = vperm.xlu0 %3958, %v1786_v59   ;;  %v1015_v18 = vmul.f32 0.0625, %v6989_v16  ;;  %v5104_v59 = vpack.c.bf16 %v1195_v12, %v1194_v23  ;;  %v1741_v23 = vunpack.c.h.b16 %v5060_v9  ;;  %v5144_v16 = vadd.s32 4294967256, %v5098_v29 }
 0x249   : > { %v1752_v33 = vunpack.c.l.b16 %v5104_v59 }
 0x24b   : > { %2110 = vperm.xlu2 %3957, %v1815_v61   ;;  %v5106_v61 = vpack.c.bf16 %v1245_v34, %v1244_v55 }
 0x24c   : > { %v5138_v50 = vpop.permute.xlu1 %1156 }
 0x24f   : > { %2008 = vperm.xlu1 %3956, %v1781_v24   ;;  %2158 = vperm.xlu0 %3958, %v1831_v2   ;;  %v1258_v24 = vadd.f32 %v4912_v44, %v1015_v18  ;;  %v6991_v2 = vld [vmem:[#allocation74_spill] sm:$0xff]  ;;  %v1018_v18 = vmul.f32 0.0625, %v6994_v30 }
 0x250   : > { %v1046_v38 = vmul.f32 0.0625, %v6991_v2 }
 0x251   : > { %v5119_v0 = vpack.c.bf16 %v1259_v40, %v1258_v24  ;;  %v1261_v54 = vadd.f32 %v4961_v17, %v1018_v18  ;;  %v6996_v24 = vld [vmem:[#allocation63_spill] sm:$0xff] }
 0x252   : > { %v1289_v13 = vadd.f32 %v4870_v46, %v1046_v38  ;;  %v1032_v9 = vmul.f32 0.0625, %v6996_v24  ;;  %v7000_v24 = vld [vmem:[#allocation15_spill] sm:$0xff] }
 0x253   : > { %2200 = vperm.xlu2 %3957, %v1845_v49   ;;  %v1802_v49 = vunpack.c.l.b16 %v5106_v61  ;;  %v1816_v19 = vunpack.c.l.b16 %v5119_v0 }
 0x254   : > { %v5128_v43 = vpack.c.bf16 %v1289_v13, %v1288_v10  ;;  %v1275_v10 = vadd.f32 %v4929_v5, %v1032_v9  ;;  %v957_v9 = vmul.f32 0.0625, %v7000_v24 }
 0x256   : > { %v1847_v34 = vunpack.c.h.b16 %v5128_v43 }
 0x257   : > { %1873 = vperm.xlu1 %3956, %v1736_v45   ;;  %1936 = vperm.xlu0 %3958, %v1757_v42   ;;  %v972_v45 = vmul.f32 0.0625, %v6992_v15  ;;  %v6993_v42 = vld [vmem:[#allocation27_spill] sm:$0xff] }
 0x258   : > { %v971_v12 = vmul.f32 0.0625, %v6993_v42  ;;  %v5167_v42 = vadd.s32 4294967264, %v5098_v29 }
 0x259   : > { %v1215_v32 = vadd.f32 %v4959_v56, %v972_v45  ;;  %v1798_v45 = vunpack.c.l.b16 %v5022_v27 }
 0x25a   : > { %v1214_v46 = vadd.f32 %v4967_v28, %v971_v12  ;;  %v1782_v28 = vunpack.c.l.b16 %v4897_v31  ;;  %v1787_v31 = vunpack.c.h.b16 %v5076_v36  ;;  %v1796_v36 = vunpack.c.l.b16 %v4921_v6 }
 0x25b   : > { %1978 = vperm.xlu2 %3957, %v1771_v37   ;;  %v6995_v37 = vld [vmem:[#allocation53_spill] sm:$0xff] }
 0x25c   : > { %v5141_v55 = vpack.c.bf16 %v1215_v32, %v1214_v46  ;;  %v1017_v56 = vmul.f32 0.0625, %v6995_v37  ;;  %v6999_v32 = vld [vmem:[#allocation7_spill] sm:$0xff] }
 0x25d   : > { %v5115_v63 = vpop.permute.xlu2 %1867  ;;  %v941_v46 = vmul.f32 0.0625, %v6999_v32 }
 0x25e   : > { %v2252_v7 = vperm.slane %v5115_v63, %v5110_v53  ;;  %v1773_v26 = vunpack.c.h.b16 %v5141_v55  ;;  %v1260_v38 = vadd.f32 %v4932_v22, %v1017_v56 }
 0x25f   : > { %1921 = vperm.xlu1 %3956, %v1752_v33   ;;  %2071 = vperm.xlu0 %3958, %v1802_v49   ;;  %v6997_v33 = vld [vmem:[#allocation64_spill] sm:$0xff]  ;;  %v1184_v37 = vadd.f32 %v5031_v1, %v941_v46 }
 0x260   : > { %v1031_v49 = vmul.f32 0.0625, %v6997_v33  ;;  %v5162_v15 = vpack.c.bf16 %v1261_v54, %v1260_v38  ;;  %v5186_v54 = vadd.s32 4294967272, %v5098_v29  ;;  %v7001_v38 = vld [vmem:[#allocation20_spill] sm:$0xff] }
 0x261   : > { %v958_v33 = vmul.f32 0.0625, %v7001_v38  ;;  %v1797_v38 = vunpack.c.h.b16 %v4921_v6 }
 0x262   : > { %v1274_v12 = vadd.f32 %v4912_v44, %v1031_v49  ;;  %v1818_v18 = vunpack.c.l.b16 %v5162_v15 }
 0x263   : > { %2113 = vperm.xlu2 %3957, %v1816_v19  }
 0x267   : > { %1966 = vperm.xlu1 %3956, %v1767_v25   ;;  %2206 = vperm.xlu0 %3958, %v1847_v34   ;;  %v6998_v25 = vld [vmem:[#allocation6_spill] sm:$0xff] }
 0x268   : > { %v942_v34 = vmul.f32 0.0625, %v6998_v25  ;;  %v1200_v25 = vadd.f32 %v5031_v1, %v957_v9 }
 0x26a   : > { %v1185_v56 = vadd.f32 %v5029_v14, %v942_v34  ;;  %v1201_v34 = vadd.f32 %v5029_v14, %v958_v33 }
 0x26b   : > { %1888 = vperm.xlu2 %3957, %v1741_v23   ;;  %v5172_v23 = vpack.c.bf16 %v1275_v10, %v1274_v12 }
 0x26c   : > { %v5193_v12 = vpack.c.bf16 %v1185_v56, %v1184_v37  ;;  %v5204_v56 = vpack.c.bf16 %v1201_v34, %v1200_v25  ;;  %v7003_v25 = vld [vmem:[#allocation65_spill] sm:$0xff] }
 0x26d   : > { %v5148_v40 = vpop.permute.xlu2 %1876  ;;  %v1832_v49 = vunpack.c.l.b16 %v5172_v23  ;;  %v1034_v34 = vmul.f32 0.0625, %v7003_v25 }
 0x26e   : > { %v1743_v37 = vunpack.c.h.b16 %v5193_v12  ;;  %7002 = vst [vmem:[#allocation24_spill] sm:$0xff] %v5204_v56 }
 0x26f   : > { %2011 = vperm.xlu1 %3956, %v1782_v28   ;;  %1984 = vperm.xlu0 %3958, %v1773_v26   ;;  %v5183_v26 = vadd.s32 4294967288, %v5098_v29 }
 0x271   : > { %v1862_v13 = vpop.permute.xlu1 %1861  ;;  %v5159_v19 = vpop.permute.xlu0 %1957 }
 0x272   : > { %v2246_v32 = vperm.slane %v1862_v13, %v5098_v29 }
 0x273   : > { %2026 = vperm.xlu2 %3957, %v1787_v31  }
 0x275   : > { %v5174_v30 = vpop.permute.xlu2 %1969 }
 0x277   : > { %2053 = vperm.xlu1 %3956, %v1796_v36   ;;  %2119 = vperm.xlu0 %3958, %v1818_v18   ;;  %v7005_v36 = vld [vmem:[#allocation72_spill] sm:$0xff] }
 0x278   : > { %v1047_v25 = vmul.f32 0.0625, %v7005_v36  ;;  %v7008_v36 = vld [vmem:[#allocation18_spill] sm:$0xff] }
 0x279   : > { %v1865_v10 = vpop.permute.xlu1 %1864  ;;  %v5191_v31 = vpop.permute.xlu0 %2014 }
 0x27a   : > { %v2248_v46 = vperm.slane %v1865_v10, %v5183_v26  ;;  %v1758_v10 = vunpack.c.l.b16 %v5204_v56 }
 0x27b   : > { %2161 = vperm.xlu2 %3957, %v1832_v49  }
 0x27c   : > { %v2250_v18 = vsel %vm2249_vm1, %v2248_v46, %v2246_v32  ;;  %v5216_v32 = vadd.s32 4294967248, %v5098_v29  ;;  %v1753_v46 = vunpack.c.h.b16 %v5104_v59  ;;  %v1803_v59 = vunpack.c.h.b16 %v5106_v61 }
 0x27d   : > { %v2102_v24 = vpop.permute.xlu2 %2101  ;;  %v5210_v13 = vsel %vm2253_vm2, %v2252_v7, %v2250_v18  ;;  %v1789_v18 = vunpack.c.h.b16 %v4988_v60 }
 0x27e   : > { %v2431_v9 = vperm.slane %v2102_v24, %v5098_v29  ;;  %v1277_v24 = vadd.f32 %v4961_v17, %v1034_v34  ;;  %v7009_v34 = vld [vmem:[#allocation31_spill] sm:$0xff] }
 0x27f   : > { %2056 = vperm.xlu1 %3956, %v1797_v38   ;;  %1894 = vperm.xlu0 %3958, %v1743_v37   ;;  %v7004_v38 = vld [vmem:[#allocation76_spill] sm:$0xff] }
 0x280   : > { %v1048_v37 = vmul.f32 0.0625, %v7004_v38  ;;  %v5234_v28 = vpack.c.bf16 %v1277_v24, %v4942_v41  ;;  %v1290_v38 = vadd.f32 %v4912_v44, %v1047_v25  ;;  %v973_v25 = vmul.f32 0.0625, %v7009_v34 }
 0x281   : > { %v1910_v33 = vpop.permute.xlu1 %1909  ;;  %v2105_v49 = vpop.permute.xlu0 %2104 }
 0x282   : > { %v2432_v6 = vperm.slane %v2105_v49, %v5183_v26  ;;  %v7006_v49 = vld [vmem:[#allocation19_spill] sm:$0xff]  ;;  %v1834_v61 = vunpack.c.l.b16 %v5234_v28  ;;  %v2307_v27 = vperm.slane %v1910_v33, %v5098_v29  ;;  %v1216_v24 = vadd.f32 %v5031_v1, %v973_v25 }
 0x283   : > { %1939 = vperm.xlu2 %3957, %v1758_v10   ;;  %v1291_v10 = vadd.f32 %v4929_v5, %v1048_v37  ;;  %v960_v37 = vmul.f32 0.0625, %v7008_v36 }
 0x284   : > { %v2433_v63 = vsel %vm2249_vm1, %v2432_v6, %v2431_v9 }
 0x285   : > { %v5220_v7 = vpop.permute.xlu2 %1927 }
 0x287   : > { %1924 = vperm.xlu1 %3956, %v1753_v46   ;;  %2032 = vperm.xlu0 %3958, %v1789_v18   ;;  %v959_v46 = vmul.f32 0.0625, %v7006_v49  ;;  %v5240_v18 = vpack.c.bf16 %v1291_v10, %v1290_v38  ;;  %v974_v49 = vmul.f32 0.0625, %v7010_v3 }
 0x289   : > { %v1913_v9 = vpop.permute.xlu1 %1912  ;;  %v5230_v6 = vpop.permute.xlu0 %1972  ;;  %7007 = vst [vmem:[#allocation8_spill] sm:$0xff] %v5240_v18  ;;  %v1202_v41 = vadd.f32 %v5125_v52, %v959_v46  ;;  %v1848_v38 = vunpack.c.l.b16 %v5240_v18  ;;  %v1217_v34 = vadd.f32 %v5029_v14, %v974_v49 }
 0x28a   : > { %v2308_v10 = vperm.slane %v1913_v9, %v5183_v26 }
 0x28b   : > { %2074 = vperm.xlu2 %3957, %v1803_v59   ;;  %v1203_v59 = vadd.f32 %v5136_v8, %v960_v37 }
 0x28d   : > { %v5243_v2 = vpop.permute.xlu2 %2062  ;;  %v5256_v46 = vpack.c.bf16 %v1203_v59, %v1202_v41  ;;  %v1738_v41 = vunpack.c.l.b16 %v4977_v57  ;;  %v5271_v59 = vpack.c.bf16 %v1217_v34, %v1216_v24  ;;  %v7013_v24 = vld [vmem:[#allocation75_spill] sm:$0xff]  ;;  %v7014_v34 = vperm.slane %v5159_v19, %v5098_v29 }
 0x28f   : > { %2059 = vperm.xlu1 %3956, %v1798_v45   ;;  %2167 = vperm.xlu0 %3958, %v1834_v61   ;;  %v2309_v45 = vsel %vm2249_vm1, %v2308_v10, %v2307_v27  ;;  %v1760_v25 = vunpack.c.l.b16 %v5256_v46  ;;  %7012 = vst [vmem:[#allocation23_spill] sm:$0xff] %v5271_v59 }
 0x291   : > { %v1916_v36 = vpop.permute.xlu1 %1915  ;;  %v2108_v56 = vpop.permute.xlu0 %2107 }
 0x292   : > { %v2310_v3 = vperm.slane %v1916_v36, %v5110_v53  ;;  %v2434_v9 = vperm.slane %v2108_v56, %v5110_v53  ;;  %v5276_v56 = vadd.s32 4294967240, %v5098_v29  ;;  %v1050_v36 = vmul.f32 0.0625, %v7013_v24 }
 0x293   : > { %2209 = vperm.xlu2 %3957, %v1848_v38  }
 0x294   : > { %v5264_v37 = vsel %vm2253_vm2, %v2310_v3, %v2309_v45  ;;  %v2435_v33 = vsel %vm2253_vm2, %v2434_v9, %v2433_v63  ;;  %v1774_v63 = vunpack.c.l.b16 %v5271_v59  ;;  %v7015_v9 = vld [vmem:[#allocation77_spill] sm:$0xff]  ;;  %v1293_v49 = vadd.f32 %v4961_v17, %v1050_v36 }
 0x295   : > { %v5267_v61 = vpop.permute.xlu2 %2152  ;;  %v1049_v45 = vmul.f32 0.0625, %v7015_v9 }
 0x296   : > { %7011 = vst [vmem:[#allocation5_spill] sm:$0xff] %v5267_v61 }
 0x297   : > { %1879 = vperm.xlu1 %3956, %v1738_v41   ;;  %1945 = vperm.xlu0 %3958, %v1760_v25   ;;  %v1784_v25 = vunpack.c.l.b16 %v5009_v62  ;;  %v1292_v19 = vadd.f32 %v4932_v22, %v1049_v45  ;;  %v1819_v62 = vunpack.c.h.b16 %v5162_v15  ;;  %v7019_v45 = vld [vmem:[#allocation34_spill] sm:$0xff] }
 0x299   : > { %v1961_v10 = vpop.permute.xlu1 %1960  ;;  %v5278_v38 = vpop.permute.xlu0 %1882  ;;  %v5305_v61 = vpack.c.bf16 %v1293_v49, %v1292_v19  ;;  %v1828_v49 = vunpack.c.l.b16 %v5046_v58 }
 0x29a   : > { %v2339_v27 = vperm.slane %v1961_v10, %v5183_v26  ;;  %v1805_v10 = vunpack.c.h.b16 %v5000_v21 }
 0x29b   : > { %1987 = vperm.xlu2 %3957, %v1774_v63   ;;  %v7016_v63 = vld [vmem:[#allocation11_spill] sm:$0xff] }
 0x29c   : > { %v5289_v3 = vsel %vm2249_vm1, %v2339_v27, %v7014_v34  ;;  %v943_v57 = vmul.f32 0.0625, %v7016_v63  ;;  %v7017_v27 = vld [vmem:[#allocation10_spill] sm:$0xff] }
 0x29d   : > { %v5292_v41 = vpop.permute.xlu2 %1975  ;;  %v944_v34 = vmul.f32 0.0625, %v7017_v27  ;;  %v976_v27 = vmul.f32 0.0625, %v7019_v45 }
 0x29e   : > { %v1186_v17 = vadd.f32 %v5125_v52, %v943_v57  ;;  %v1850_v57 = vunpack.c.l.b16 %v5305_v61 }
 0x29f   : > { %2017 = vperm.xlu1 %3956, %v1784_v25   ;;  %2080 = vperm.xlu0 %3958, %v1805_v10   ;;  %v7018_v10 = vld [vmem:[#allocation29_spill] sm:$0xff]  ;;  %v1187_v22 = vadd.f32 %v5136_v8, %v944_v34  ;;  %v7022_v34 = vld [vmem:[#allocation38_spill] sm:$0xff] }
 0x2a0   : > { %v975_v63 = vmul.f32 0.0625, %v7018_v10  ;;  %v989_v18 = vmul.f32 0.0625, %v7022_v34 }
 0x2a1   : > { %v1871_v9 = vpop.permute.xlu1 %1870  ;;  %v5302_v59 = vpop.permute.xlu0 %2020  ;;  %v5320_v19 = vpack.c.bf16 %v1187_v22, %v1186_v17 }
 0x2a2   : > { %v2256_v36 = vperm.slane %v1871_v9, %v5186_v54  ;;  %v1218_v9 = vadd.f32 %v5125_v52, %v975_v63  ;;  %v1232_v63 = vadd.f32 %v5031_v1, %v989_v18  ;;  %v1755_v18 = vunpack.c.h.b16 %v4995_v4 }
 0x2a3   : > { %2122 = vperm.xlu2 %3957, %v1819_v62   ;;  %7020 = vst [vmem:[#allocation28_spill] sm:$0xff] %v5320_v19  ;;  %v7021_v62 = vld [vmem:[#allocation37_spill] sm:$0xff]  ;;  %v1744_v17 = vunpack.c.l.b16 %v5320_v19 }
 0x2a4   : > { %v5316_v24 = vsel %vm2257_vm3, %v2256_v36, %v5210_v13  ;;  %v990_v25 = vmul.f32 0.0625, %v7021_v62  ;;  %v1219_v13 = vadd.f32 %v5136_v8, %v976_v27 }
 0x2a5   : > { %v2111_v15 = vpop.permute.xlu2 %2110 }
 0x2a6   : > { %v2436_v10 = vperm.slane %v2111_v15, %v5186_v54  ;;  %v5331_v22 = vpack.c.bf16 %v1219_v13, %v1218_v9  ;;  %v1233_v15 = vadd.f32 %v5029_v14, %v990_v25 }
 0x2a7   : > { %2149 = vperm.xlu1 %3956, %v1828_v49   ;;  %2215 = vperm.xlu0 %3958, %v1850_v57   ;;  %v7024_v57 = vld [vmem:[#allocation46_spill] sm:$0xff] }
 0x2a8   : > { %v2437_v36 = vsel %vm2257_vm3, %v2436_v10, %v2435_v33  ;;  %v1000_v27 = vmul.f32 0.0625, %v7024_v57  ;;  %v7025_v33 = vld [vmem:[#allocation43_spill] sm:$0xff]  ;;  %v1776_v25 = vunpack.c.l.b16 %v5331_v22  ;;  %v5348_v13 = vpack.c.bf16 %v1233_v15, %v1232_v63  ;;  %v7028_v15 = vld [vmem:[#allocation12_spill] sm:$0xff] }
 0x2a9   : > { %v1919_v45 = vpop.permute.xlu1 %1918  ;;  %v5328_v58 = vpop.permute.xlu0 %2155  ;;  %v999_v10 = vmul.f32 0.0625, %v7025_v33 }
 0x2aa   : > { %7023 = vst [vmem:[#allocation25_spill] sm:$0xff] %v5328_v58  ;;  %v2312_v62 = vperm.slane %v1919_v45, %v5186_v54  ;;  %v1243_v45 = vadd.f32 %v4929_v5, %v1000_v27  ;;  %v1790_v4 = vunpack.c.l.b16 %v5348_v13  ;;  %v946_v27 = vmul.f32 0.0625, %v7028_v15 }
 0x2ab   : > { %1897 = vperm.xlu2 %3957, %v1744_v17   ;;  %7027 = vst [vmem:[#allocation36_spill] sm:$0xff] %v5348_v13  ;;  %v5354_v17 = vadd.s32 4294967232, %v5098_v29 }
 0x2ac   : > { %v5342_v34 = vsel %vm2257_vm3, %v2312_v62, %v5264_v37  ;;  %v1242_v37 = vadd.f32 %v4912_v44, %v999_v10  ;;  %v7029_v44 = vld [vmem:[#allocation9_spill] sm:$0xff] }
 0x2ad   : > { %v5344_v9 = vpop.permute.xlu2 %2200  ;;  %v945_v10 = vmul.f32 0.0625, %v7029_v44 }
 0x2ae   : > { %7026 = vst [vmem:[#allocation35_spill] sm:$0xff] %v5344_v9  ;;  %v5360_v49 = vpack.c.bf16 %v1243_v45, %v1242_v37  ;;  %v1821_v45 = vunpack.c.h.b16 %v5003_v20  ;;  %v1189_v37 = vadd.f32 %v5138_v50, %v946_v27  ;;  %v7031_v27 = vld [vmem:[#allocation41_spill] sm:$0xff]  ;;  %v7034_v20 = vld [vmem:[#allocation50_spill] sm:$0xff] }
 0x2af   : > { %1930 = vperm.xlu1 %3956, %v1755_v18   ;;  %1993 = vperm.xlu0 %3958, %v1776_v25   ;;  %v991_v9 = vmul.f32 0.0625, %v7031_v27  ;;  %v1006_v58 = vmul.f32 0.0625, %v7034_v20 }
 0x2b0   : > { %v1800_v57 = vunpack.c.l.b16 %v5360_v49 }
 0x2b1   : > { %v1964_v62 = vpop.permute.xlu1 %1963  ;;  %v5357_v33 = vpop.permute.xlu0 %1885 }
 0x2b2   : > { %v2341_v63 = vperm.slane %v1964_v62, %v5110_v53  ;;  %v7032_v62 = vld [vmem:[#allocation40_spill] sm:$0xff] }
 0x2b3   : > { %2035 = vperm.xlu2 %3957, %v1790_v4   ;;  %v1188_v4 = vadd.f32 %v5064_v47, %v945_v10  ;;  %v1844_v10 = vunpack.c.l.b16 %v4917_v51  ;;  %v1761_v51 = vunpack.c.h.b16 %v5256_v46  ;;  %v1756_v46 = vunpack.c.l.b16 %v5087_v39  ;;  %v7037_v39 = vld [vmem:[#allocation21_spill] sm:$0xff] }
 0x2b4   : > { %v5368_v18 = vsel %vm2253_vm2, %v2341_v63, %v5289_v3  ;;  %v1835_v63 = vunpack.c.h.b16 %v5234_v28  ;;  %v1234_v28 = vadd.f32 %v5125_v52, %v991_v9 }
 0x2b5   : > { %v5371_v25 = vpop.permute.xlu2 %1978  ;;  %v5382_v44 = vpack.c.bf16 %v1189_v37, %v1188_v4  ;;  %v7033_v4 = vld [vmem:[#allocation47_spill] sm:$0xff] }
 0x2b7   : > { %2065 = vperm.xlu1 %3956, %v1800_v57   ;;  %2128 = vperm.xlu0 %3958, %v1821_v45   ;;  %v992_v57 = vmul.f32 0.0625, %v7032_v62  ;;  %v1746_v19 = vunpack.c.l.b16 %v5382_v44 }
 0x2b9   : > { %v2006_v15 = vpop.permute.xlu1 %2005  ;;  %v5379_v3 = vpop.permute.xlu0 %2023 }
 0x2ba   : > { %7030 = vst [vmem:[#allocation81_spill] sm:$0xff] %v5379_v3  ;;  %v2369_v5 = vperm.slane %v2006_v15, %v5098_v29  ;;  %v1005_v15 = vmul.f32 0.0625, %v7033_v4 }
 0x2bb   : > { %2170 = vperm.xlu2 %3957, %v1835_v63   ;;  %v1235_v63 = vadd.f32 %v5136_v8, %v992_v57  ;;  %v5410_v57 = vadd.s32 4294967224, %v5098_v29 }
 0x2bc   : > { %v1248_v9 = vadd.f32 %v5031_v1, %v1005_v15 }
 0x2bd   : > { %v2114_v45 = vpop.permute.xlu2 %2113  ;;  %v5402_v3 = vpack.c.bf16 %v1235_v63, %v1234_v28 }
 0x2be   : > { %v2438_v37 = vperm.slane %v2114_v45, %v5167_v42  ;;  %v1249_v45 = vadd.f32 %v5029_v14, %v1006_v58 }
 0x2bf   : > { %2197 = vperm.xlu1 %3956, %v1844_v10   ;;  %1903 = vperm.xlu0 %3958, %v1746_v19   ;;  %v1792_v28 = vunpack.c.l.b16 %v5402_v3  ;;  %v1837_v19 = vunpack.c.h.b16 %v5012_v48 }
 0x2c0   : > { %v5397_v62 = vsel %vm2261_vm4, %v2438_v37, %v2437_v36  ;;  %v5419_v37 = vpack.c.bf16 %v1249_v45, %v1248_v9  ;;  %v7038_v9 = vld [vmem:[#allocation22_spill] sm:$0xff] }
 0x2c1   : > { %7035 = vst [vmem:[#allocation16_spill] sm:$0xff] %v5397_v62  ;;  %v2009_v27 = vpop.permute.xlu1 %2008  ;;  %v5399_v13 = vpop.permute.xlu0 %2158  ;;  %v961_v45 = vmul.f32 0.0625, %v7038_v9 }
 0x2c2   : > { %v2370_v20 = vperm.slane %v2009_v27, %v5183_v26  ;;  %7036 = vst [vmem:[#allocation17_spill] sm:$0xff] %v5419_v37  ;;  %v1806_v63 = vunpack.c.l.b16 %v5419_v37  ;;  %v7039_v27 = vperm.slane %v5148_v40, %v5144_v16  ;;  %v7043_v40 = vld [vmem:[#allocation59_spill] sm:$0xff] }
 0x2c3   : > { %1948 = vperm.xlu2 %3957, %v1761_v51   ;;  %v962_v51 = vmul.f32 0.0625, %v7037_v39 }
 0x2c4   : > { %v5413_v36 = vsel %vm2249_vm1, %v2370_v20, %v2369_v5 }
 0x2c5   : > { %v5415_v10 = vpop.permute.xlu2 %1888 }
 0x2c7   : > { %1933 = vperm.xlu1 %3956, %v1756_v46   ;;  %2041 = vperm.xlu0 %3958, %v1792_v28   ;;  %v1801_v28 = vunpack.c.h.b16 %v5360_v49  ;;  %v1851_v49 = vunpack.c.h.b16 %v5305_v61  ;;  %v1846_v61 = vunpack.c.l.b16 %v5128_v43  ;;  %v1777_v43 = vunpack.c.h.b16 %v5331_v22 }
 0x2c8   : > { %v7045_v22 = vperm.slane %v5174_v30, %v5167_v42  ;;  %v7047_v30 = vperm.slane %v5292_v41, %v5216_v32 }
 0x2c9   : > { %v1874_v4 = vpop.permute.xlu1 %1873  ;;  %v5423_v15 = vpop.permute.xlu0 %1936 }
 0x2ca   : > { %v2260_v5 = vperm.slane %v1874_v4, %v5167_v42  ;;  %v1205_v4 = vadd.f32 %v5138_v50, %v962_v51 }
 0x2cb   : > { %2083 = vperm.xlu2 %3957, %v1806_v63  }
 0x2cc   : > { %v2262_v20 = vsel %vm2261_vm4, %v2260_v5, %v5316_v24  ;;  %v1204_v24 = vadd.f32 %v5064_v47, %v961_v45  ;;  %v7042_v45 = vld [vmem:[#allocation48_spill] sm:$0xff] }
 0x2cd   : > { %v5433_v46 = vpop.permute.xlu2 %2026  ;;  %v5442_v58 = vsel %vm2265_vm5, %v7039_v27, %v2262_v20  ;;  %v7041_v27 = vld [vmem:[#allocation49_spill] sm:$0xff] }
 0x2ce   : > { %v5450_v9 = vpack.c.bf16 %v1205_v4, %v1204_v24  ;;  %v1007_v20 = vmul.f32 0.0625, %v7041_v27  ;;  %v1021_v27 = vmul.f32 0.0625, %v7043_v40  ;;  %v7052_v40 = vld [vmem:[#allocation57_spill] sm:$0xff] }
 0x2cf   : > { %2068 = vperm.xlu1 %3956, %v1801_v28   ;;  %2176 = vperm.xlu0 %3958, %v1837_v19   ;;  %v1008_v28 = vmul.f32 0.0625, %v7042_v45 }
 0x2d0   : > { %7040 = vst [vmem:[#allocation14_spill] sm:$0xff] %v5450_v9  ;;  %v1763_v4 = vunpack.c.h.b16 %v5450_v9  ;;  %v1250_v24 = vadd.f32 %v5125_v52, %v1007_v20  ;;  %v1264_v9 = vadd.f32 %v5031_v1, %v1021_v27 }
 0x2d1   : > { %v1922_v5 = vpop.permute.xlu1 %1921  ;;  %v5447_v39 = vpop.permute.xlu0 %2071 }
 0x2d2   : > { %v2314_v51 = vperm.slane %v1922_v5, %v5167_v42 }
 0x2d3   : > { %2218 = vperm.xlu2 %3957, %v1851_v49   ;;  %v7044_v49 = vld [vmem:[#allocation58_spill] sm:$0xff] }
 0x2d4   : > { %v5458_v19 = vsel %vm2261_vm4, %v2314_v51, %v5342_v34  ;;  %v1022_v62 = vmul.f32 0.0625, %v7044_v49  ;;  %v1251_v34 = vadd.f32 %v5136_v8, %v1008_v28 }
 0x2d5   : > { %v5461_v63 = vpop.permute.xlu2 %2161 }
 0x2d6   : > { %v1622_v37 = vpack.c.bf16 %v1251_v34, %v1250_v24  ;;  %v1265_v20 = vadd.f32 %v5029_v14, %v1022_v62  ;;  %v7046_v34 = vperm.slane %v5230_v6, %v5144_v16 }
 0x2d7   : > { %2203 = vperm.xlu1 %3956, %v1846_v61   ;;  %1954 = vperm.xlu0 %3958, %v1763_v4   ;;  %v5480_v61 = vadd.s32 4294967216, %v5098_v29  ;;  %v1772_v4 = vunpack.c.l.b16 %v5141_v55 }
 0x2d8   : > { %v1808_v27 = vunpack.c.l.b16 %v1622_v37  ;;  %v5491_v49 = vpack.c.bf16 %v1265_v20, %v1264_v9  ;;  %v7048_v9 = vperm.slane %v5371_v25, %v5276_v56  ;;  %v1817_v25 = vunpack.c.h.b16 %v5119_v0 }
 0x2d9   : > { %v1967_v51 = vpop.permute.xlu1 %1966  ;;  %v5471_v45 = vpop.permute.xlu0 %2206 }
 0x2da   : > { %v2343_v5 = vperm.slane %v1967_v51, %v5186_v54  ;;  %v1822_v20 = vunpack.c.l.b16 %v5491_v49 }
 0x2db   : > { %1996 = vperm.xlu2 %3957, %v1777_v43  }
 0x2dc   : > { %v2344_v28 = vsel %vm2257_vm3, %v2343_v5, %v5368_v18 }
 0x2dd   : > { %v2346_v62 = vsel %vm2261_vm4, %v7045_v22, %v2344_v28  ;;  %v5489_v24 = vpop.permute.xlu2 %1939 }
 0x2de   : > { %v2348_v51 = vsel %vm2265_vm5, %v7046_v34, %v2346_v62  ;;  %v1853_v62 = vunpack.c.h.b16 %v5034_v11 }
 0x2df   : > { %1981 = vperm.xlu1 %3956, %v1772_v4   ;;  %2089 = vperm.xlu0 %3958, %v1808_v27   ;;  %v2350_v18 = vsel %vm2269_vm6, %v7047_v30, %v2348_v51  ;;  %v7049_v27 = vperm.slane %v5191_v31, %v5186_v54 }
 0x2e0   : > { %v5507_v5 = vsel %vm2273_vm7, %v7048_v9, %v2350_v18 }
 0x2e1   : > { %v2012_v43 = vpop.permute.xlu1 %2011  ;;  %v5509_v6 = vpop.permute.xlu0 %1984 }
 0x2e2   : > { %v2372_v28 = vperm.slane %v2012_v43, %v5110_v53  ;;  %v1742_v43 = vunpack.c.l.b16 %v5193_v12 }
 0x2e3   : > { %2131 = vperm.xlu2 %3957, %v1822_v20   ;;  %v1809_v20 = vunpack.c.h.b16 %v1622_v37 }
 0x2e4   : > { %v2373_v41 = vsel %vm2253_vm2, %v2372_v28, %v5413_v36  ;;  %v1747_v36 = vunpack.c.h.b16 %v5382_v44  ;;  %v7051_v44 = vld [vmem:[#allocation67_spill] sm:$0xff] }
 0x2e5   : > { %v5517_v22 = vpop.permute.xlu2 %2074  ;;  %v5525_v34 = vsel %vm2257_vm3, %v7049_v27, %v2373_v41  ;;  %v5541_v41 = vadd.s32 4294967208, %v5098_v29  ;;  %v1037_v27 = vmul.f32 0.0625, %v7051_v44  ;;  %v7053_v44 = vld [vmem:[#allocation62_spill] sm:$0xff] }
 0x2e7   : > { %2116 = vperm.xlu1 %3956, %v1817_v25   ;;  %2224 = vperm.xlu0 %3958, %v1853_v62   ;;  %v7050_v25 = vld [vmem:[#allocation66_spill] sm:$0xff]  ;;  %v1280_v12 = vadd.f32 %v5031_v1, %v1037_v27  ;;  %v1854_v1 = vunpack.c.l.b16 %v5051_v35 }
 0x2e8   : > { %v1038_v62 = vmul.f32 0.0625, %v7050_v25  ;;  %v1023_v25 = vmul.f32 0.0625, %v7052_v40 }
 0x2e9   : > { %v2054_v30 = vpop.permute.xlu1 %2053  ;;  %v5529_v18 = vpop.permute.xlu0 %2119 }
 0x2ea   : > { %v2400_v0 = vperm.slane %v2054_v30, %v5098_v29  ;;  %v1281_v37 = vadd.f32 %v5029_v14, %v1038_v62  ;;  %v1266_v14 = vadd.f32 %v5125_v52, %v1023_v25 }
 0x2eb   : > { %1906 = vperm.xlu2 %3957, %v1747_v36   ;;  %v1793_v36 = vunpack.c.h.b16 %v5402_v3  ;;  %v1788_v3 = vunpack.c.l.b16 %v4988_v60 }
 0x2ec   : > { %v1637_v27 = vpack.c.bf16 %v1281_v37, %v1280_v12 }
 0x2ed   : > { %v5535_v31 = vpop.permute.xlu2 %2209 }
 0x2ee   : > { %v1838_v60 = vunpack.c.l.b16 %v1637_v27 }
 0x2ef   : > { %1891 = vperm.xlu1 %3956, %v1742_v43   ;;  %2092 = vperm.xlu0 %3958, %v1809_v20   ;;  %v1024_v43 = vmul.f32 0.0625, %v7053_v44 }
 0x2f1   : > { %v2057_v30 = vpop.permute.xlu1 %2056  ;;  %v5545_v9 = vpop.permute.xlu0 %1894  ;;  %v1267_v40 = vadd.f32 %v5136_v8, %v1024_v43 }
 0x2f2   : > { %v2401_v4 = vperm.slane %v2057_v30, %v5183_v26  ;;  %v7054_v30 = vld [vmem:[#allocation42_spill] sm:$0xff] }
 0x2f3   : > { %2044 = vperm.xlu2 %3957, %v1793_v36   ;;  %v994_v28 = vmul.f32 0.0625, %v7054_v30  ;;  %v7055_v36 = vld [vmem:[#allocation39_spill] sm:$0xff]  ;;  %v5568_v55 = vpack.c.bf16 %v1267_v40, %v1266_v14  ;;  %v1833_v14 = vunpack.c.h.b16 %v5172_v23 }
 0x2f4   : > { %v2402_v20 = vsel %vm2249_vm1, %v2401_v4, %v2400_v0  ;;  %v993_v4 = vmul.f32 0.0625, %v7055_v36  ;;  %v7057_v30 = vld [vmem:[#allocation51_spill] sm:$0xff] }
 0x2f5   : > { %v5556_v51 = vpop.permute.xlu2 %1987  ;;  %7056 = vst [vmem:[#allocation44_spill] sm:$0xff] %v5568_v55  ;;  %v1237_v12 = vadd.f32 %v5138_v50, %v994_v28  ;;  %v1825_v28 = vunpack.c.h.b16 %v5568_v55  ;;  %v7063_v55 = vld [vmem:[#allocation24_spill] sm:$0xff] }
 0x2f6   : > { %v1236_v43 = vadd.f32 %v5064_v47, %v993_v4 }
 0x2f7   : > { %2029 = vperm.xlu1 %3956, %v1788_v3   ;;  %2227 = vperm.xlu0 %3958, %v1854_v1   ;;  %v1010_v3 = vmul.f32 0.0625, %v7057_v30  ;;  %v7058_v1 = vld [vmem:[#allocation52_spill] sm:$0xff] }
 0x2f8   : > { %v1009_v36 = vmul.f32 0.0625, %v7058_v1  ;;  %v7061_v1 = vld [vmem:[#allocation80_spill] sm:$0xff] }
 0x2f9   : > { %v1925_v0 = vpop.permute.xlu1 %1924  ;;  %v5566_v44 = vpop.permute.xlu0 %2032  ;;  %v1253_v25 = vadd.f32 %v5138_v50, %v1010_v3 }
 0x2fa   : > { %v2316_v37 = vperm.slane %v1925_v0, %v5144_v16  ;;  %v5583_v0 = vpack.c.bf16 %v1237_v12, %v1236_v43  ;;  %v1252_v23 = vadd.f32 %v5064_v47, %v1009_v36 }
 0x2fb   : > { %2179 = vperm.xlu2 %3957, %v1838_v60   ;;  %v7060_v60 = vperm.slane %v5220_v7, %v5216_v32 }
 0x2fc   : > { %v2317_v62 = vsel %vm2265_vm5, %v2316_v37, %v5458_v19  ;;  %7059 = vst [vmem:[#allocation13_spill] sm:$0xff] %v5583_v0  ;;  %v1794_v12 = vunpack.c.l.b16 %v5583_v0  ;;  %v1623_v43 = vpack.c.bf16 %v1253_v25, %v1252_v23  ;;  %v1759_v0 = vunpack.c.h.b16 %v7063_v55 }
 0x2fd   : > { %v5580_v40 = vpop.permute.xlu2 %2122  ;;  %v5590_v4 = vsel %vm2269_vm6, %v7060_v60, %v2317_v62  ;;  %v5602_v62 = vadd.s32 4294967200, %v5098_v29  ;;  %v1055_v60 = vmul.f32 0.0625, %v7061_v1  ;;  %v1839_v55 = vunpack.c.h.b16 %v1637_v27 }
 0x2fe   : > { %v1811_v25 = vunpack.c.h.b16 %v1623_v43  ;;  %v1804_v27 = vunpack.c.l.b16 %v5000_v21  ;;  %v1810_v21 = vunpack.c.l.b16 %v1623_v43 }
 0x2ff   : > { %2164 = vperm.xlu1 %3956, %v1833_v14   ;;  %2140 = vperm.xlu0 %3958, %v1825_v28   ;;  %v7062_v14 = vld [vmem:[#allocation78_spill] sm:$0xff]  ;;  %v1298_v23 = vadd.f32 %v5125_v52, %v1055_v60 }
 0x300   : > { %v1056_v28 = vmul.f32 0.0625, %v7062_v14 }
 0x301   : > { %v2060_v19 = vpop.permute.xlu1 %2059  ;;  %v5595_v37 = vpop.permute.xlu0 %2167 }
 0x302   : > { %v2403_v3 = vperm.slane %v2060_v19, %v5110_v53  ;;  %v7064_v19 = vperm.slane %v5243_v2, %v5186_v54 }
 0x303   : > { %2047 = vperm.xlu2 %3957, %v1794_v12   ;;  %v7091_v12 = vld [vmem:[#allocation36_spill] sm:$0xff] }
 0x304   : > { %v2404_v36 = vsel %vm2253_vm2, %v2403_v3, %v2402_v20  ;;  %v1299_v20 = vadd.f32 %v5136_v8, %v1056_v28 }
 0x305   : > { %v5607_v30 = vpop.permute.xlu2 %1897  ;;  %v5615_v7 = vsel %vm2257_vm3, %v7064_v19, %v2404_v36 }
 0x306   : > { %v1646_v14 = vpack.c.bf16 %v1299_v20, %v1298_v23  ;;  %v7066_v20 = vperm.slane %v5357_v33, %v5354_v17  ;;  %v7068_v33 = vld [vmem:[#allocation82_spill] sm:$0xff] }
 0x307   : > { %1942 = vperm.xlu1 %3956, %v1759_v0   ;;  %2098 = vperm.xlu0 %3958, %v1811_v25   ;;  %v7065_v0 = vperm.slane %v5278_v38, %v5276_v56  ;;  %v7067_v38 = vperm.slane %v5415_v10, %v5410_v57  ;;  %v1058_v2 = vmul.f32 0.0625, %v7068_v33  ;;  %v7069_v10 = vperm.slane %v5302_v59, %v5144_v16  ;;  %v7071_v33 = vld [vmem:[#allocation81_spill] sm:$0xff] }
 0x308   : > { %v1856_v23 = vunpack.c.l.b16 %v1646_v14  ;;  %v7074_v59 = vperm.slane %v5433_v46, %v5276_v56  ;;  %v5685_v46 = vadd.s32 4294967192, %v5098_v29 }
 0x309   : > { %v1880_v3 = vpop.permute.xlu1 %1879  ;;  %v5620_v1 = vpop.permute.xlu0 %1945 }
 0x30a   : > { %v2268_v60 = vperm.slane %v1880_v3, %v5216_v32 }
 0x30b   : > { %2182 = vperm.xlu2 %3957, %v1839_v55  }
 0x30c   : > { %v2270_v36 = vsel %vm2269_vm6, %v2268_v60, %v5442_v58 }
 0x30d   : > { %v2274_v28 = vsel %vm2273_vm7, %v7065_v0, %v2270_v36  ;;  %v5631_v25 = vpop.permute.xlu2 %2035 }
 0x30e   : > { %v2278_v3 = vsel %vm2277_vm8, %v7066_v20, %v2274_v28  ;;  %v7070_v20 = vld [vmem:[#allocation8_spill] sm:$0xff] }
 0x30f   : > { %2077 = vperm.xlu1 %3956, %v1804_v27   ;;  %2233 = vperm.xlu0 %3958, %v1856_v23   ;;  %v5644_v58 = vsel %vm2281_vm9, %v7067_v38, %v2278_v3  ;;  %v1849_v43 = vunpack.c.h.b16 %v7070_v20  ;;  %v1857_v3 = vunpack.c.h.b16 %v1646_v14  ;;  %v1301_v38 = vadd.f32 %v5138_v50, %v1058_v2  ;;  %v7075_v14 = vld [vmem:[#allocation70_spill] sm:$0xff] }
 0x310   : > { %v1040_v2 = vmul.f32 0.0625, %v7075_v14  ;;  %v7081_v14 = vld [vmem:[#allocation23_spill] sm:$0xff] }
 0x311   : > { %v2018_v55 = vpop.permute.xlu1 %2017  ;;  %v5646_v60 = vpop.permute.xlu0 %2080 }
 0x312   : > { %v2376_v36 = vperm.slane %v2018_v55, %v5167_v42  ;;  %v1855_v55 = vunpack.c.h.b16 %v5051_v35 }
 0x313   : > { %2095 = vperm.xlu2 %3957, %v1810_v21   ;;  %v7072_v21 = vperm.slane %v7071_v33, %v5216_v32  ;;  %v7076_v33 = vld [vmem:[#allocation79_spill] sm:$0xff] }
 0x314   : > { %v2377_v28 = vsel %vm2261_vm4, %v2376_v36, %v5525_v34  ;;  %v7073_v36 = vld [vmem:[#allocation69_spill] sm:$0xff]  ;;  %v1647_v19 = vpack.c.bf16 %v1301_v38, %v7076_v33 }
 0x315   : > { %v2379_v27 = vsel %vm2265_vm5, %v7069_v10, %v2377_v28  ;;  %v5658_v23 = vpop.permute.xlu2 %2170  ;;  %v1039_v0 = vmul.f32 0.0625, %v7073_v36 }
 0x316   : > { %v2381_v34 = vsel %vm2269_vm6, %v7072_v21, %v2379_v27  ;;  %v1283_v21 = vadd.f32 %v5136_v8, %v1040_v2  ;;  %v1859_v33 = vunpack.c.h.b16 %v1647_v19  ;;  %v1858_v8 = vunpack.c.l.b16 %v1647_v19 }
 0x317   : > { %2212 = vperm.xlu1 %3956, %v1849_v43   ;;  %2236 = vperm.xlu0 %3958, %v1857_v3   ;;  %v5673_v28 = vsel %vm2273_vm7, %v7074_v59, %v2381_v34  ;;  %v1282_v27 = vadd.f32 %v5125_v52, %v1039_v0  ;;  %v7077_v34 = vld [vmem:[#allocation5_spill] sm:$0xff] }
 0x318   : > { %v7078_v36 = vperm.slane %v7077_v34, %v5183_v26  ;;  %v7079_v59 = vld [vmem:[#allocation25_spill] sm:$0xff] }
 0x319   : > { %v2150_v10 = vpop.permute.xlu1 %2149  ;;  %v5676_v20 = vpop.permute.xlu0 %2215  ;;  %v7080_v38 = vperm.slane %v7079_v59, %v5110_v53  ;;  %v5699_v3 = vpack.c.bf16 %v1283_v21, %v1282_v27  ;;  %v7085_v27 = vld [vmem:[#allocation68_spill] sm:$0xff] }
 0x31a   : > { %v2462_v43 = vperm.slane %v2150_v10, %v5098_v29  ;;  %v1775_v10 = vunpack.c.h.b16 %v7081_v14  ;;  %v1041_v21 = vmul.f32 0.0625, %v7085_v27 }
 0x31b   : > { %2230 = vperm.xlu2 %3957, %v1855_v55   ;;  %v7082_v55 = vperm.slane %v5399_v13, %v5186_v54  ;;  %v1841_v14 = vunpack.c.h.b16 %v5699_v3 }
 0x31c   : > { %v2464_v35 = vsel %vm2249_vm1, %v7078_v36, %v2462_v43  ;;  %v7083_v43 = vld [vmem:[#allocation71_spill] sm:$0xff]  ;;  %v7084_v36 = vperm.slane %v5461_v63, %v5167_v42  ;;  %v1284_v63 = vadd.f32 %v5064_v47, %v1041_v21 }
 0x31d   : > { %v2466_v52 = vsel %vm2253_vm2, %v7080_v38, %v2464_v35  ;;  %v5696_v0 = vpop.permute.xlu2 %1948  ;;  %v1042_v34 = vmul.f32 0.0625, %v7083_v43 }
 0x31e   : > { %v2468_v2 = vsel %vm2257_vm3, %v7082_v55, %v2466_v52 }
 0x31f   : > { %1990 = vperm.xlu1 %3956, %v1775_v10   ;;  %2242 = vperm.xlu0 %3958, %v1859_v33   ;;  %v5712_v35 = vsel %vm2261_vm4, %v7084_v36, %v2468_v2  ;;  %v1285_v13 = vadd.f32 %v5138_v50, %v1042_v34  ;;  %v7086_v2 = vld [vmem:[#allocation83_spill] sm:$0xff]  ;;  %v5746_v10 = vadd.s32 4294967184, %v5098_v29 }
 0x320   : > { %v1820_v43 = vunpack.c.l.b16 %v7086_v2 }
 0x321   : > { %v1931_v59 = vpop.permute.xlu1 %1930  ;;  %v5715_v38 = vpop.permute.xlu0 %1993  ;;  %v5728_v36 = vpack.c.bf16 %v1285_v13, %v1284_v63  ;;  %v7088_v63 = vld [vmem:[#allocation28_spill] sm:$0xff] }
 0x322   : > { %v2320_v52 = vperm.slane %v1931_v59, %v5276_v56  ;;  %v1745_v2 = vunpack.c.h.b16 %v7088_v63 }
 0x323   : > { %2188 = vperm.xlu2 %3957, %v1841_v14   ;;  %7087 = vst [vmem:[#allocation45_spill] sm:$0xff] %v5728_v36  ;;  %v1842_v14 = vunpack.c.l.b16 %v5728_v36  ;;  %v1791_v36 = vunpack.c.h.b16 %v7091_v12 }
 0x324   : > { %v2321_v33 = vsel %vm2273_vm7, %v2320_v52, %v5590_v4 }
 0x325   : > { %v5725_v55 = vpop.permute.xlu2 %2083 }
 0x327   : > { %2125 = vperm.xlu1 %3956, %v1820_v43  }
 0x329   : > { %v2066_v27 = vpop.permute.xlu1 %2065  ;;  %v5732_v59 = vpop.permute.xlu0 %2128 }
 0x32a   : > { %v2407_v21 = vperm.slane %v2066_v27, %v5167_v42 }
 0x32b   : > { %2191 = vperm.xlu2 %3957, %v1842_v14  }
 0x32c   : > { %v2408_v52 = vsel %vm2261_vm4, %v2407_v21, %v5615_v7  ;;  %v7089_v21 = vld [vmem:[#allocation35_spill] sm:$0xff] }
 0x32d   : > { %v5740_v13 = vpop.permute.xlu2 %2218  ;;  %v7090_v63 = vperm.slane %v7089_v21, %v5183_v26 }
 0x32f   : > { %1900 = vperm.xlu1 %3956, %v1745_v2  }
 0x331   : > { %v2198_v34 = vpop.permute.xlu1 %2197  ;;  %v5748_v27 = vpop.permute.xlu0 %1903 }
 0x332   : > { %v2493_v14 = vperm.slane %v2198_v34, %v5098_v29 }
 0x333   : > { %2239 = vperm.xlu2 %3957, %v1858_v8  }
 0x334   : > { %v2495_v4 = vsel %vm2249_vm1, %v7090_v63, %v2493_v14  ;;  %v7092_v14 = vperm.slane %v5423_v15, %v5410_v57  ;;  %vm2526_vm1 = vcmask 1042434  }
 0x335   : > { %v5757_v43 = vpop.permute.xlu2 %1996 }
 0x336   : > { %v2363_v2 = vperm.slane %v5757_v43, %v5685_v46  ;;  %v7124_v43 = vperm.slane %v5732_v59, %v5410_v57 }
 0x337   : > { %2038 = vperm.xlu1 %3956, %v1791_v36   ;;  %v1836_v36 = vunpack.c.l.b16 %v5012_v48  ;;  %v7096_v48 = vperm.slane %v5517_v22, %v5276_v56 }
 0x339   : > { %v1934_v19 = vpop.permute.xlu1 %1933  ;;  %v5762_v34 = vpop.permute.xlu0 %2041 }
 0x33a   : > { %v2322_v7 = vperm.slane %v1934_v19, %v5354_v17  ;;  %v7093_v19 = vperm.slane %v5489_v24, %v5480_v61 }
 0x33c   : > { %v2323_v26 = vsel %vm2277_vm8, %v2322_v7, %v2321_v33  ;;  %v3998_v7 = vld [vmem:[%s4308_s20 + $0x100] sm:$0xff] }
 0x33d   : > { %v2325_v12 = vsel %vm2281_vm9, %v7092_v14, %v2323_v26  ;;  %v5772_v21 = vpop.permute.xlu2 %2131  ;;  %v5790_v14 = vadd.s32 4294967176, %v5098_v29 }
 0x33e   : > { %v5781_v8 = vsel %vm2285_vm10, %v7093_v19, %v2325_v12  ;;  %v7094_v12 = vperm.slane %v5447_v39, %v5216_v32 }
 0x33f   : > { %2173 = vperm.xlu1 %3956, %v1836_v36  }
 0x341   : > { %v2069_v33 = vpop.permute.xlu1 %2068  ;;  %1366 = vxpose.xlu0.b32.start [1/16] (narrow) %v3998_v7, 16  ;;  %v5784_v15 = vpop.permute.xlu0 %2176  ;;  %v7095_v7 = vld [vmem:[#allocation14_spill] sm:$0xff] }
 0x342   : > { %v2409_v26 = vperm.slane %v2069_v33, %v5144_v16  ;;  %v1762_v63 = vunpack.c.l.b16 %v7095_v7  ;;  %v7097_v33 = vperm.slane %v5471_v45, %v5186_v54 }
 0x344   : > { %v2410_v24 = vsel %vm2265_vm5, %v2409_v26, %v2408_v52  ;;  %v3999_v26 = vld [vmem:[%s4308_s20 + $0x108] sm:$0xff] }
 0x345   : > { %v2412_v36 = vsel %vm2269_vm6, %v7094_v12, %v2410_v24  ;;  %v5797_v19 = vpop.permute.xlu2 %1906 }
 0x346   : > { %v5806_v29 = vsel %vm2273_vm7, %v7096_v48, %v2412_v36  ;;  %v7098_v48 = vld [vmem:[#allocation17_spill] sm:$0xff] }
 0x347   : > { %1951 = vperm.xlu1 %3956, %v1762_v63   ;;  %v1807_v36 = vunpack.c.h.b16 %v7098_v48  ;;  %v7099_v63 = vperm.slane %v5535_v31, %v5167_v42  ;;  %v7102_v42 = vperm.slane %v5509_v6, %v5410_v57  ;;  %v4002_v6 = vld [vmem:[%s4308_s20] sm:$0xff] }
 0x349   : > { %v2204_v52 = vpop.permute.xlu1 %2203  ;;  %1367 = vxpose.xlu0.b32.cont [2/16] (narrow) %v3999_v26, 16  ;;  %v5809_v39 = vpop.permute.xlu0 %1954 }
 0x34a   : > { %v2496_v24 = vperm.slane %v2204_v52, %v5110_v53  ;;  %v2336_v12 = vperm.slane %v5809_v39, %v5790_v14  ;;  %v4000_v52 = vld [vmem:[%s4308_s20 + $0x110] sm:$0xff] }
 0x34c   : > { %v2497_v7 = vsel %vm2253_vm2, %v2496_v24, %v2495_v4  ;;  %v7100_v24 = vld [vmem:[#allocation32_spill] sm:$0xff]  ;;  %vm2528_vm2 = vcmask 1043459  }
 0x34d   : > { %v2499_v22 = vsel %vm2257_vm3, %v7097_v33, %v2497_v7  ;;  %v978_v54 = vmul.f32 0.0625, %v7100_v24  ;;  %v7101_v33 = vld [vmem:[#allocation33_spill] sm:$0xff]  ;;  %v7104_v24 = vld [vmem:[#allocation16_spill] sm:$0xff]  ;;  %vm2530_vm3 = vcmask 1044484  }
 0x34e   : > { %v5824_v26 = vsel %vm2261_vm4, %v7099_v63, %v2499_v22  ;;  %v977_v7 = vmul.f32 0.0625, %v7101_v33  ;;  %v1852_v22 = vunpack.c.l.b16 %v5034_v11  ;;  %vm2532_vm4 = vcmask 1045509  }
 0x34f   : > { %2086 = vperm.xlu1 %3956, %v1807_v36   ;;  %v1221_v48 = vadd.f32 %v5138_v50, %v978_v54  ;;  %v7103_v36 = vperm.slane %v5556_v51, %v5480_v61  ;;  %v7105_v51 = vperm.slane %v5529_v18, %v5216_v32 }
 0x351   : > { %v1982_v53 = vpop.permute.xlu1 %1981  ;;  %1368 = vxpose.xlu0.b32.cont [3/16] (narrow) %v4000_v52, 16  ;;  %v4001_v52 = vld [vmem:[%s4308_s20 + $0x118] sm:$0xff] }
 0x352   : > { %v2353_v4 = vperm.slane %v1982_v53, %v5354_v17 }
 0x354   : > { %v2354_v45 = vsel %vm2277_vm8, %v2353_v4, %v5507_v5  ;;  %v1220_v5 = vadd.f32 %v5064_v47, %v977_v7  ;;  %v7106_v7 = vperm.slane %v5580_v40, %v5276_v56  ;;  %v7107_v40 = vperm.slane %v5545_v9, %v5541_v41 }
 0x355   : > { %v2356_v31 = vsel %vm2281_vm9, %v7102_v42, %v2354_v45 }
 0x356   : > { %v5842_v63 = vsel %vm2285_vm10, %v7103_v36, %v2356_v31  ;;  %v1607_v4 = vpack.c.bf16 %v1221_v48, %v1220_v5  ;;  %v4004_v48 = vld [vmem:[%s4308_s20 + $0x8] sm:$0xff] }
 0x357   : > { %2221 = vperm.xlu1 %3956, %v1852_v22   ;;  %v4003_v22 = vld [vmem:[%s4308_s20 + $0x120] sm:$0xff] }
 0x358   : > { %v1778_v33 = vunpack.c.l.b16 %v1607_v4 }
 0x359   : > { %v2117_v53 = vpop.permute.xlu1 %2116  ;;  %1369 = vxpose.xlu0.b32.cont [4/16] (narrow) %v4001_v52, 16  ;;  %1302 = vxpose.xlu2.b32.start [1/16] (narrow) %v4002_v6, 16  ;;  %v7108_v52 = vperm.slane %v5607_v30, %v5602_v62 }
 0x35a   : > { %v2440_v11 = vperm.slane %v2117_v53, %v5144_v16  ;;  %v1823_v53 = vunpack.c.h.b16 %v5491_v49  ;;  %v7109_v49 = vperm.slane %v5566_v44, %v5410_v57 }
 0x35c   : > { %v2441_v54 = vsel %vm2265_vm5, %v2440_v11, %v7104_v24  ;;  %v4005_v24 = vld [vmem:[%s4308_s20 + $0x128] sm:$0xff] }
 0x35d   : > { %v2443_v45 = vsel %vm2269_vm6, %v7105_v51, %v2441_v54  ;;  %v1779_v51 = vunpack.c.h.b16 %v1607_v4  ;;  %v7111_v4 = vperm.slane %v5595_v37, %v5216_v32 }
 0x35e   : > { %v5858_v42 = vsel %vm2273_vm7, %v7106_v7, %v2443_v45  ;;  %v7110_v45 = vperm.slane %v5631_v25, %v5480_v61 }
 0x35f   : > { %1999 = vperm.xlu1 %3956, %v1778_v33  }
 0x361   : > { %v1892_v31 = vpop.permute.xlu1 %1891  ;;  %1370 = vxpose.xlu0.b32.cont [5/16] (narrow) %v4003_v22, 16  ;;  %1303 = vxpose.xlu2.b32.cont [2/16] (narrow) %v4004_v48, 16  ;;  %v4008_v22 = vld [vmem:[%s4308_s20 + $0x18] sm:$0xff]  ;;  %v7112_v48 = vld [vmem:[#allocation44_spill] sm:$0xff] }
 0x362   : > { %v2284_v18 = vperm.slane %v1892_v31, %v5480_v61  ;;  %v4007_v31 = vld [vmem:[%s4308_s20 + $0x130] sm:$0xff] }
 0x364   : > { %v2286_v36 = vsel %vm2285_vm10, %v2284_v18, %v5644_v58  ;;  %v4006_v58 = vld [vmem:[%s4308_s20 + $0x10] sm:$0xff]  ;;  %v1824_v18 = vunpack.c.l.b16 %v7112_v48 }
 0x365   : > { %v2290_v5 = vsel %vm2289_vm11, %v7107_v40, %v2286_v36  ;;  %v7113_v36 = vperm.slane %v5658_v23, %v5276_v56  ;;  %v7114_v23 = vperm.slane %v5620_v1, %v5602_v62 }
 0x366   : > { %v5874_v6 = vsel %vm2293_vm12, %v7108_v52, %v2290_v5 }
 0x367   : > { %2134 = vperm.xlu1 %3956, %v1823_v53   ;;  %v4009_v53 = vld [vmem:[%s4308_s20 + $0x138] sm:$0xff] }
 0x369   : > { %v2030_v11 = vpop.permute.xlu1 %2029  ;;  %1371 = vxpose.xlu0.b32.cont [6/16] (narrow) %v4005_v24, 16  ;;  %1304 = vxpose.xlu2.b32.cont [3/16] (narrow) %v4006_v58, 16  ;;  %v7115_v58 = vld [vmem:[#allocation13_spill] sm:$0xff] }
 0x36a   : > { %v2384_v9 = vperm.slane %v2030_v11, %v5354_v17  ;;  %v5912_v11 = vpop.permute.xlu2 %2044 }
 0x36c   : > { %v2385_v54 = vsel %vm2277_vm8, %v2384_v9, %v5673_v28  ;;  %v1795_v9 = vunpack.c.h.b16 %v7115_v58 }
 0x36d   : > { %v2387_v30 = vsel %vm2281_vm9, %v7109_v49, %v2385_v54  ;;  %v5919_v54 = vpop.permute.xlu0 %2089  ;;  %v7116_v49 = vperm.slane %v5696_v0, %v5685_v46 }
 0x36e   : > { %v5889_v33 = vsel %vm2285_vm10, %v7110_v45, %v2387_v30  ;;  %v4012_v45 = vld [vmem:[%s4308_s20 + $0x28] sm:$0xff] }
 0x36f   : > { %2002 = vperm.xlu1 %3956, %v1779_v51  }
 0x371   : > { %v2165_v7 = vpop.permute.xlu1 %2164  ;;  %1372 = vxpose.xlu0.b32.cont [7/16] (narrow) %v4007_v31, 16  ;;  %1305 = vxpose.xlu2.b32.cont [4/16] (narrow) %v4008_v22, 16 }
 0x372   : > { %v2471_v28 = vperm.slane %v2165_v7, %v5144_v16  ;;  %v7117_v7 = vld [vmem:[#allocation60_spill] sm:$0xff] }
 0x373   : > { %v1026_v31 = vmul.f32 0.0625, %v7117_v7  ;;  %v4017_v7 = vld [vmem:[%s4308_s20 + $0x158] sm:$0xff] }
 0x374   : > { %v2472_v44 = vsel %vm2265_vm5, %v2471_v28, %v5712_v35  ;;  %v4010_v35 = vld [vmem:[%s4308_s20 + $0x20] sm:$0xff]  ;;  %v7118_v28 = vld [vmem:[#allocation61_spill] sm:$0xff] }
 0x375   : > { %v2474_v25 = vsel %vm2269_vm6, %v7111_v4, %v2472_v44  ;;  %v1025_v0 = vmul.f32 0.0625, %v7118_v28  ;;  %v7119_v44 = vperm.slane %v5646_v60, %v5410_v57  ;;  %v1269_v48 = vadd.f32 %v5138_v50, %v1026_v31  ;;  %v4018_v31 = vld [vmem:[%s4308_s20 + $0x40] sm:$0xff] }
 0x376   : > { %v5905_v40 = vsel %vm2273_vm7, %v7113_v36, %v2474_v25  ;;  %v1840_v25 = vunpack.c.l.b16 %v5699_v3  ;;  %v4014_v3 = vld [vmem:[%s4308_s20 + $0x30] sm:$0xff] }
 0x377   : > { %2137 = vperm.xlu1 %3956, %v1824_v18   ;;  %v7120_v18 = vperm.slane %v5725_v55, %v5480_v61 }
 0x379   : > { %v1943_v5 = vpop.permute.xlu1 %1942  ;;  %1373 = vxpose.xlu0.b32.cont [8/16] (narrow) %v4009_v53, 16  ;;  %1306 = vxpose.xlu2.b32.cont [5/16] (narrow) %v4010_v35, 16  ;;  %v5949_v53 = vpop.permute.xlu0 %2224  ;;  %v4013_v35 = vld [vmem:[%s4308_s20 + $0x148] sm:$0xff] }
 0x37a   : > { %v2328_v37 = vperm.slane %v1943_v5, %v5541_v41  ;;  %v5946_v5 = vpop.permute.xlu2 %2179 }
 0x37c   : > { %v2329_v52 = vsel %vm2289_vm11, %v2328_v37, %v5781_v8  ;;  %v4011_v8 = vld [vmem:[%s4308_s20 + $0x140] sm:$0xff] }
 0x37d   : > { %v2331_v24 = vsel %vm2293_vm12, %v7114_v23, %v2329_v52  ;;  %v7121_v52 = vperm.slane %v5676_v20, %v5216_v32 }
 0x37e   : > { %v5925_v30 = vsel %vm2297_vm13, %v7116_v49, %v2331_v24  ;;  %v7122_v24 = vperm.slane %v5740_v13, %v5276_v56  ;;  %v4015_v49 = vld [vmem:[%s4308_s20 + $0x150] sm:$0xff]  ;;  %v7123_v56 = vperm.slane %v5715_v38, %v5602_v62 }
 0x37f   : > { %2050 = vperm.xlu1 %3956, %v1795_v9  }
 0x381   : > { %v2078_v51 = vpop.permute.xlu1 %2077  ;;  %1374 = vxpose.xlu0.b32.cont [9/16] (narrow) %v4011_v8, 16  ;;  %1307 = vxpose.xlu2.b32.cont [6/16] (narrow) %v4012_v45, 16 }
 0x382   : > { %v2415_v1 = vperm.slane %v2078_v51, %v5354_v17  ;;  %v2048_v9 = vpop.permute.xlu2 %2047  ;;  %v5968_v51 = vpop.permute.xlu0 %2092 }
 0x383   : > { %v2425_v39 = vperm.slane %v5968_v51, %v5685_v46 }
 0x384   : > { %v2416_v22 = vsel %vm2277_vm8, %v2415_v1, %v5806_v29  ;;  %v1268_v29 = vadd.f32 %v5064_v47, %v1025_v0  ;;  %v7125_v0 = vld [vmem:[#allocation45_spill] sm:$0xff] }
 0x385   : > { %v2418_v4 = vsel %vm2281_vm9, %v7119_v44, %v2416_v22  ;;  %v1843_v44 = vunpack.c.h.b16 %v7125_v0 }
 0x386   : > { %v5944_v36 = vsel %vm2285_vm10, %v7120_v18, %v2418_v4  ;;  %v1631_v50 = vpack.c.bf16 %v1269_v48, %v1268_v29  ;;  %v7126_v4 = vperm.slane %v5772_v21, %v5480_v61  ;;  %v4019_v48 = vld [vmem:[%s4308_s20 + $0x160] sm:$0xff]  ;;  %v7127_v21 = vperm.slane %v5748_v27, %v5746_v10 }
 0x387   : > { %2185 = vperm.xlu1 %3956, %v1840_v25   ;;  %v2394_v27 = vperm.slane %v5912_v11, %v5685_v46  ;;  %v4023_v11 = vld [vmem:[%s4308_s20 + $0x170] sm:$0xff] }
 0x388   : > { %v1826_v23 = vunpack.c.l.b16 %v1631_v50  ;;  %v1827_v8 = vunpack.c.h.b16 %v1631_v50  ;;  %v7128_v50 = vperm.slane %v5797_v19, %v5790_v14  ;;  %v7129_v19 = vperm.slane %v5762_v34, %v5602_v62 }
 0x389   : > { %v2213_v60 = vpop.permute.xlu1 %2212  ;;  %1375 = vxpose.xlu0.b32.cont [10/16] (narrow) %v4013_v35, 16  ;;  %1308 = vxpose.xlu2.b32.cont [7/16] (narrow) %v4014_v3, 16  ;;  %v2481_v34 = vperm.slane %v5946_v5, %v5480_v61  ;;  %v4025_v5 = vld [vmem:[%s4308_s20 + $0x178] sm:$0xff] }
 0x38a   : > { %v2502_v55 = vperm.slane %v2213_v60, %v5144_v16  ;;  %v2183_v38 = vpop.permute.xlu2 %2182  ;;  %v5986_v22 = vpop.permute.xlu0 %2227 }
 0x38c   : > { %v2503_v37 = vsel %vm2265_vm5, %v2502_v55, %v5824_v26  ;;  %v4016_v26 = vld [vmem:[%s4308_s20 + $0x38] sm:$0xff]  ;;  %vm2534_vm5 = vcmask 1046534  }
 0x38d   : > { %v2505_v47 = vsel %vm2269_vm6, %v7121_v52, %v2503_v37  ;;  %v4021_v37 = vld [vmem:[%s4308_s20 + $0x168] sm:$0xff]  ;;  %vm2536_vm6 = vcmask 1047559  }
 0x38e   : > { %v5964_v58 = vsel %vm2273_vm7, %v7122_v24, %v2505_v47  ;;  %v4022_v47 = vld [vmem:[%s4308_s20 + $0x50] sm:$0xff]  ;;  %v2396_v24 = vperm.slane %v2048_v9, %v5746_v10  ;;  %vm3032_vm7 = vcmask 31744  }
 0x38f   : > { %2143 = vperm.xlu1 %3956, %v1826_v23  }
 0x391   : > { %v1991_v16 = vpop.permute.xlu1 %1990  ;;  %1376 = vxpose.xlu0.b32.cont [11/16] (narrow) %v4015_v49, 16  ;;  %1309 = vxpose.xlu2.b32.cont [8/16] (narrow) %v4016_v26, 16 }
 0x392   : > { %v2359_v32 = vperm.slane %v1991_v16, %v5541_v41  ;;  %v2096_v60 = vpop.permute.xlu2 %2095  ;;  %v6010_v3 = vpop.permute.xlu0 %2140 }
 0x394   : > { %v2360_v20 = vsel %vm2289_vm11, %v2359_v32, %v5842_v63 }
 0x395   : > { %v2362_v13 = vsel %vm2293_vm12, %v7123_v56, %v2360_v20  ;;  %v4024_v56 = vld [vmem:[%s4308_s20 + $0x58] sm:$0xff] }
 0x396   : > { %v5981_v45 = vsel %vm2297_vm13, %v2363_v2, %v2362_v13 }
 0x397   : > { %2146 = vperm.xlu1 %3956, %v1827_v8   ;;  %v2483_v8 = vperm.slane %v2183_v38, %v5541_v41 }
 0x399   : > { %v2126_v1 = vpop.permute.xlu1 %2125  ;;  %1377 = vxpose.xlu0.b32.cont [12/16] (narrow) %v4017_v7, 16  ;;  %1310 = vxpose.xlu2.b32.cont [9/16] (narrow) %v4018_v31, 16 }
 0x39a   : > { %v2446_v63 = vperm.slane %v2126_v1, %v5354_v17  ;;  %v6029_v26 = vpop.permute.xlu2 %2230  ;;  %v2099_v20 = vpop.permute.xlu0 %2098  ;;  %v7130_v1 = vperm.slane %v5784_v15, %v5410_v57 }
 0x39c   : > { %v2447_v28 = vsel %vm2277_vm8, %v2446_v63, %v5858_v42  ;;  %v4020_v42 = vld [vmem:[%s4308_s20 + $0x48] sm:$0xff] }
 0x39d   : > { %v2449_v2 = vsel %vm2281_vm9, %v7124_v43, %v2447_v28 }
 0x39e   : > { %v5999_v25 = vsel %vm2285_vm10, %v7126_v4, %v2449_v2  ;;  %v4027_v4 = vld [vmem:[%s4308_s20 + $0x200] sm:$0xff] }
 0x39f   : > { %2194 = vperm.xlu1 %3956, %v1843_v44  }
 0x3a1   : > { %1378 = vxpose.xlu0.b32.cont [13/16] (narrow) %v4019_v48, 16  ;;  %v1901_v18 = vpop.permute.xlu1 %1900  ;;  %1311 = vxpose.xlu2.b32.cont [10/16] (narrow) %v4020_v42, 16 }
 0x3a2   : > { %v2296_v59 = vperm.slane %v1901_v18, %v5685_v46  ;;  %v6050_v28 = vpop.permute.xlu2 %2188  ;;  %v2234_v38 = vpop.permute.xlu0 %2233  ;;  %v4028_v18 = vld [vmem:[%s4308_s20 + $0x68] sm:$0xff] }
 0x3a4   : > { %v2298_v29 = vsel %vm2297_vm13, %v2296_v59, %v5874_v6 }
 0x3a5   : > { %v2302_v35 = vsel %vm2301_vm14, %v7127_v21, %v2298_v29  ;;  %v2427_v21 = vperm.slane %v2096_v60, %v5746_v10  ;;  %v2510_v60 = vperm.slane %v5949_v53, %v5410_v57  ;;  %v2514_v57 = vperm.slane %v6029_v26, %v5541_v41 }
 0x3a6   : > { %v2306_v55 = vsel %vm2305_vm15, %v7128_v50, %v2302_v35  ;;  %v2429_v50 = vperm.slane %v2099_v20, %v5790_v14 }
 0x3a9   : > { %1379 = vxpose.xlu0.b32.cont [14/16] (narrow) %v4021_v37, 16  ;;  %v2039_v52 = vpop.permute.xlu1 %2038  ;;  %1312 = vxpose.xlu2.b32.cont [11/16] (narrow) %v4022_v47, 16  ;;  %v4030_v47 = vld [vmem:[%s4308_s20 + $0x70] sm:$0xff] }
 0x3aa   : > { %v2390_v6 = vperm.slane %v2039_v52, %v5541_v41  ;;  %v6069_v59 = vpop.permute.xlu2 %2191  ;;  %v4029_v52 = vld [vmem:[%s4308_s20 + $0x208] sm:$0xff] }
 0x3ac   : > { %v2391_v23 = vsel %vm2289_vm11, %v2390_v6, %v5889_v33  ;;  %v2512_v6 = vperm.slane %v5986_v22, %v5480_v61  ;;  %v3881_v22 = vld [vmem:[%s6860_s6 + $0x64] sm:$0xf0] }
 0x3ad   : > { %v2393_v16 = vsel %vm2293_vm12, %v7129_v19, %v2391_v23  ;;  %v3776_v23 = vld [vmem:[%s6860_s6 + $0x70] sm:$0xf]  ;;  %v2516_v19 = vperm.slane %v2234_v38, %v5602_v62 }
 0x3ae   : > { %v2395_v49 = vsel %vm2297_vm13, %v2394_v27, %v2393_v16  ;;  %v3760_v38 = vld [vmem:[%s6860_s6 + $0x50] sm:$0xf] }
 0x3af   : > { %v6032_v32 = vsel %vm2301_vm14, %v2396_v24, %v2395_v49  ;;  %v3883_v24 = vld [vmem:[%s6860_s6 + $0x74] sm:$0xf0] }
 0x3b1   : > { %1380 = vxpose.xlu0.b32.cont [15/16] (narrow) %v4023_v11, 16  ;;  %v2174_v33 = vpop.permute.xlu1 %2173  ;;  %1313 = vxpose.xlu2.b32.cont [12/16] (narrow) %v4024_v56, 16 }
 0x3b2   : > { %v2477_v9 = vperm.slane %v2174_v33, %v5354_v17  ;;  %v2240_v61 = vpop.permute.xlu2 %2239 }
 0x3b3   : > { %v2520_v33 = vperm.slane %v2240_v61, %v5746_v10  ;;  %v4039_v61 = vld [vmem:[%s4308_s20 + $0x90] sm:$0xff] }
 0x3b4   : > { %v2478_v13 = vsel %vm2277_vm8, %v2477_v9, %v5905_v40  ;;  %v4026_v40 = vld [vmem:[%s4308_s20 + $0x60] sm:$0xff] }
 0x3b5   : > { %v2480_v7 = vsel %vm2281_vm9, %v7130_v1, %v2478_v13 }
 0x3b6   : > { %v2482_v31 = vsel %vm2285_vm10, %v2481_v34, %v2480_v7  ;;  %v4031_v34 = vld [vmem:[%s4308_s20 + $0x210] sm:$0xff] }
 0x3b7   : > { %v6048_v63 = vsel %vm2289_vm11, %v2483_v8, %v2482_v31  ;;  %v4032_v8 = vld [vmem:[%s4308_s20 + $0x78] sm:$0xff] }
 0x3b9   : > { %1381 = vxpose.xlu0.b32.end [16/16] (narrow) %v4025_v5, 16  ;;  %v1952_v43 = vpop.permute.xlu1 %1951  ;;  %1314 = vxpose.xlu2.b32.cont [13/16] (narrow) %v4026_v40, 16  ;;  %v4033_v40 = vld [vmem:[%s4308_s20 + $0x80] sm:$0xff] }
 0x3ba   : > { %v2334_v2 = vperm.slane %v1952_v43, %v5746_v10 }
 0x3bc   : > { %v2335_v15 = vsel %vm2301_vm14, %v2334_v2, %v5925_v30  ;;  %v2423_v30 = vperm.slane %v5919_v54, %v5602_v62  ;;  %v3879_v2 = vld [vmem:[%s6860_s6 + $0x54] sm:$0xf0] }
 0x3bd   : > { %v2337_v0 = vsel %vm2305_vm15, %v2336_v12, %v2335_v15  ;;  %v2237_v12 = vpop.permute.xlu0 %2236  ;;  %v3752_v15 = vld [vmem:[%s6860_s6 + $0x40] sm:$0xf] }
 0x3be   : > { %v6062_v44 = vsel %vm2524_vm0, %v2337_v0, %v2306_v55  ;;  %v2518_v20 = vperm.slane %v2237_v12, %v5685_v46  ;;  %v6140_v0 = vor.u32 %v3879_v2, %v3760_v38  ;;  %v4036_v12 = vld [vmem:[%s4308_s20 + $0x88] sm:$0xff]  ;;  %v2456_v38 = vperm.slane %v6010_v3, %v5685_v46  ;;  %v3874_v3 = vld [vmem:[%s6860_s6 + $0x34] sm:$0xf] }
 0x3c1   : > { %1430 = vxpose.xlu0.b32.start [1/16] (narrow) %v4027_v4, 16  ;;  %v2087_v48 = vpop.permute.xlu1 %2086  ;;  %1315 = vxpose.xlu2.b32.cont [14/16] (narrow) %v4028_v18, 16 }
 0x3c2   : > { %v2421_v42 = vperm.slane %v2087_v48, %v5541_v41  ;;  %v4034_v48 = vld [vmem:[%s4308_s20 + $0x218] sm:$0xff] }
 0x3c4   : > { %v2422_v29 = vsel %vm2289_vm11, %v2421_v42, %v5944_v36  ;;  %v4035_v42 = vld [vmem:[%s4308_s20 + $0x180] sm:$0xff] }
 0x3c5   : > { %v2424_v35 = vsel %vm2293_vm12, %v2423_v30, %v2422_v29  ;;  %v2243_v16 = vpop.permute.xlu0 %2242  ;;  %v3867_v29 = vld [vmem:[%s6858_s4 + $0x38] sm:$0xff] }
 0x3c6   : > { %v2426_v55 = vsel %vm2297_vm13, %v2425_v39, %v2424_v35  ;;  %v2522_v9 = vperm.slane %v2243_v16, %v5790_v14  ;;  %2588 = vmatpush.bf16.msra.mxu0 %v3867_v29 }
 0x3c7   : > { %v2428_v37 = vsel %vm2301_vm14, %v2427_v21, %v2426_v55  ;;  %v3882_v21 = vld [vmem:[%s6860_s6 + $0x74] sm:$0xf] }
 0x3c8   : > { %v6081_v54 = vsel %vm2305_vm15, %v2429_v50, %v2428_v37  ;;  %v3875_v50 = vld [vmem:[%s6860_s6 + $0x34] sm:$0xf0]  ;;  %v3866_v55 = vld [vmem:[%s6858_s4 + $0x30] sm:$0xff] }
 0x3c9   : > { %1431 = vxpose.xlu0.b32.cont [2/16] (narrow) %v4029_v52, 16  ;;  %v2222_v51 = vpop.permute.xlu1 %2221  ;;  %1316 = vxpose.xlu2.b32.cont [15/16] (narrow) %v4030_v47, 16  ;;  %v3880_v52 = vld [vmem:[%s6860_s6 + $0x64] sm:$0xf]  ;;  %v3736_v47 = vld [vmem:[%s6860_s6 + $0x20] sm:$0xf] }
 0x3ca   : > { %v2508_v36 = vperm.slane %v2222_v51, %v5354_v17  ;;  %v3768_v17 = vld [vmem:[%s6860_s6 + $0x60] sm:$0xf]  ;;  %v3770_v51 = vld [vmem:[%s6860_s6 + $0x68] sm:$0xf0]  ;;  %2589 = vmatpush.bf16.msra.mxu0 %v3866_v55 }
 0x3cb   : > { %v6114_v26 = vor.u32 %v3881_v22, %v3768_v17  ;;  %v3878_v22 = vld [vmem:[%s6860_s6 + $0x54] sm:$0xf]  ;;  %v4045_v55 = vld [vmem:[%s4308_s20 + $0xa0] sm:$0xff] }
 0x3cc   : > { %v2509_v27 = vsel %vm2277_vm8, %v2508_v36, %v5964_v58  ;;  %v6104_v58 = vor.u32 %v3883_v24, %v3776_v23  ;;  %v6187_v36 = vor.u32 %v3880_v52, %v3770_v51  ;;  %v4038_v23 = vld [vmem:[%s4308_s20 + $0x188] sm:$0xff]  ;;  %v3870_v51 = vld [vmem:[%s6860_s6 + $0x14] sm:$0xf]  ;;  %vm3292_vm8 = vcmask 1041408  }
 0x3cd   : > { %v2511_v53 = vsel %vm2281_vm9, %v2510_v60, %v2509_v27  ;;  %v3873_v60 = vld [vmem:[%s6860_s6 + $0x24] sm:$0xf0] }
 0x3ce   : > { %v2513_v49 = vsel %vm2285_vm10, %v2512_v6, %v2511_v53  ;;  %2703 = vmatpush.bf16.msra.mxu3 %v6104_v58  ;;  %v4037_v6 = vld [vmem:[%s4308_s20 + $0x220] sm:$0xff]  ;;  %v6196_v17 = vor.u32 %v3873_v60, %v3736_v47  ;;  %v3865_v53 = vld [vmem:[%s6858_s4 + $0x28] sm:$0xff] }
 0x3cf   : > { %v2515_v11 = vsel %vm2289_vm11, %v2514_v57, %v2513_v49  ;;  %2590 = vmatpush.bf16.msra.mxu0 %v3865_v53  ;;  %v3861_v52 = vld [vmem:[%s6858_s4 + $0x8] sm:$0xff]  ;;  %v3868_v60 = vld [vmem:[%s6860_s6 + $0x4] sm:$0xf] }
 0x3d0   : > { %v2517_v56 = vsel %vm2293_vm12, %v2516_v19, %v2515_v11  ;;  %v3762_v19 = vld [vmem:[%s6860_s6 + $0x58] sm:$0xf0]  ;;  %v3871_v11 = vld [vmem:[%s6860_s6 + $0x14] sm:$0xf0]  ;;  %v4047_v53 = vld [vmem:[%s4308_s20 + $0x1a0] sm:$0xff] }
 0x3d1   : > { %1432 = vxpose.xlu0.b32.cont [3/16] (narrow) %v4031_v34, 16  ;;  %v2000_v13 = vpop.permute.xlu1 %1999  ;;  %1317 = vxpose.xlu2.b32.end [16/16] (narrow) %v4032_v8, 16  ;;  %v2519_v1 = vsel %vm2297_vm13, %v2518_v20, %v2517_v56  ;;  %v6212_v49 = vor.u32 %v3878_v22, %v3762_v19  ;;  %v3728_v20 = vld [vmem:[%s6860_s6 + $0x10] sm:$0xf]  ;;  %v3876_v56 = vld [vmem:[%s6860_s6 + $0x44] sm:$0xf]  ;;  %v2489_v22 = vperm.slane %v6069_v59, %v5746_v10 }
 0x3d2   : > { %v2365_v7 = vperm.slane %v2000_v13, %v5746_v10  ;;  %v2521_v31 = vsel %vm2301_vm14, %v2520_v33, %v2519_v1  ;;  %2704 = vmatpush.bf16.msra.mxu3 %v6114_v26  ;;  %v6221_v33 = vor.u32 %v3871_v11, %v3728_v20  ;;  %v3720_v34 = vld [vmem:[%s6860_s6] sm:$0xf]  ;;  %v3869_v13 = vld [vmem:[%s6860_s6 + $0x4] sm:$0xf0]  ;;  %v4051_v20 = vld [vmem:[%s4308_s20 + $0xb0] sm:$0xff] }
 0x3d3   : > { %v6126_v5 = vsel %vm2305_vm15, %v2522_v9, %v2521_v31  ;;  %v3864_v9 = vld [vmem:[%s6858_s4 + $0x20] sm:$0xff]  ;;  %v4040_v1 = vld [vmem:[%s4308_s20 + $0x228] sm:$0xff]  ;;  %v4041_v31 = vld [vmem:[%s4308_s20 + $0x190] sm:$0xff] }
 0x3d4   : > { %v2366_v43 = vsel %vm2301_vm14, %v2365_v7, %v5981_v45  ;;  %1334 = vxpose.xlu1.b32.start [1/16] (narrow) %v4033_v40, 16  ;;  %v3877_v45 = vld [vmem:[%s6860_s6 + $0x44] sm:$0xf0]  ;;  %v6245_v40 = vor.u32 %v3869_v13, %v3720_v34  ;;  %2591 = vmatpush.bf16.msra.mxu0 %v3864_v9  ;;  %v4056_v9 = vld [vmem:[%s4308_s20 + $0x1b8] sm:$0xff] }
 0x3d5   : > { %v6146_v4 = vor.u32 %v3877_v45, %v3752_v15  ;;  %v4042_v15 = vld [vmem:[%s4308_s20 + $0x98] sm:$0xff] }
 0x3d6   : > { %2705 = vmatpush.bf16.msra.mxu3 %v6140_v0 }
 0x3d9   : > { %1433 = vxpose.xlu0.b32.cont [4/16] (narrow) %v4034_v48, 16  ;;  %v2135_v18 = vpop.permute.xlu1 %2134  ;;  %1398 = vxpose.xlu2.b32.start [1/16] (narrow) %v4035_v42, 16  ;;  %v3863_v48 = vld [vmem:[%s6858_s4 + $0x18] sm:$0xff] }
 0x3da   : > { %v2452_v30 = vperm.slane %v2135_v18, %v5541_v41  ;;  %2706 = vmatpush.bf16.msra.mxu3 %v6146_v4  ;;  %v3778_v41 = vld [vmem:[%s6860_s6 + $0x78] sm:$0xf0]  ;;  %2592 = vmatpush.bf16.msra.mxu0 %v3863_v48 }
 0x3db   : > { %v6164_v35 = vor.u32 %v3882_v21, %v3778_v41  ;;  %v3746_v18 = vld [vmem:[%s6860_s6 + $0x38] sm:$0xf0]  ;;  %v4043_v21 = vld [vmem:[%s4308_s20 + $0x230] sm:$0xff] }
 0x3dc   : > { %v2453_v39 = vsel %vm2289_vm11, %v2452_v30, %v5999_v25  ;;  %1335 = vxpose.xlu1.b32.cont [2/16] (narrow) %v4036_v12, 16  ;;  %v3744_v25 = vld [vmem:[%s6860_s6 + $0x30] sm:$0xf]  ;;  %v6265_v42 = vor.u32 %v3874_v3, %v3746_v18  ;;  %v3872_v30 = vld [vmem:[%s6860_s6 + $0x24] sm:$0xf]  ;;  %v4062_v18 = vld [vmem:[%s4308_s20 + $0x1c8] sm:$0xff] }
 0x3dd   : > { %v6175_v37 = vor.u32 %v3875_v50, %v3744_v25  ;;  %2716 = vmatpush.bf16.msra.mxu2 %v6164_v35  ;;  %v3862_v12 = vld [vmem:[%s6858_s4 + $0x10] sm:$0xff]  ;;  %v4044_v25 = vld [vmem:[%s4308_s20 + $0x198] sm:$0xff] }
 0x3de   : > { %2593 = vmatpush.bf16.msra.mxu0 %v3862_v12  ;;  %v4065_v12 = vld [vmem:[%s4308_s20 + $0x1d0] sm:$0xff] }
 0x3df   : > { %2707 = vmatpush.bf16.msra.mxu3 %v6175_v37 }
 0x3e1   : > { %1434 = vxpose.xlu0.b32.cont [5/16] (narrow) %v4037_v6, 16  ;;  %v2003_v27 = vpop.permute.xlu1 %2002  ;;  %1399 = vxpose.xlu2.b32.cont [2/16] (narrow) %v4038_v23, 16  ;;  %v3722_v6 = vld [vmem:[%s6860_s6 + $0x8] sm:$0xf0]  ;;  %v3860_v23 = vld [vmem:[%s6858_s4] sm:$0xff] }
 0x3e2   : > { %v2367_v24 = vperm.slane %v2003_v27, %v5790_v14  ;;  %2717 = vmatpush.bf16.msra.mxu2 %v6187_v36  ;;  %2594 = vmatpush.bf16.msra.mxu0 %v3861_v52  ;;  %v4073_v52 = vld [vmem:[%s4308_s20 + $0x380] sm:$0xff] }
 0x3e3   : > { %2708 = vmatpush.bf16.msra.mxu3 %v6196_v17 }
 0x3e4   : > { %v2368_v57 = vsel %vm2305_vm15, %v2367_v24, %v2366_v43  ;;  %1336 = vxpose.xlu1.b32.cont [3/16] (narrow) %v4039_v61, 16  ;;  %v6313_v24 = vor.u32 %v3868_v60, %v3722_v6  ;;  %v4078_v60 = vld [vmem:[%s4308_s20 + $0xf8] sm:$0xff]  ;;  %v4079_v6 = vld [vmem:[%s4308_s20 + $0x390] sm:$0xff] }
 0x3e5   : > { %v2527_v16 = vsel %vm2526_vm1, %v2368_v57, %v6062_v44  ;;  %v3754_v44 = vld [vmem:[%s6860_s6 + $0x48] sm:$0xf0]  ;;  %v4046_v57 = vld [vmem:[%s4308_s20 + $0x238] sm:$0xff] }
 0x3e6   : > { %2718 = vmatpush.bf16.msra.mxu2 %v6212_v49  ;;  %v6239_v8 = vor.u32 %v3876_v56, %v3754_v44  ;;  %2595 = vmatpush.bf16.msra.mxu0 %v3860_v23  ;;  %v4055_v56 = vld [vmem:[%s4308_s20 + $0x250] sm:$0xff]  ;;  %v4081_v23 = vld [vmem:[%s4308_s20 + $0x280] sm:$0xff] }
 0x3e7   : > { %2709 = vmatpush.bf16.msra.mxu3 %v6221_v33 }
 0x3e9   : > { %1435 = vxpose.xlu0.b32.cont [6/16] (narrow) %v4040_v1, 16  ;;  %v2138_v7 = vpop.permute.xlu1 %2137  ;;  %1400 = vxpose.xlu2.b32.cont [3/16] (narrow) %v4041_v31, 16 }
 0x3ea   : > { %v2454_v43 = vperm.slane %v2138_v7, %v5602_v62  ;;  %2719 = vmatpush.bf16.msra.mxu2 %v6239_v8  ;;  %2778 = vmatpush.bf16.msrb.mxu0 %v6164_v35 }
 0x3eb   : > { %2710 = vmatpush.bf16.msra.mxu3 %v6245_v40 }
 0x3ec   : > { %v2455_v2 = vsel %vm2293_vm12, %v2454_v43, %v2453_v39  ;;  %1337 = vxpose.xlu1.b32.cont [4/16] (narrow) %v4042_v15, 16  ;;  %v3738_v39 = vld [vmem:[%s6860_s6 + $0x28] sm:$0xf0]  ;;  %v4058_v43 = vld [vmem:[%s4308_s20 + $0x258] sm:$0xff] }
 0x3ed   : > { %v6253_v45 = vsel %vm2297_vm13, %v2456_v38, %v2455_v2  ;;  %v6278_v29 = vor.u32 %v3872_v30, %v3738_v39  ;;  %v4060_v38 = vld [vmem:[%s4308_s20 + $0xc8] sm:$0xff] }
 0x3ee   : > { %2720 = vmatpush.bf16.msra.mxu2 %v6265_v42  ;;  %2779 = vmatpush.bf16.msrb.mxu0 %v6187_v36  ;;  %v6372_v2 = vld [vmem:[%s7131_s2 + $0x8] sm:$0xff] }
 0x3ef   : > { %2729 = vmatpush.bf16.msrb.mxu3 %v6104_v58  ;;  %v4064_v39 = vld [vmem:[%s4308_s20 + $0x268] sm:$0xff] }
 0x3f1   : > { %1436 = vxpose.xlu0.b32.cont [7/16] (narrow) %v4043_v21, 16  ;;  %v2051_v41 = vpop.permute.xlu1 %2050  ;;  %1401 = vxpose.xlu2.b32.cont [4/16] (narrow) %v4044_v25, 16  ;;  %v4067_v21 = vld [vmem:[%s4308_s20 + $0x270] sm:$0xff]  ;;  %v4069_v25 = vld [vmem:[%s4308_s20 + $0xe0] sm:$0xff] }
 0x3f2   : > { %v2398_v50 = vperm.slane %v2051_v41, %v5790_v14  ;;  %2721 = vmatpush.bf16.msra.mxu2 %v6278_v29  ;;  %2780 = vmatpush.bf16.msrb.mxu0 %v6212_v49  ;;  %v4054_v49 = vld [vmem:[%s4308_s20 + $0xb8] sm:$0xff]  ;;  %v1318_v7 = vpop.trf.xlu2 }
 0x3f3   : > { %2730 = vmatpush.bf16.msrb.mxu3 %v6114_v26  ;;  %v3730_v26 = vld [vmem:[%s6860_s6 + $0x18] sm:$0xf0] }
 0x3f4   : > { %v2399_v58 = vsel %vm2305_vm15, %v2398_v50, %v6032_v32  ;;  %1338 = vxpose.xlu1.b32.cont [5/16] (narrow) %v4045_v55, 16  ;;  %v6298_v47 = vor.u32 %v3870_v51, %v3730_v26  ;;  %v4068_v41 = vld [vmem:[%s4308_s20 + $0x1d8] sm:$0xff]  ;;  %v4072_v55 = vld [vmem:[%s4308_s20 + $0xe8] sm:$0xff]  ;;  %v4075_v26 = vld [vmem:[%s4308_s20 + $0xf0] sm:$0xff] }
 0x3f5   : > { %v2529_v32 = vsel %vm2528_vm2, %v2399_v58, %v2527_v16  ;;  %v4048_v16 = vld [vmem:[%s4308_s20 + $0xa8] sm:$0xff]  ;;  %v4070_v50 = vld [vmem:[%s4308_s20 + $0x278] sm:$0xff]  ;;  %v4071_v58 = vld [vmem:[%s4308_s20 + $0x1e0] sm:$0xff] }
 0x3f6   : > { %v2531_v27 = vsel %vm2530_vm3, %v6081_v54, %v2529_v32  ;;  %2722 = vmatpush.bf16.msra.mxu2 %v6298_v47  ;;  %2781 = vmatpush.bf16.msrb.mxu0 %v6239_v8  ;;  %v4057_v8 = vld [vmem:[%s4308_s20 + $0xc0] sm:$0xff]  ;;  %v4074_v51 = vld [vmem:[%s4308_s20 + $0x1e8] sm:$0xff] }
 0x3f7   : > { %2731 = vmatpush.bf16.msrb.mxu3 %v6140_v0  ;;  %v2487_v0 = vperm.slane %v6050_v28, %v5685_v46  ;;  %v4049_v28 = vld [vmem:[%s4308_s20 + $0x240] sm:$0xff]  ;;  %v4076_v32 = vld [vmem:[%s4308_s20 + $0x388] sm:$0xff] }
 0x3f9   : > { %1437 = vxpose.xlu0.b32.cont [8/16] (narrow) %v4046_v57, 16  ;;  %v2186_v61 = vpop.permute.xlu1 %2185  ;;  %1402 = vxpose.xlu2.b32.cont [5/16] (narrow) %v4047_v53, 16  ;;  %v4083_v57 = vld [vmem:[%s4308_s20 + $0x300] sm:$0xff] }
 0x3fa   : > { %v2485_v54 = vperm.slane %v2186_v61, %v5602_v62  ;;  %2723 = vmatpush.bf16.msra.mxu2 %v6313_v24  ;;  %2782 = vmatpush.bf16.msrb.mxu0 %v6265_v42  ;;  %v1319_v15 = vpop.trf.xlu2  ;;  %v4063_v42 = vld [vmem:[%s4308_s20 + $0xd0] sm:$0xff]  ;;  %v4084_v61 = vld [vmem:[%s4308_s20 + $0x288] sm:$0xff]  ;;  %v4085_v53 = vld [vmem:[%s4308_s20 + $0x3a0] sm:$0xff] }
 0x3fb   : > { %2732 = vmatpush.bf16.msrb.mxu3 %v6146_v4  ;;  %v4050_v4 = vld [vmem:[%s4308_s20 + $0x1a8] sm:$0xff]  ;;  %v1561_v3 = vadd.f32 %v6372_v2, %v1319_v15 }
 0x3fc   : > { %v2486_v19 = vsel %vm2293_vm12, %v2485_v54, %v6048_v63  ;;  %1339 = vxpose.xlu1.b32.cont [6/16] (narrow) %v4048_v16, 16  ;;  %v4086_v54 = vld [vmem:[%s4308_s20 + $0x308] sm:$0xff] }
 0x3fd   : > { %v2488_v62 = vsel %vm2297_vm13, %v2487_v0, %v2486_v19  ;;  %v3891_v0 = vld [vmem:[%s6864_s10 + $0x38] sm:$0xff]  ;;  %v3890_v19 = vld [vmem:[%s6864_s10 + $0x30] sm:$0xff]  ;;  %v4088_v16 = vld [vmem:[%s4308_s20 + $0x3a8] sm:$0xff] }
 0x3fe   : > { %v2490_v46 = vsel %vm2301_vm14, %v2489_v22, %v2488_v62  ;;  %2783 = vmatpush.bf16.msrb.mxu0 %v6278_v29  ;;  %v4066_v29 = vld [vmem:[%s4308_s20 + $0xd8] sm:$0xff]  ;;  %v4087_v22 = vld [vmem:[%s4308_s20 + $0x290] sm:$0xff]  ;;  %2894 = vmatpush.bf16.msra.mxu1 %v3891_v0 }
 0x3ff   : > { %2733 = vmatpush.bf16.msrb.mxu3 %v6175_v37  ;;  %v4052_v37 = vld [vmem:[%s4308_s20 + $0x248] sm:$0xff]  ;;  %2955 = vmatpush.bf16.msrb.mxu2 %v3891_v0  ;;  %v4089_v62 = vld [vmem:[%s4308_s20 + $0x310] sm:$0xff] }
 0x401   : > { %1438 = vxpose.xlu0.b32.cont [9/16] (narrow) %v4049_v28, 16  ;;  %v2144_v59 = vpop.permute.xlu1 %2143  ;;  %1403 = vxpose.xlu2.b32.cont [6/16] (narrow) %v4050_v4, 16  ;;  %v4090_v28 = vld [vmem:[%s4308_s20 + $0x298] sm:$0xff]  ;;  %v4091_v4 = vld [vmem:[%s4308_s20 + $0x3b0] sm:$0xff] }
 0x402   : > { %v2458_v63 = vperm.slane %v2144_v59, %v5746_v10  ;;  %v4053_v10 = vld [vmem:[%s4308_s20 + $0x1b0] sm:$0xff]  ;;  %2784 = vmatpush.bf16.msrb.mxu0 %v6298_v47  ;;  %2895 = vmatpush.bf16.msra.mxu1 %v3890_v19  ;;  %v3888_v59 = vld [vmem:[%s6864_s10 + $0x20] sm:$0xff] }
 0x403   : > { %2734 = vmatpush.bf16.msrb.mxu3 %v6196_v17  ;;  %v4077_v47 = vld [vmem:[%s4308_s20 + $0x1f0] sm:$0xff]  ;;  %2956 = vmatpush.bf16.msrb.mxu2 %v3890_v19  ;;  %v4112_v19 = vld [vmem:[%s4308_s20 + $0x3e8] sm:$0xff] }
 0x404   : > { %v2459_v35 = vsel %vm2301_vm14, %v2458_v63, %v6253_v45  ;;  %1340 = vxpose.xlu1.b32.cont [7/16] (narrow) %v4051_v20, 16  ;;  %v4061_v45 = vld [vmem:[%s4308_s20 + $0x260] sm:$0xff]  ;;  %v4092_v63 = vld [vmem:[%s4308_s20 + $0x318] sm:$0xff] }
 0x405   : > { %v4093_v20 = vld [vmem:[%s4308_s20 + $0x2a0] sm:$0xff] }
 0x406   : > { %2785 = vmatpush.bf16.msrb.mxu0 %v6313_v24  ;;  %v4082_v24 = vld [vmem:[%s4308_s20 + $0x398] sm:$0xff] }
 0x407   : > { %2735 = vmatpush.bf16.msrb.mxu3 %v6221_v33 }
 0x409   : > { %1439 = vxpose.xlu0.b32.cont [10/16] (narrow) %v4052_v37, 16  ;;  %v2147_v11 = vpop.permute.xlu1 %2146  ;;  %1404 = vxpose.xlu2.b32.cont [7/16] (narrow) %v4053_v10, 16  ;;  %v3886_v37 = vld [vmem:[%s6864_s10 + $0x10] sm:$0xff]  ;;  %v4094_v10 = vld [vmem:[%s4308_s20 + $0x3b8] sm:$0xff] }
 0x40a   : > { %v2460_v36 = vperm.slane %v2147_v11, %v5790_v14 }
 0x40b   : > { %2736 = vmatpush.bf16.msrb.mxu3 %v6245_v40  ;;  %v4059_v40 = vld [vmem:[%s4308_s20 + $0x1c0] sm:$0xff] }
 0x40c   : > { %v2461_v17 = vsel %vm2305_vm15, %v2460_v36, %v2459_v35  ;;  %1341 = vxpose.xlu1.b32.cont [8/16] (narrow) %v4054_v49, 16  ;;  %v3887_v35 = vld [vmem:[%s6864_s10 + $0x18] sm:$0xff]  ;;  %v4095_v36 = vld [vmem:[%s4308_s20 + $0x320] sm:$0xff]  ;;  %v4096_v49 = vld [vmem:[%s4308_s20 + $0x2a8] sm:$0xff] }
 0x40d   : > { %v2533_v33 = vsel %vm2532_vm4, %v2461_v17, %v2531_v27  ;;  %v4080_v27 = vld [vmem:[%s4308_s20 + $0x1f8] sm:$0xff]  ;;  %v3885_v17 = vld [vmem:[%s6864_s10 + $0x8] sm:$0xff] }
 0x411   : > { %1440 = vxpose.xlu0.b32.cont [11/16] (narrow) %v4055_v56, 16  ;;  %v2195_v44 = vpop.permute.xlu1 %2194  ;;  %1405 = vxpose.xlu2.b32.cont [8/16] (narrow) %v4056_v9, 16  ;;  %v1382_v9 = vpop.trf.xlu0 }
 0x412   : > { %v2491_v34 = vperm.slane %v2195_v44, %v5790_v14 }
 0x414   : > { %v2492_v13 = vsel %vm2305_vm15, %v2491_v34, %v2490_v46  ;;  %1342 = vxpose.xlu1.b32.cont [9/16] (narrow) %v4057_v8, 16  ;;  %v3889_v46 = vld [vmem:[%s6864_s10 + $0x28] sm:$0xff] }
 0x415   : > { %v2535_v1 = vsel %vm2534_vm5, %v2492_v13, %v2533_v33  ;;  %2896 = vmatpush.bf16.msra.mxu1 %v3889_v46  ;;  %2957 = vmatpush.bf16.msrb.mxu2 %v3889_v46  ;;  %v3884_v33 = vld [vmem:[%s6864_s10] sm:$0xff]  ;;  %v4098_v8 = vld [vmem:[%s4308_s20 + $0x328] sm:$0xff]  ;;  %v4114_v46 = vld [vmem:[%s4308_s20 + $0x2d8] sm:$0xff] }
 0x416   : > { %v2537_v31 = vsel %vm2536_vm6, %v6126_v5, %v2535_v1  ;;  %v6367_v5 = vld [vmem:[%s7131_s2] sm:$0xff]  ;;  %s4140_s2 = sshra.s32 %s3619_s25, 4  ;;  %s4141_s2 = int_to_ptr.hbm [resolvable:$true] %s4140_s2 }
 0x417   : > { %v2538_v14 = vpack.c.b16 %v2537_v31, %v2537_v31  ;;  %v1560_v48 = vadd.f32 %v6367_v5, %v1318_v7  ;;  %v4097_v13 = vld [vmem:[%s4308_s20 + $0x3c0] sm:$0xff]  ;;  %v4099_v7 = vld [vmem:[%s4308_s20 + $0x2b0] sm:$0xff]  ;;  %v4100_v31 = vld [vmem:[%s4308_s20 + $0x3c8] sm:$0xff]  ;;  %p4147_p0 = scmp.lt.s32.totalorder %s4141_s2, %s6866_s12 }
 0x419   : > { %1441 = vxpose.xlu0.b32.cont [12/16] (narrow) %v4058_v43, 16  ;;  %2596 = vmatmul.bf16.vlgmr.msra.gmra.mxu0 %v2538_v14  ;;  %v1576_v30 = vpack.c.bf16 %v1561_v3, %v1560_v48  ;;  %v4101_v43 = vld [vmem:[%s4308_s20 + $0x330] sm:$0xff] }
 0x41a   : > { %2711 = vmatmul.bf16.vlgmr.msra.gmra.mxu3 %v2538_v14  ;;  %2724 = vmatmul.bf16.vlgmr.msra.gmra.mxu2 %v2538_v14  ;;  %v1383_v14 = vpop.trf.xlu0  ;;  %v4103_v48 = vld [vmem:[%s4308_s20 + $0x3d0] sm:$0xff] }
 0x41b   : > { %1406 = vxpose.xlu2.b32.cont [9/16] (narrow) %v4059_v40, 16  ;;  %2897 = vmatpush.bf16.msra.mxu1 %v3888_v59  ;;  %v4102_v40 = vld [vmem:[%s4308_s20 + $0x2b8] sm:$0xff]  ;;  %v1565_v15 = vadd.f32 %v6372_v2, %v1383_v14 }
 0x41c   : > { %1343 = vxpose.xlu1.b32.cont [10/16] (narrow) %v4060_v38, 16  ;;  %2958 = vmatpush.bf16.msrb.mxu2 %v3888_v59  ;;  %v1564_v38 = vadd.f32 %v6367_v5, %v1382_v9  ;;  %v4119_v9 = vld [vmem:[%s4308_s20 + $0x360] sm:$0xff] }
 0x41e   : > { %v1578_v3 = vpack.c.bf16 %v1565_v15, %v1564_v38 }
 0x41f   : > { %2898 = vmatpush.bf16.msra.mxu1 %v3887_v35 }
 0x420   : > { %2959 = vmatpush.bf16.msrb.mxu2 %v3887_v35 }
 0x421   : > { %1442 = vxpose.xlu0.b32.cont [13/16] (narrow) %v4061_v45, 16 }
 0x423   : > { %1407 = vxpose.xlu2.b32.cont [10/16] (narrow) %v4062_v18, 16  ;;  %2899 = vmatpush.bf16.msra.mxu1 %v3886_v37  ;;  %v4104_v18 = vld [vmem:[%s4308_s20 + $0x338] sm:$0xff] }
 0x424   : > { %1344 = vxpose.xlu1.b32.cont [11/16] (narrow) %v4063_v42, 16  ;;  %2960 = vmatpush.bf16.msrb.mxu2 %v3886_v37  ;;  %v4105_v42 = vld [vmem:[%s4308_s20 + $0x2c0] sm:$0xff] }
 0x427   : > { %2900 = vmatpush.bf16.msra.mxu1 %v3885_v17 }
 0x428   : > { %2961 = vmatpush.bf16.msrb.mxu2 %v3885_v17 }
 0x429   : > { %1443 = vxpose.xlu0.b32.cont [14/16] (narrow) %v4064_v39, 16  ;;  %2786 = vmatmul.bf16.vlgmr.msrb.gmra.mxu0 %v1576_v30  ;;  %v2617_v39 = vld [vmem:[%s6861_s7] sm:$0x3] }
 0x42a   : > { %2737 = vmatmul.bf16.vlgmr.msrb.gmra.mxu3 %v1576_v30 }
 0x42b   : > { %1408 = vxpose.xlu2.b32.cont [11/16] (narrow) %v4065_v12, 16  ;;  %2901 = vmatpush.bf16.msra.mxu1 %v3884_v33  ;;  %v4106_v12 = vld [vmem:[%s4308_s20 + $0x3d8] sm:$0xff] }
 0x42c   : > { %1345 = vxpose.xlu1.b32.cont [12/16] (narrow) %v4066_v29, 16  ;;  %2962 = vmatpush.bf16.msrb.mxu2 %v3884_v33  ;;  %v3960_v29 = vld [vmem:[%s6859_s5] ss:$0 sm:$0xff] }
 0x431   : > { %1444 = vxpose.xlu0.b32.cont [15/16] (narrow) %v4067_v21, 16  ;;  %v6456_v21 = vperm.slane %v2617_v39, 0 }
 0x433   : > { %1409 = vxpose.xlu2.b32.cont [12/16] (narrow) %v4068_v41, 16  ;;  %v6458_v41 = vperm.slane %v2617_v39, 1 }
 0x434   : > { %1346 = vxpose.xlu1.b32.cont [13/16] (narrow) %v4069_v25, 16 }
 0x439   : > { %1445 = vxpose.xlu0.b32.end [16/16] (narrow) %v4070_v50, 16  ;;  %v4107_v50 = vld [vmem:[%s4308_s20 + $0x340] sm:$0xff] }
 0x43b   : > { %1410 = vxpose.xlu2.b32.cont [13/16] (narrow) %v4071_v58, 16  ;;  %v4108_v58 = vld [vmem:[%s4308_s20 + $0x2c8] sm:$0xff] }
 0x43c   : > { %1347 = vxpose.xlu1.b32.cont [14/16] (narrow) %v4072_v55, 16 }
 0x441   : > { %1526 = vxpose.xlu0.b32.start [1/16] (narrow) %v4073_v52, 16 }
 0x443   : > { %1411 = vxpose.xlu2.b32.cont [14/16] (narrow) %v4074_v51, 16 }
 0x444   : > { %1348 = vxpose.xlu1.b32.cont [15/16] (narrow) %v4075_v26, 16 }
 0x449   : > { %1527 = vxpose.xlu0.b32.cont [2/16] (narrow) %v4076_v32, 16 }
 0x44b   : > { %1412 = vxpose.xlu2.b32.cont [15/16] (narrow) %v4077_v47, 16 }
 0x44c   : > { %1349 = vxpose.xlu1.b32.end [16/16] (narrow) %v4078_v60, 16 }
 0x451   : > { %1528 = vxpose.xlu0.b32.cont [3/16] (narrow) %v4079_v6, 16 }
 0x453   : > { %1413 = vxpose.xlu2.b32.end [16/16] (narrow) %v4080_v27, 16 }
 0x454   : > { %1462 = vxpose.xlu1.b32.start [1/16] (narrow) %v4081_v23, 16 }
 0x459   : > { %1529 = vxpose.xlu0.b32.cont [4/16] (narrow) %v4082_v24, 16  ;;  %v4109_v24 = vld [vmem:[%s4308_s20 + $0x3e0] sm:$0xff] }
 0x45b   : > { %1494 = vxpose.xlu2.b32.start [1/16] (narrow) %v4083_v57, 16 }
 0x45c   : > { %1463 = vxpose.xlu1.b32.cont [2/16] (narrow) %v4084_v61, 16 }
 0x461   : > { %1530 = vxpose.xlu0.b32.cont [5/16] (narrow) %v4085_v53, 16  ;;  %v4110_v53 = vld [vmem:[%s4308_s20 + $0x348] sm:$0xff] }
 0x463   : > { %1495 = vxpose.xlu2.b32.cont [2/16] (narrow) %v4086_v54, 16  ;;  %v4111_v54 = vld [vmem:[%s4308_s20 + $0x2d0] sm:$0xff] }
 0x464   : > { %1464 = vxpose.xlu1.b32.cont [3/16] (narrow) %v4087_v22, 16 }
 0x465   : > { %v1446_v23 = vpop.trf.xlu0 }
 0x469   : > { %1531 = vxpose.xlu0.b32.cont [6/16] (narrow) %v4088_v16, 16 }
 0x46b   : > { %1496 = vxpose.xlu2.b32.cont [3/16] (narrow) %v4089_v62, 16  ;;  %v4113_v62 = vld [vmem:[%s4308_s20 + $0x350] sm:$0xff] }
 0x46c   : > { %1465 = vxpose.xlu1.b32.cont [4/16] (narrow) %v4090_v28, 16  ;;  %v1568_v28 = vadd.f32 %v6367_v5, %v1446_v23 }
 0x46d   : > { %v1447_v16 = vpop.trf.xlu0 }
 0x471   : > { %1532 = vxpose.xlu0.b32.cont [7/16] (narrow) %v4091_v4, 16  ;;  %v1569_v4 = vadd.f32 %v6372_v2, %v1447_v16 }
 0x473   : > { %1497 = vxpose.xlu2.b32.cont [4/16] (narrow) %v4092_v63, 16  ;;  %v4115_v63 = vld [vmem:[%s4308_s20 + $0x3f0] sm:$0xff]  ;;  %v1580_v35 = vpack.c.bf16 %v1569_v4, %v1568_v28 }
 0x474   : > { %1466 = vxpose.xlu1.b32.cont [5/16] (narrow) %v4093_v20, 16  ;;  %v1414_v45 = vpop.trf.xlu2  ;;  %v4116_v20 = vld [vmem:[%s4308_s20 + $0x358] sm:$0xff] }
 0x475   : > { %v1566_v55 = vadd.f32 %v6367_v5, %v1414_v45 }
 0x478   : > { %v1350_v11 = vpop.trf.xlu1 }
 0x479   : > { %1533 = vxpose.xlu0.b32.cont [8/16] (narrow) %v4094_v10, 16  ;;  %v1562_v56 = vadd.f32 %v6367_v5, %v1350_v11  ;;  %v4117_v11 = vld [vmem:[%s4308_s20 + $0x2e0] sm:$0xff] }
 0x47b   : > { %1498 = vxpose.xlu2.b32.cont [5/16] (narrow) %v4095_v36, 16 }
 0x47c   : > { %1467 = vxpose.xlu1.b32.cont [6/16] (narrow) %v4096_v49, 16  ;;  %v1415_v25 = vpop.trf.xlu2 }
 0x47d   : > { %v1567_v26 = vadd.f32 %v6372_v2, %v1415_v25 }
 0x47f   : > { %v1579_v57 = vpack.c.bf16 %v1567_v26, %v1566_v55 }
 0x480   : > { %v1351_v44 = vpop.trf.xlu1 }
 0x481   : > { %v1563_v34 = vadd.f32 %v6372_v2, %v1351_v44  ;;  %1534 = vxpose.xlu0.b32.cont [9/16] (narrow) %v4097_v13, 16  ;;  %v4121_v13 = vld [vmem:[%s4308_s20 + $0x368] sm:$0xff] }
 0x483   : > { %1499 = vxpose.xlu2.b32.cont [6/16] (narrow) %v4098_v8, 16  ;;  %v1577_v1 = vpack.c.bf16 %v1563_v34, %v1562_v56  ;;  %v4118_v56 = vld [vmem:[%s4308_s20 + $0x3f8] sm:$0xff]  ;;  %v4120_v34 = vld [vmem:[%s4308_s20 + $0x2e8] sm:$0xff]  ;;  %v4122_v8 = vld [vmem:[%s4308_s20 + $0x2f0] sm:$0xff] }
 0x484   : > { %1468 = vxpose.xlu1.b32.cont [7/16] (narrow) %v4099_v7, 16  ;;  %v4124_v7 = vld [vmem:[%s4308_s20 + $0x2f8] sm:$0xff] }
 0x485   : > { %2742 = vmatmul.bf16.gmra.mxu3 %v1577_v1  ;;  %2791 = vmatmul.bf16.gmra.mxu0 %v1577_v1  ;;  %v4123_v1 = vld [vmem:[%s4308_s20 + $0x370] sm:$0xff] }
 0x489   : > { %1535 = vxpose.xlu0.b32.cont [10/16] (narrow) %v4100_v31, 16  ;;  %v4125_v31 = vld [vmem:[%s4308_s20 + $0x378] sm:$0xff]  ;;  %s407_s20 = sand.u32 1, %s4180_s22  }
 0x48a   : > { %s3682_s0 = sshll.u32 %s407_s20, 3  ;;  %s3604_s26 = scalar_lea.sflag [#allocation3], %s407_s20 }
 0x48b   : > { %1500 = vxpose.xlu2.b32.cont [7/16] (narrow) %v4101_v43, 16  ;;  %s409_s18 = scalar_lea.vmem [#allocation2], %s3682_s0 }
 0x48c   : > { %1469 = vxpose.xlu1.b32.cont [8/16] (narrow) %v4102_v40, 16  ;;  %s3616_s19 = sshll.u32 %s409_s18, 4  ;;  %s3617_s19 = int_to_ptr.vmem [resolvable:$true] %s3616_s19 }
 0x491   : > { %1536 = vxpose.xlu0.b32.cont [11/16] (narrow) %v4103_v48, 16 }
 0x493   : > { %1501 = vxpose.xlu2.b32.cont [8/16] (narrow) %v4104_v18, 16 }
 0x494   : > { %1470 = vxpose.xlu1.b32.cont [9/16] (narrow) %v4105_v42, 16 }
 0x495   : > { %2747 = vmatmul.bf16.gmra.mxu3 %v1578_v3  ;;  %2796 = vmatmul.bf16.gmra.mxu0 %v1578_v3 }
 0x496   : > { %v2597_v30 = vpop.f32.mrf.mxu0 }
 0x497   : > { %v6464_v32 = vadd.f32 %v3960_v29, %v2597_v30 }
 0x499   : > { %1537 = vxpose.xlu0.b32.cont [12/16] (narrow) %v4106_v12, 16  ;;  %v2915_v36 = vperm.slane %v6464_v32, 0  ;;  %v2908_v12 = vrot.slane %v6464_v32, 1 }
 0x49b   : > { %1502 = vxpose.xlu2.b32.cont [9/16] (narrow) %v4107_v50, 16  ;;  %v2916_v55 = vperm.slane %v2908_v12, 0 }
 0x49c   : > { %1471 = vxpose.xlu1.b32.cont [10/16] (narrow) %v4108_v58, 16 }
 0x49d   : > { %v2712_v52 = vpop.f32.mrf.mxu3  ;;  %v2725_v51 = vpop.f32.mrf.mxu2 }
 0x49e   : > { %v2713_v47 = vadd.f32 %v2712_v52, %v6456_v21  ;;  %v6468_v60 = vadd.f32 %v2725_v51, %v6458_v41  ;;  %v2599_v6 = vpop.f32.mrf.mxu0 }
 0x4a0   : > { %v2844_v27 = vmul.f32 %v2713_v47, %v6464_v32 }
 0x4a1   : > { %1538 = vxpose.xlu0.b32.cont [13/16] (narrow) %v4109_v24, 16 }
 0x4a2   : > { %v2845_v61 = vpack.c.bf16 %v2844_v27, %v2844_v27 }
 0x4a3   : > { %1503 = vxpose.xlu2.b32.cont [10/16] (narrow) %v4110_v53, 16 }
 0x4a4   : > { %2902 = vmatmul.bf16.vlgmr.msra.gmra.mxu1 %v2845_v61  ;;  %1472 = vxpose.xlu1.b32.cont [11/16] (narrow) %v4111_v54, 16 }
 0x4a5   : > { %v2714_v0 = vpop.f32.mrf.mxu3  ;;  %v2727_v22 = vpop.f32.mrf.mxu2  ;;  %2752 = vmatmul.bf16.gmra.mxu3 %v1579_v57  ;;  %2801 = vmatmul.bf16.gmra.mxu0 %v1579_v57 }
 0x4a6   : > { %v2787_v48 = vpop.f32.mrf.mxu0  ;;  %v2909_v0 = vrot.slane %v6464_v32, 2 }
 0x4a7   : > { %v6496_v3 = vadd.f32 %v2787_v48, %v6458_v41 }
 0x4a9   : > { %1539 = vxpose.xlu0.b32.cont [14/16] (narrow) %v4112_v19, 16 }
 0x4ab   : > { %1504 = vxpose.xlu2.b32.cont [11/16] (narrow) %v4113_v62, 16 }
 0x4ac   : > { %1473 = vxpose.xlu1.b32.cont [12/16] (narrow) %v4114_v46, 16  ;;  %v2917_v46 = vperm.slane %v2909_v0, 0 }
 0x4ad   : > { %v2738_v59 = vpop.f32.mrf.mxu3 }
 0x4ae   : > { %v2739_v37 = vadd.f32 %v2738_v59, %v6456_v21  ;;  %v2789_v42 = vpop.f32.mrf.mxu0 }
 0x4af   : > { %v6499_v39 = vadd.f32 %v2789_v42, %v6458_v41 }
 0x4b0   : > { %v2931_v49 = vmul.f32 %v2915_v36, %v2739_v37  ;;  %v3004_v37 = vld [vmem:[%s7132_s3] sm:$0xff] }
 0x4b1   : > { %1540 = vxpose.xlu0.b32.cont [15/16] (narrow) %v4115_v63, 16 }
 0x4b3   : > { %1505 = vxpose.xlu2.b32.cont [12/16] (narrow) %v4116_v20, 16 }
 0x4b4   : > { %1474 = vxpose.xlu1.b32.cont [13/16] (narrow) %v4117_v11, 16 }
 0x4b5   : > { %v2740_v10 = vpop.f32.mrf.mxu3  ;;  %2757 = vmatmul.bf16.gmra.mxu3 %v1580_v35  ;;  %2806 = vmatmul.bf16.gmra.mxu0 %v1580_v35 }
 0x4b6   : > { %v2741_v17 = vadd.f32 %v2740_v10, %v6456_v21 }
 0x4b8   : > { %v2932_v33 = vmul.f32 %v2915_v36, %v2741_v17 }
 0x4b9   : > { %1541 = vxpose.xlu0.b32.end [16/16] (narrow) %v4118_v56, 16 }
 0x4ba   : > { %v2947_v44 = vpack.c.bf16 %v2932_v33, %v2931_v49  ;;  %v2910_v49 = vrot.slane %v6464_v32, 3 }
 0x4bb   : > { %1506 = vxpose.xlu2.b32.cont [13/16] (narrow) %v4119_v9, 16 }
 0x4bc   : > { %2963 = vmatmul.bf16.vlgmr.msrb.gmra.mxu2 %v2947_v44  ;;  %1475 = vxpose.xlu1.b32.cont [14/16] (narrow) %v4120_v34, 16  ;;  %v2918_v44 = vperm.slane %v2910_v49, 0 }
 0x4c3   : > { %1507 = vxpose.xlu2.b32.cont [14/16] (narrow) %v4121_v13, 16 }
 0x4c4   : > { %1476 = vxpose.xlu1.b32.cont [15/16] (narrow) %v4122_v8, 16 }
 0x4cb   : > { %1508 = vxpose.xlu2.b32.cont [15/16] (narrow) %v4123_v1, 16 }
 0x4cc   : > { %1477 = vxpose.xlu1.b32.end [16/16] (narrow) %v4124_v7, 16 }
 0x4d3   : > { %1509 = vxpose.xlu2.b32.end [16/16] (narrow) %v4125_v31, 16 }
 0x4e5   : > { %v1542_v51 = vpop.trf.xlu0 }
 0x4e6   : > { %v1574_v22 = vadd.f32 %v6367_v5, %v1542_v51 }
 0x4ed   : > { %v1543_v53 = vpop.trf.xlu0 }
 0x4ee   : > { %v1575_v16 = vadd.f32 %v6372_v2, %v1543_v53 }
 0x4f0   : > { %v1583_v35 = vpack.c.bf16 %v1575_v16, %v1574_v22 }
 0x4f4   : > { %v1510_v15 = vpop.trf.xlu2 }
 0x4f5   : > { %v1572_v29 = vadd.f32 %v6367_v5, %v1510_v15 }
 0x4f8   : > { %v1478_v14 = vpop.trf.xlu1 }
 0x4f9   : > { %v1570_v40 = vadd.f32 %v6367_v5, %v1478_v14  ;;  %v3005_v14 = vld [vmem:[%s7132_s3 + $0x8] sm:$0xff]  ;;  %s4142_s3 = scalar_lea.hbm %s4141_s2, 8 }
 0x4fa   : > { %p4143_p11 = scmp.ne.s32.totalorder %s4141_s2, %s4142_s3  ;;  %p4148_p1 = scmp.lt.s32.totalorder %s4146_s28, %s4142_s3 }
 0x4fc   : > { %v1511_v30 = vpop.trf.xlu2  ;;  %p4144_p12 = pnand %p4143_p11, %p4291_p5  ;;  %p4149_p2 = por %p4148_p1, %p4147_p0 }
 0x4fd   : > { %v1573_v25 = vadd.f32 %v6372_v2, %v1511_v30 }
 0x4fe   : > { %p4145_p13 = pneg %p4144_p12 }
 0x4ff   : > { %v1582_v6 = vpack.c.bf16 %v1573_v25, %v1572_v29  ;;  %v2912_v29 = vrot.slane %v6464_v32, 5 }
 0x500   : > { %v1479_v43 = vpop.trf.xlu1  ;;  %p4150_p3 = pnand %p4149_p2, %p4145_p13 }
 0x501   : > { %v1571_v38 = vadd.f32 %v6372_v2, %v1479_v43  ;;  %v2911_v43 = vrot.slane %v6464_v32, 4 }
 0x502   : > { %v2792_v27 = vpop.f32.mrf.mxu0 }
 0x503   : > { %v1581_v45 = vpack.c.bf16 %v1571_v38, %v1570_v40  ;;  %v6507_v23 = vadd.f32 %v2792_v27, %v6458_v41  ;;  %v2919_v15 = vperm.slane %v2911_v43, 0 }
 0x505   : > { %2762 = vmatmul.bf16.gmra.mxu3 %v1581_v45  ;;  %2811 = vmatmul.bf16.gmra.mxu0 %v1581_v45 }
 0x508   : > { %v2743_v18 = vpop.f32.mrf.mxu3 }
 0x509   : > { %v2744_v50 = vadd.f32 %v2743_v18, %v6456_v21 }
 0x50a   : > { %v2794_v61 = vpop.f32.mrf.mxu0 }
 0x50b   : > { %v2933_v26 = vmul.f32 %v2916_v55, %v2744_v50  ;;  %v6510_v54 = vadd.f32 %v2794_v61, %v6458_v41 }
 0x510   : > { %v2745_v58 = vpop.f32.mrf.mxu3 }
 0x511   : > { %v2746_v52 = vadd.f32 %v2745_v58, %v6456_v21  ;;  %v2920_v58 = vperm.slane %v2912_v29, 0 }
 0x512   : > { %v2797_v20 = vpop.f32.mrf.mxu0 }
 0x513   : > { %v2934_v47 = vmul.f32 %v2916_v55, %v2746_v52  ;;  %v6523_v5 = vadd.f32 %v2797_v20, %v6458_v41 }
 0x515   : > { %2767 = vmatmul.bf16.gmra.mxu3 %v1582_v6  ;;  %2816 = vmatmul.bf16.gmra.mxu0 %v1582_v6  ;;  %v2948_v24 = vpack.c.bf16 %v2934_v47, %v2933_v26 }
 0x517   : > { %2968 = vmatmul.bf16.gmra.mxu2 %v2948_v24 }
 0x518   : > { %v2748_v57 = vpop.f32.mrf.mxu3 }
 0x519   : > { %v2749_v19 = vadd.f32 %v2748_v57, %v6456_v21 }
 0x51a   : > { %v2799_v36 = vpop.f32.mrf.mxu0 }
 0x51b   : > { %v2935_v4 = vmul.f32 %v2917_v46, %v2749_v19  ;;  %v6526_v17 = vadd.f32 %v2799_v36, %v6458_v41  ;;  %v2913_v19 = vrot.slane %v6464_v32, 6 }
 0x520   : > { %v2750_v62 = vpop.f32.mrf.mxu3 }
 0x521   : > { %v2751_v28 = vadd.f32 %v2750_v62, %v6456_v21  ;;  %v6517_v59 = vpop.f32.mrf.mxu1 }
 0x522   : > { %v2802_v8 = vpop.f32.mrf.mxu0 }
 0x523   : > { %v2936_v63 = vmul.f32 %v2917_v46, %v2751_v28  ;;  %v6532_v1 = vadd.f32 %v2802_v8, %v6458_v41 }
 0x525   : > { %2772 = vmatmul.bf16.gmra.mxu3 %v1583_v35  ;;  %2821 = vmatmul.bf16.gmra.mxu0 %v1583_v35  ;;  %v2949_v2 = vpack.c.bf16 %v2936_v63, %v2935_v4  ;;  %v2921_v4 = vperm.slane %v2913_v19, 0 }
 0x527   : > { %3008 = vperm.xlu0 %3958, %v3004_v37   ;;  %2973 = vmatmul.bf16.gmra.mxu2 %v2949_v2 }
 0x528   : > { %v2753_v11 = vpop.f32.mrf.mxu3 }
 0x529   : > { %v2905_v10 = vpop.f32.mrf.mxu1  ;;  %v2754_v33 = vadd.f32 %v2753_v11, %v6456_v21 }
 0x52b   : > { %v2937_v34 = vmul.f32 %v2918_v44, %v2754_v33 }
 0x530   : > { %v2755_v56 = vpop.f32.mrf.mxu3 }
 0x531   : > { %v2756_v9 = vadd.f32 %v2755_v56, %v6456_v21 }
 0x533   : > { %v2938_v13 = vmul.f32 %v2918_v44, %v2756_v9 }
 0x535   : > { %v2950_v7 = vpack.c.bf16 %v2938_v13, %v2937_v34 }
 0x537   : > { %2978 = vmatmul.bf16.gmra.mxu2 %v2950_v7 }
 0x538   : > { %v2758_v31 = vpop.f32.mrf.mxu3 }
 0x539   : > { %v2759_v40 = vadd.f32 %v2758_v31, %v6456_v21 }
 0x53b   : > { %v2939_v48 = vmul.f32 %v2919_v15, %v2759_v40 }
 0x53c   : > { %3013 = vperm.xlu2 %3957, %v3005_v14   ;;  %v2914_v14 = vrot.slane %v6464_v32, 7 }
 0x53f   : > { %v2964_v30 = vpop.f32.mrf.mxu2 }
 0x540   : > { %v2760_v38 = vpop.f32.mrf.mxu3 }
 0x541   : > { %v2761_v45 = vadd.f32 %v2760_v38, %v6456_v21 }
 0x543   : > { %v2940_v18 = vmul.f32 %v2919_v15, %v2761_v45 }
 0x545   : > { %v2951_v42 = vpack.c.bf16 %v2940_v18, %v2939_v48  ;;  %v2922_v48 = vperm.slane %v2914_v14, 0 }
 0x547   : > { %2983 = vmatmul.bf16.gmra.mxu2 %v2951_v42  ;;  %v2966_v52 = vpop.f32.mrf.mxu2 }
 0x588   : > { %v2763_v12 = vpop.f32.mrf.mxu3 }
 0x589   : > { %v2764_v25 = vadd.f32 %v2763_v12, %v6456_v21 }
 0x58b   : > { %v2941_v51 = vmul.f32 %v2920_v58, %v2764_v25 }
 0x590   : > { %v2765_v50 = vpop.f32.mrf.mxu3 }
 0x591   : > { %v2766_v55 = vadd.f32 %v2765_v50, %v6456_v21 }
 0x593   : > { %v2942_v26 = vmul.f32 %v2920_v58, %v2766_v55 }
 0x595   : > { %v2952_v47 = vpack.c.bf16 %v2942_v26, %v2941_v51 }
 0x596   : > { %v6543_v6 = vpop.permute.xlu2 %3013 }
 0x597   : > { %2988 = vmatmul.bf16.gmra.mxu2 %v2952_v47  ;;  %v6546_v27 = vadd.f32 %v6543_v6, %v2966_v52 }
 0x598   : > { %v2768_v24 = vpop.f32.mrf.mxu3 }
 0x599   : > { %v6548_v57 = vpop.permute.xlu0 %3008  ;;  %v3034_v0 = vsel %vm3032_vm7, %v6546_v27, -inf  ;;  %v2769_v62 = vadd.f32 %v2768_v24, %v6456_v21 }
 0x59a   : > { %v6551_v61 = vadd.f32 %v6548_v57, %v2964_v30  ;;  %v2969_v53 = vpop.f32.mrf.mxu2 }
 0x59b   : > { %v6560_v63 = vadd.f32 %v6548_v57, %v2969_v53  ;;  %v2943_v2 = vmul.f32 %v2921_v4, %v2769_v62 }
 0x59c   : > { %v3033_v22 = vsel %vm3032_vm7, %v6551_v61, -inf }
 0x59d   : > { %v3035_v16 = vmax.f32 %v3033_v22, %v3034_v0  ;;  %v3042_v36 = vsel %vm3032_vm7, %v6560_v63, -inf }
 0x59f   : > { %v3036_v46 = vrot.slane %v3035_v16, 4 }
 0x5a0   : > { %v2770_v28 = vpop.f32.mrf.mxu3 }
 0x5a1   : > { %v2771_v35 = vadd.f32 %v2770_v28, %v6456_v21  ;;  %v3037_v20 = vmax.f32 %v3035_v16, %v3036_v46 }
 0x5a2   : > { %v2971_v37 = vpop.f32.mrf.mxu2 }
 0x5a3   : > { %v2944_v11 = vmul.f32 %v2921_v4, %v2771_v35  ;;  %v6564_v10 = vadd.f32 %v6543_v6, %v2971_v37  ;;  %v3038_v56 = vrot.slane %v3037_v20, 2 }
 0x5a5   : > { %v3043_v49 = vsel %vm3032_vm7, %v6564_v10, -inf  ;;  %v2953_v33 = vpack.c.bf16 %v2944_v11, %v2943_v2  ;;  %v3039_v13 = vmax.f32 %v3037_v20, %v3038_v56 }
 0x5a6   : > { %v3044_v44 = vmax.f32 %v3042_v36, %v3043_v49 }
 0x5a7   : > { %2993 = vmatmul.bf16.gmra.mxu2 %v2953_v33  ;;  %v3040_v43 = vrot.slane %v3039_v13, 1 }
 0x5a8   : > { %v3045_v9 = vrot.slane %v3044_v44, 4  ;;  %v2773_v34 = vpop.f32.mrf.mxu3 }
 0x5a9   : > { %v2774_v38 = vadd.f32 %v2773_v34, %v6456_v21  ;;  %v3041_v30 = vmax.f32 %v3039_v13, %v3040_v43 }
 0x5aa   : > { %v3046_v8 = vmax.f32 %v3044_v44, %v3045_v9  ;;  %v2974_v7 = vpop.f32.mrf.mxu2 }
 0x5ab   : > { %v6573_v18 = vadd.f32 %v6548_v57, %v2974_v7  ;;  %v2945_v25 = vmul.f32 %v2922_v48, %v2774_v38 }
 0x5ac   : > { %v3047_v31 = vrot.slane %v3046_v8, 2 }
 0x5ad   : > { %v3051_v55 = vsel %vm3032_vm7, %v6573_v18, -inf }
 0x5ae   : > { %v3048_v40 = vmax.f32 %v3046_v8, %v3047_v31 }
 0x5b0   : > { %v3049_v15 = vrot.slane %v3048_v40, 1  ;;  %v2775_v45 = vpop.f32.mrf.mxu3 }
 0x5b1   : > { %v2776_v42 = vadd.f32 %v2775_v45, %v6456_v21 }
 0x5b2   : > { %v3050_v12 = vmax.f32 %v3048_v40, %v3049_v15  ;;  %v2976_v29 = vpop.f32.mrf.mxu2 }
 0x5b3   : > { %v2946_v50 = vmul.f32 %v2922_v48, %v2776_v42  ;;  %v6577_v58 = vadd.f32 %v6543_v6, %v2976_v29 }
 0x5b4   : > { %v3113_v32 = vsel %vm2524_vm0, %v3050_v12, %v3041_v30 }
 0x5b5   : > { %v3052_v52 = vsel %vm3032_vm7, %v6577_v58, -inf  ;;  %v2954_v51 = vpack.c.bf16 %v2946_v50, %v2945_v25 }
 0x5b6   : > { %v3053_v26 = vmax.f32 %v3051_v55, %v3052_v52 }
 0x5b7   : > { %2998 = vmatmul.bf16.gmra.mxu2 %v2954_v51 }
 0x5b8   : > { %v3054_v21 = vrot.slane %v3053_v26, 4 }
 0x5ba   : > { %v3055_v47 = vmax.f32 %v3053_v26, %v3054_v21  ;;  %v2979_v24 = vpop.f32.mrf.mxu2 }
 0x5bb   : > { %v6585_v19 = vadd.f32 %v6548_v57, %v2979_v24 }
 0x5bc   : > { %v3056_v53 = vrot.slane %v3055_v47, 2 }
 0x5bd   : > { %v3060_v4 = vsel %vm3032_vm7, %v6585_v19, -inf }
 0x5be   : > { %v3057_v0 = vmax.f32 %v3055_v47, %v3056_v53 }
 0x5c0   : > { %v3058_v22 = vrot.slane %v3057_v0, 1 }
 0x5c2   : > { %v3059_v16 = vmax.f32 %v3057_v0, %v3058_v22  ;;  %v2981_v62 = vpop.f32.mrf.mxu2 }
 0x5c3   : > { %v6588_v46 = vadd.f32 %v6543_v6, %v2981_v62 }
 0x5c4   : > { %v3114_v28 = vsel %vm2526_vm1, %v3059_v16, %v3113_v32 }
 0x5c5   : > { %v3061_v35 = vsel %vm3032_vm7, %v6588_v46, -inf }
 0x5c6   : > { %v3062_v20 = vmax.f32 %v3060_v4, %v3061_v35 }
 0x5c8   : > { %v3063_v37 = vrot.slane %v3062_v20, 4 }
 0x5ca   : > { %v3064_v2 = vmax.f32 %v3062_v20, %v3063_v37  ;;  %v2984_v44 = vpop.f32.mrf.mxu2 }
 0x5cb   : > { %v6603_v14 = vadd.f32 %v6548_v57, %v2984_v44 }
 0x5cc   : > { %v3065_v11 = vrot.slane %v3064_v2, 2 }
 0x5cd   : > { %v3069_v42 = vsel %vm3032_vm7, %v6603_v14, -inf }
 0x5ce   : > { %v3066_v36 = vmax.f32 %v3064_v2, %v3065_v11 }
 0x5d0   : > { %v3067_v49 = vrot.slane %v3066_v36, 1 }
 0x5d2   : > { %v3068_v33 = vmax.f32 %v3066_v36, %v3067_v49  ;;  %v2986_v9 = vpop.f32.mrf.mxu2 }
 0x5d3   : > { %v6597_v7 = vadd.f32 %v6543_v6, %v2986_v9 }
 0x5d4   : > { %v3115_v56 = vsel %vm2528_vm2, %v3068_v33, %v3114_v28 }
 0x5d5   : > { %v3070_v40 = vsel %vm3032_vm7, %v6597_v7, -inf }
 0x5d6   : > { %v3071_v30 = vmax.f32 %v3069_v42, %v3070_v40 }
 0x5d8   : > { %v3072_v55 = vrot.slane %v3071_v30, 4 }
 0x5da   : > { %v3073_v21 = vmax.f32 %v3071_v30, %v3072_v55 }
 0x5dc   : > { %v3074_v53 = vrot.slane %v3073_v21, 2 }
 0x5de   : > { %v3075_v4 = vmax.f32 %v3073_v21, %v3074_v53 }
 0x5e0   : > { %v3076_v49 = vrot.slane %v3075_v4, 1 }
 0x61a   : > { %v2989_v34 = vpop.f32.mrf.mxu2 }
 0x61b   : > { %v6606_v43 = vadd.f32 %v6548_v57, %v2989_v34  ;;  %v3077_v34 = vmax.f32 %v3075_v4, %v3076_v49 }
 0x61d   : > { %v3078_v12 = vsel %vm3032_vm7, %v6606_v43, -inf }
 0x622   : > { %v2991_v13 = vpop.f32.mrf.mxu2 }
 0x623   : > { %v6600_v31 = vadd.f32 %v6543_v6, %v2991_v13 }
 0x625   : > { %v3079_v45 = vsel %vm3032_vm7, %v6600_v31, -inf }
 0x626   : > { %v3080_v25 = vmax.f32 %v3078_v12, %v3079_v45 }
 0x628   : > { %v3081_v52 = vrot.slane %v3080_v25, 4 }
 0x62a   : > { %v2994_v8 = vpop.f32.mrf.mxu2  ;;  %v3082_v47 = vmax.f32 %v3080_v25, %v3081_v52 }
 0x62b   : > { %v6611_v38 = vadd.f32 %v6548_v57, %v2994_v8 }
 0x62c   : > { %v3083_v22 = vrot.slane %v3082_v47, 2 }
 0x62d   : > { %v3087_v50 = vsel %vm3032_vm7, %v6611_v38, -inf }
 0x62e   : > { %v3084_v37 = vmax.f32 %v3082_v47, %v3083_v22 }
 0x632   : > { %v2996_v15 = vpop.f32.mrf.mxu2 }
 0x633   : > { %v6616_v48 = vadd.f32 %v6543_v6, %v2996_v15  ;;  %v3116_v15 = vsel %vm2530_vm3, %v3077_v34, %v3115_v56 }
 0x635   : > { %v3088_v29 = vsel %vm3032_vm7, %v6616_v48, -inf }
 0x636   : > { %v3089_v32 = vmax.f32 %v3087_v50, %v3088_v29 }
 0x638   : > { %v3090_v26 = vrot.slane %v3089_v32, 4 }
 0x63a   : > { %v2999_v51 = vpop.f32.mrf.mxu2  ;;  %v3091_v24 = vmax.f32 %v3089_v32, %v3090_v26 }
 0x63b   : > { %v6627_v0 = vadd.f32 %v6548_v57, %v2999_v51  ;;  %v3085_v57 = vrot.slane %v3084_v37, 1 }
 0x63c   : > { %v3092_v62 = vrot.slane %v3091_v24, 2 }
 0x63d   : > { %v3096_v35 = vsel %vm3032_vm7, %v6627_v0, -inf  ;;  %v3086_v13 = vmax.f32 %v3084_v37, %v3085_v57 }
 0x63e   : > { %v3093_v11 = vmax.f32 %v3091_v24, %v3092_v62 }
 0x63f   : > { %v3117_v45 = vsel %vm2532_vm4, %v3086_v13, %v3116_v15 }
 0x640   : > { %v3094_v44 = vrot.slane %v3093_v11, 1 }
 0x642   : > { %v3001_v16 = vpop.f32.mrf.mxu2  ;;  %v3095_v8 = vmax.f32 %v3093_v11, %v3094_v44 }
 0x643   : > { %v6630_v28 = vadd.f32 %v6543_v6, %v3001_v16 }
 0x644   : > { %v3118_v30 = vsel %vm2534_vm5, %v3095_v8, %v3117_v45 }
 0x645   : > { %v3097_v20 = vsel %vm3032_vm7, %v6630_v28, -inf }
 0x646   : > { %v3098_v2 = vmax.f32 %v3096_v35, %v3097_v20 }
 0x648   : > { %v3099_v36 = vrot.slane %v3098_v2, 4 }
 0x64a   : > { %v3100_v33 = vmax.f32 %v3098_v2, %v3099_v36 }
 0x64c   : > { %v3101_v9 = vrot.slane %v3100_v33, 2 }
 0x64e   : > { %v3102_v6 = vmax.f32 %v3100_v33, %v3101_v9 }
 0x650   : > { %v3103_v40 = vrot.slane %v3102_v6, 1 }
 0x652   : > { %v3104_v42 = vmax.f32 %v3102_v6, %v3103_v40 }
 0x654   : > { %v3119_v12 = vsel %vm2536_vm6, %v3104_v42, %v3118_v30 }
 0x655   : > { %v6641_v29 = vmax.f32 %v6517_v59, %v3119_v12 }
 0x657   : > { %v3126_v25 = vrot.slane %v6641_v29, 1  ;;  %v3127_v50 = vrot.slane %v6641_v29, 2  ;;  %v3128_v32 = vrot.slane %v6641_v29, 3  ;;  %v3129_v55 = vrot.slane %v6641_v29, 4 }
 0x658   : > { %v3133_v56 = vperm.slane %v6641_v29, 0  ;;  %v3130_v21 = vrot.slane %v6641_v29, 5  ;;  %v3131_v62 = vrot.slane %v6641_v29, 6  ;;  %v3132_v37 = vrot.slane %v6641_v29, 7 }
 0x659   : > { %v3134_v52 = vperm.slane %v3126_v25, 0  ;;  %v3135_v51 = vperm.slane %v3127_v50, 0  ;;  %v3136_v26 = vperm.slane %v3128_v32, 0  ;;  %v3137_v4 = vperm.slane %v3129_v55, 0 }
 0x65a   : > { %v3149_v47 = vsub.f32 %v6551_v61, %v3133_v56  ;;  %v3150_v24 = vsub.f32 %v6546_v27, %v3133_v56  ;;  %v3138_v2 = vperm.slane %v3130_v21, 0  ;;  %v3139_v49 = vperm.slane %v3131_v62, 0 }
 0x65b   : > { %v3151_v53 = vsub.f32 %v6560_v63, %v3134_v52  ;;  %v3152_v22 = vsub.f32 %v6564_v10, %v3134_v52  ;;  %v3153_v16 = vsub.f32 %v6573_v18, %v3135_v51  ;;  %v3154_v35 = vsub.f32 %v6577_v58, %v3135_v51 }
 0x65c   : > { %v3155_v20 = vsub.f32 %v6585_v19, %v3136_v26  ;;  %v3165_v11 = vmul.f32 1.442695, %v3149_v47  ;;  %v3156_v61 = vsub.f32 %v6588_v46, %v3136_v26  ;;  %v3167_v27 = vmul.f32 1.442695, %v3150_v24 }
 0x65d   : > { %v3169_v36 = vmul.f32 1.442695, %v3151_v53  ;;  %v3171_v63 = vmul.f32 1.442695, %v3152_v22  ;;  %v3157_v10 = vsub.f32 %v6603_v14, %v3137_v4  ;;  %v3173_v18 = vmul.f32 1.442695, %v3153_v16 }
 0x65e   : > { %3962 = vpow2.f32 %v3165_v11  ;;  %v3140_v57 = vperm.slane %v3132_v37, 0  ;;  %v3158_v33 = vsub.f32 %v6597_v7, %v3137_v4  ;;  %v3175_v58 = vmul.f32 1.442695, %v3154_v35 }
 0x65f   : > { %3964 = vpow2.f32 %v3167_v27  ;;  %v3159_v19 = vsub.f32 %v6606_v43, %v3138_v2  ;;  %v3177_v44 = vmul.f32 1.442695, %v3155_v20  ;;  %v3160_v9 = vsub.f32 %v6600_v31, %v3138_v2  ;;  %v2843_v31 = vld [vmem:[%s6865_s11] sm:$0x3] }
 0x660   : > { %3966 = vpow2.f32 %v3169_v36  ;;  %v3179_v46 = vmul.f32 1.442695, %v3156_v61  ;;  %v3161_v34 = vsub.f32 %v6611_v38, %v3139_v49  ;;  %v3181_v13 = vmul.f32 1.442695, %v3157_v10 }
 0x661   : > { %3968 = vpow2.f32 %v3171_v63  ;;  %v3162_v14 = vsub.f32 %v6616_v48, %v3139_v49  ;;  %v3163_v6 = vsub.f32 %v6627_v0, %v3140_v57  ;;  %v3183_v7 = vmul.f32 1.442695, %v3158_v33 }
 0x662   : > { %3970 = vpow2.f32 %v3173_v18  ;;  %v3164_v43 = vsub.f32 %v6630_v28, %v3140_v57  ;;  %v3185_v40 = vmul.f32 1.442695, %v3159_v19  ;;  %v3187_v15 = vmul.f32 1.442695, %v3160_v9 }
 0x663   : > { %3972 = vpow2.f32 %v3175_v58  ;;  %v3294_v0 = vsel %vm3292_vm8, %v2843_v31, 0  ;;  %v3189_v42 = vmul.f32 1.442695, %v3161_v34  ;;  %v3191_v12 = vmul.f32 1.442695, %v3162_v14 }
 0x664   : > { %v6666_v8 = vpop.eup %3962  ;;  %3974 = vpow2.f32 %v3177_v44  ;;  %3303 = vmatpush.bf16.msrb.mxu1 %v3294_v0  ;;  %v3193_v55 = vmul.f32 1.442695, %v3163_v6  ;;  %v3195_v56 = vmul.f32 1.442695, %v3164_v43 }
 0x665   : > { %v6672_v38 = vpop.eup %3964  ;;  %3976 = vpow2.f32 %v3179_v46  ;;  %v3197_v48 = vsel %vm3032_vm7, %v6666_v8, 0.0 }
 0x666   : > { %v6676_v45 = vpop.eup %3966  ;;  %3978 = vpow2.f32 %v3181_v13  ;;  %v3198_v28 = vsel %vm3032_vm7, %v6672_v38, 0.0  ;;  %v3122_v13 = vsub.f32 %v6517_v59, %v6641_v29 }
 0x667   : > { %v6680_v30 = vpop.eup %3968  ;;  %3980 = vpow2.f32 %v3183_v7  ;;  %v3199_v25 = vadd.f32 %v3198_v28, %v3197_v48  ;;  %v3206_v50 = vsel %vm3032_vm7, %v6676_v45, 0.0 }
 0x668   : > { %3388 = vmatpush.bf16.msra.mxu1 %v3294_v0  ;;  %v6684_v32 = vpop.eup %3970  ;;  %3982 = vpow2.f32 %v3185_v40  ;;  %v3207_v52 = vsel %vm3032_vm7, %v6680_v30, 0.0 }
 0x669   : > { %v6688_v51 = vpop.eup %3972  ;;  %3984 = vpow2.f32 %v3187_v15  ;;  %v3200_v26 = vrot.slane %v3199_v25, 4  ;;  %v3208_v21 = vadd.f32 %v3207_v52, %v3206_v50  ;;  %v3215_v47 = vsel %vm3032_vm7, %v6684_v32, 0.0 }
 0x66a   : > { %v6692_v24 = vpop.eup %3974  ;;  %3986 = vpow2.f32 %v3189_v42  ;;  %v3216_v53 = vsel %vm3032_vm7, %v6688_v51, 0.0 }
 0x66b   : > { %v6696_v22 = vpop.eup %3976  ;;  %3988 = vpow2.f32 %v3191_v12  ;;  %v3201_v16 = vadd.f32 %v3200_v26, %v3199_v25  ;;  %v3209_v62 = vrot.slane %v3208_v21, 4  ;;  %v3217_v4 = vadd.f32 %v3216_v53, %v3215_v47 }
 0x66c   : > { %v6698_v35 = vpop.eup %3978  ;;  %3990 = vpow2.f32 %v3193_v55  ;;  %v3224_v20 = vsel %vm3032_vm7, %v6692_v24, 0.0  ;;  %v3225_v37 = vsel %vm3032_vm7, %v6696_v22, 0.0 }
 0x66d   : > { %v6704_v2 = vpop.eup %3980  ;;  %3992 = vpow2.f32 %v3195_v56  ;;  %v3202_v11 = vrot.slane %v3201_v16, 2  ;;  %v3210_v61 = vadd.f32 %v3209_v62, %v3208_v21  ;;  %v3218_v27 = vrot.slane %v3217_v4, 4 }
 0x66e   : > { %v6706_v36 = vpop.eup %3982  ;;  %v3226_v63 = vadd.f32 %v3225_v37, %v3224_v20  ;;  %v3233_v49 = vsel %vm3032_vm7, %v6698_v35, 0.0  ;;  %v3234_v10 = vsel %vm3032_vm7, %v6704_v2, 0.0 }
 0x66f   : > { %v6712_v18 = vpop.eup %3984  ;;  %v3203_v57 = vadd.f32 %v3202_v11, %v3201_v16  ;;  %v3211_v33 = vrot.slane %v3210_v61, 2  ;;  %v3219_v58 = vadd.f32 %v3218_v27, %v3217_v4  ;;  %v3235_v19 = vadd.f32 %v3234_v10, %v3233_v49 }
 0x670   : > { %v6714_v44 = vpop.eup %3986  ;;  %v3227_v9 = vrot.slane %v3226_v63, 4  ;;  %v3242_v46 = vsel %vm3032_vm7, %v6706_v36, 0.0  ;;  %v3243_v34 = vsel %vm3032_vm7, %v6712_v18, 0.0 }
 0x671   : > { %v6722_v14 = vpop.eup %3988  ;;  %v3204_v6 = vrot.slane %v3203_v57, 1  ;;  %v3212_v7 = vadd.f32 %v3211_v33, %v3210_v61  ;;  %v3220_v43 = vrot.slane %v3219_v58, 2  ;;  %v3236_v40 = vrot.slane %v3235_v19, 4 }
 0x672   : > { %v6724_v31 = vpop.eup %3990  ;;  %v3228_v15 = vadd.f32 %v3227_v9, %v3226_v63  ;;  %v3244_v48 = vadd.f32 %v3243_v34, %v3242_v46  ;;  %v3251_v0 = vsel %vm3032_vm7, %v6714_v44, 0.0  ;;  %v3252_v42 = vsel %vm3032_vm7, %v6722_v14, 0.0 }
 0x673   : > { %v6730_v28 = vpop.eup %3992  ;;  %v3205_v12 = vadd.f32 %v3204_v6, %v3203_v57  ;;  %v3213_v59 = vrot.slane %v3212_v7, 1  ;;  %v3221_v29 = vadd.f32 %v3220_v43, %v3219_v58  ;;  %v3237_v25 = vadd.f32 %v3236_v40, %v3235_v19 }
 0x674   : > { %v3229_v50 = vrot.slane %v3228_v15, 2  ;;  %v3245_v55 = vrot.slane %v3244_v48, 4  ;;  %v3253_v56 = vadd.f32 %v3252_v42, %v3251_v0  ;;  %v3260_v52 = vsel %vm3032_vm7, %v6724_v31, 0.0 }
 0x675   : > { %v3214_v26 = vadd.f32 %v3213_v59, %v3212_v7  ;;  %v3222_v21 = vrot.slane %v3221_v29, 1  ;;  %v3238_v47 = vrot.slane %v3237_v25, 2  ;;  %v3261_v53 = vsel %vm3032_vm7, %v6730_v28, 0.0 }
 0x676   : > { %v3230_v16 = vadd.f32 %v3229_v50, %v3228_v15  ;;  %v3246_v62 = vadd.f32 %v3245_v55, %v3244_v48  ;;  %v3254_v4 = vrot.slane %v3253_v56, 4  ;;  %v3262_v20 = vadd.f32 %v3261_v53, %v3260_v52 }
 0x677   : > { %v3223_v37 = vadd.f32 %v3222_v21, %v3221_v29  ;;  %v3239_v11 = vadd.f32 %v3238_v47, %v3237_v25  ;;  %v3277_v61 = vsel %vm2524_vm0, %v3214_v26, %v3205_v12  ;;  %v3123_v58 = vmul.f32 1.442695, %v3122_v13 }
 0x678   : > { %v3231_v27 = vrot.slane %v3230_v16, 1  ;;  %v3247_v63 = vrot.slane %v3246_v62, 2  ;;  %v3255_v49 = vadd.f32 %v3254_v4, %v3253_v56  ;;  %v3263_v10 = vrot.slane %v3262_v20, 4 }
 0x679   : > { %v3240_v57 = vrot.slane %v3239_v11, 1  ;;  %v3278_v33 = vsel %vm2526_vm1, %v3223_v37, %v3277_v61  ;;  %3994 = vpow2.f32 %v3123_v58 }
 0x67a   : > { %v3232_v19 = vadd.f32 %v3231_v27, %v3230_v16  ;;  %v3248_v9 = vadd.f32 %v3247_v63, %v3246_v62  ;;  %v3256_v46 = vrot.slane %v3255_v49, 2  ;;  %v3264_v34 = vadd.f32 %v3263_v10, %v3262_v20 }
 0x67b   : > { %v3241_v6 = vadd.f32 %v3240_v57, %v3239_v11 }
 0x67c   : > { %v3249_v7 = vrot.slane %v3248_v9, 1  ;;  %v3257_v43 = vadd.f32 %v3256_v46, %v3255_v49  ;;  %v3265_v40 = vrot.slane %v3264_v34, 2  ;;  %v3279_v15 = vsel %vm2528_vm2, %v3232_v19, %v3278_v33 }
 0x67d   : > { %v3280_v48 = vsel %vm2530_vm3, %v3241_v6, %v3279_v15 }
 0x67e   : > { %v3250_v0 = vadd.f32 %v3249_v7, %v3248_v9  ;;  %v3258_v42 = vrot.slane %v3257_v43, 1  ;;  %v3266_v12 = vadd.f32 %v3265_v40, %v3264_v34 }
 0x67f   : > { %v3995_v55 = vpop.eup %3994 }
 0x680   : > { %v3259_v59 = vadd.f32 %v3258_v42, %v3257_v43  ;;  %v3267_v29 = vrot.slane %v3266_v12, 1  ;;  %v3281_v13 = vsel %vm2532_vm4, %v3250_v0, %v3280_v48 }
 0x682   : > { %v3268_v25 = vadd.f32 %v3267_v29, %v3266_v12  ;;  %v3282_v50 = vsel %vm2534_vm5, %v3259_v59, %v3281_v13 }
 0x684   : > { %v3283_v56 = vsel %vm2536_vm6, %v3268_v25, %v3282_v50  ;;  %v3898_v25 = vld [vmem:[%s6862_s8 + $0x30] sm:$0xff] }
 0x685   : > { %v3285_v52 = vadd.f32 %v3995_v55, %v3283_v56 }
 0x687   : > { %3996 = vrcp.f32 %v3285_v52 }
 0x68d   : > { %v3997_v26 = vpop.eup %3996 }
 0x68e   : > { %v3287_v21 = vmul.f32 %v3997_v26, %v3995_v55  ;;  %v3317_v47 = vperm.slane %v3997_v26, 0  ;;  %v3310_v53 = vrot.slane %v3997_v26, 1  ;;  %v3311_v16 = vrot.slane %v3997_v26, 2 }
 0x68f   : > { %v3312_v62 = vrot.slane %v3997_v26, 3  ;;  %v3313_v4 = vrot.slane %v3997_v26, 4  ;;  %v3314_v20 = vrot.slane %v3997_v26, 5  ;;  %v3315_v37 = vrot.slane %v3997_v26, 6 }
 0x690   : > { %v3288_v11 = vpack.c.bf16 %v3287_v21, %v3287_v21  ;;  %v3333_v61 = vmul.f32 %v6666_v8, %v3317_v47  ;;  %v3334_v27 = vmul.f32 %v6672_v38, %v3317_v47  ;;  %v3318_v63 = vperm.slane %v3310_v53, 0 }
 0x691   : > { %v3319_v49 = vperm.slane %v3311_v16, 0  ;;  %v3320_v10 = vperm.slane %v3312_v62, 0  ;;  %v3321_v57 = vperm.slane %v3313_v4, 0  ;;  %v3322_v33 = vperm.slane %v3314_v20, 0 }
 0x692   : > { %3814 = vmatmul.msk.bf16.vlgmr.msrb.gmra.mxu1 %vm3032_vm7, %v3288_v11  ;;  %v3349_v58 = vpack.c.bf16 %v3334_v27, %v3333_v61  ;;  %v3335_v19 = vmul.f32 %v6676_v45, %v3318_v63  ;;  %v3336_v9 = vmul.f32 %v6680_v30, %v3318_v63  ;;  %v3323_v46 = vperm.slane %v3315_v37, 0  ;;  %v2804_v27 = vpop.f32.mrf.mxu0 }
 0x693   : > { %v3337_v34 = vmul.f32 %v6684_v32, %v3319_v49  ;;  %v3338_v6 = vmul.f32 %v6688_v51, %v3319_v49  ;;  %v3339_v8 = vmul.f32 %v6692_v24, %v3320_v10  ;;  %v3340_v38 = vmul.f32 %v6696_v22, %v3320_v10 }
 0x694   : > { %v3350_v7 = vpack.c.bf16 %v3336_v9, %v3335_v19  ;;  %v3341_v43 = vmul.f32 %v6698_v35, %v3321_v57  ;;  %v3342_v40 = vmul.f32 %v6704_v2, %v3321_v57  ;;  %v3343_v15 = vmul.f32 %v6706_v36, %v3322_v33 }
 0x695   : > { %v3351_v48 = vpack.c.bf16 %v3338_v6, %v3337_v34  ;;  %v3352_v45 = vpack.c.bf16 %v3340_v38, %v3339_v8  ;;  %v3344_v30 = vmul.f32 %v6712_v18, %v3322_v33  ;;  %v3345_v0 = vmul.f32 %v6714_v44, %v3323_v46  ;;  %v3899_v44 = vld [vmem:[%s6862_s8 + $0x38] sm:$0xff]  ;;  %v3896_v33 = vld [vmem:[%s6862_s8 + $0x20] sm:$0xff] }
 0x696   : > { %v3353_v32 = vpack.c.bf16 %v3342_v40, %v3341_v43  ;;  %v3346_v51 = vmul.f32 %v6722_v14, %v3323_v46  ;;  %v3316_v42 = vrot.slane %v3997_v26, 7  ;;  %3589 = vmatpush.bf16.msra.mxu3 %v3899_v44 }
 0x697   : > { %v3354_v24 = vpack.c.bf16 %v3344_v30, %v3343_v15 }
 0x698   : > { %v3355_v12 = vpack.c.bf16 %v3346_v51, %v3345_v0  ;;  %v3324_v22 = vperm.slane %v3316_v42, 0 }
 0x69a   : > { %v3347_v59 = vmul.f32 %v6724_v31, %v3324_v22  ;;  %v3348_v35 = vmul.f32 %v6730_v28, %v3324_v22  ;;  %3590 = vmatpush.bf16.msra.mxu3 %v3898_v25 }
 0x69c   : > { %v3356_v2 = vpack.c.bf16 %v3348_v35, %v3347_v59 }
 0x6a2   : > { %3815 = vmatmul.msk.bf16.vlgmr.msra.gmra.mxu1 %vm3032_vm7, %v3349_v58 }
 0x6b2   : > { %3816 = vmatmul.msk.bf16.gmra.mxu1 %vm3032_vm7, %v3350_v7  ;;  %v2805_v7 = vadd.f32 %v2804_v27, %v6458_v41 }
 0x6c2   : > { %3817 = vmatmul.msk.bf16.gmra.mxu1 %vm3032_vm7, %v3351_v48  ;;  %v3895_v48 = vld [vmem:[%s6862_s8 + $0x18] sm:$0xff] }
 0x6d2   : > { %3818 = vmatmul.msk.bf16.gmra.mxu1 %vm3032_vm7, %v3352_v45 }
 0x6e2   : > { %3819 = vmatmul.msk.bf16.gmra.mxu1 %vm3032_vm7, %v3353_v32 }
 0x6f2   : > { %3820 = vmatmul.msk.bf16.gmra.mxu1 %vm3032_vm7, %v3354_v24 }
 0x702   : > { %3821 = vmatmul.msk.bf16.gmra.mxu1 %vm3032_vm7, %v3355_v12 }
 0x70f   : > { %v3305_v36 = vpop.f32.mrf.mxu1 }
 0x710   : > { %v6768_v18 = vmul.f32 %v3305_v36, %v6468_v60 }
 0x712   : > { %3822 = vmatmul.msk.bf16.gmra.mxu1 %vm3032_vm7, %v3356_v2 }
 0x717   : > { %v3307_v14 = vpop.f32.mrf.mxu1 }
 0x71f   : > { %v3390_v31 = vpop.f32.mrf.mxu1 }
 0x720   : > { %v3431_v28 = vmul.f32 %v3390_v31, %v6496_v3  ;;  %v3897_v3 = vld [vmem:[%s6862_s8 + $0x28] sm:$0xff]  ;;  %v3894_v31 = vld [vmem:[%s6862_s8 + $0x10] sm:$0xff] }
 0x721   : > { %3591 = vmatpush.bf16.msra.mxu3 %v3897_v3 }
 0x725   : > { %3592 = vmatpush.bf16.msra.mxu3 %v3896_v33 }
 0x727   : > { %v3392_v29 = vpop.f32.mrf.mxu1 }
 0x728   : > { %v3432_v13 = vmul.f32 %v3392_v29, %v6499_v39 }
 0x729   : > { %3593 = vmatpush.bf16.msra.mxu3 %v3895_v48 }
 0x72a   : > { %v3447_v60 = vadd.f32 %v3432_v13, %v3431_v28 }
 0x72c   : > { %v3448_v56 = vrot.slane %v3447_v60, 4 }
 0x72d   : > { %3594 = vmatpush.bf16.msra.mxu3 %v3894_v31 }
 0x72e   : > { %v3449_v52 = vadd.f32 %v3448_v56, %v3447_v60 }
 0x72f   : > { %v3395_v50 = vpop.f32.mrf.mxu1 }
 0x730   : > { %v3433_v55 = vmul.f32 %v3395_v50, %v6507_v23  ;;  %v3450_v47 = vrot.slane %v3449_v52, 2 }
 0x732   : > { %v3451_v16 = vadd.f32 %v3450_v47, %v3449_v52  ;;  %v3893_v47 = vld [vmem:[%s6862_s8 + $0x8] sm:$0xff] }
 0x733   : > { %3595 = vmatpush.bf16.msra.mxu3 %v3893_v47 }
 0x734   : > { %v3452_v23 = vrot.slane %v3451_v16, 1 }
 0x736   : > { %v3453_v63 = vadd.f32 %v3452_v23, %v3451_v16 }
 0x737   : > { %v3397_v26 = vpop.f32.mrf.mxu1 }
 0x738   : > { %v3434_v21 = vmul.f32 %v3397_v26, %v6510_v54 }
 0x73a   : > { %v3454_v39 = vadd.f32 %v3434_v21, %v3433_v55 }
 0x73c   : > { %v3455_v53 = vrot.slane %v3454_v39, 4 }
 0x73e   : > { %v3456_v62 = vadd.f32 %v3455_v53, %v3454_v39 }
 0x73f   : > { %v3400_v4 = vpop.f32.mrf.mxu1 }
 0x740   : > { %v3457_v20 = vrot.slane %v3456_v62, 2  ;;  %v3435_v37 = vmul.f32 %v3400_v4, %v6523_v5  ;;  %v2807_v5 = vpop.f32.mrf.mxu0 }
 0x741   : > { %v2808_v22 = vadd.f32 %v2807_v5, %v6458_v41 }
 0x742   : > { %v3458_v11 = vadd.f32 %v3457_v20, %v3456_v62 }
 0x744   : > { %v3459_v61 = vrot.slane %v3458_v11, 1 }
 0x746   : > { %v3460_v54 = vadd.f32 %v3459_v61, %v3458_v11 }
 0x747   : > { %v3402_v49 = vpop.f32.mrf.mxu1 }
 0x748   : > { %v3511_v10 = vsel %vm2524_vm0, %v3460_v54, %v3453_v63  ;;  %v3436_v57 = vmul.f32 %v3402_v49, %v6526_v17  ;;  %v2809_v45 = vpop.f32.mrf.mxu0 }
 0x749   : > { %v2810_v59 = vadd.f32 %v2809_v45, %v6458_v41 }
 0x74a   : > { %v3461_v58 = vadd.f32 %v3436_v57, %v3435_v37  ;;  %v3892_v57 = vld [vmem:[%s6862_s8] sm:$0xff] }
 0x74b   : > { %3596 = vmatpush.bf16.msra.mxu3 %v3892_v57 }
 0x74c   : > { %v3462_v19 = vrot.slane %v3461_v58, 4 }
 0x74e   : > { %v3463_v9 = vadd.f32 %v3462_v19, %v3461_v58 }
 0x74f   : > { %v3405_v46 = vpop.f32.mrf.mxu1 }
 0x750   : > { %v3464_v34 = vrot.slane %v3463_v9, 2  ;;  %v3437_v6 = vmul.f32 %v3405_v46, %v6532_v1  ;;  %v2812_v42 = vpop.f32.mrf.mxu0 }
 0x751   : > { %v2813_v26 = vadd.f32 %v2812_v42, %v6458_v41 }
 0x752   : > { %v3465_v8 = vadd.f32 %v3464_v34, %v3463_v9 }
 0x754   : > { %v3466_v38 = vrot.slane %v3465_v8, 1 }
 0x756   : > { %v3467_v43 = vadd.f32 %v3466_v38, %v3465_v8 }
 0x757   : > { %v3407_v40 = vpop.f32.mrf.mxu1 }
 0x758   : > { %v3512_v17 = vsel %vm2526_vm1, %v3467_v43, %v3511_v10  ;;  %v3438_v15 = vmul.f32 %v3407_v40, %v2805_v7  ;;  %v2814_v29 = vpop.f32.mrf.mxu0 }
 0x759   : > { %v2815_v21 = vadd.f32 %v2814_v29, %v6458_v41 }
 0x75a   : > { %v3468_v30 = vadd.f32 %v3438_v15, %v3437_v6 }
 0x75c   : > { %v3469_v0 = vrot.slane %v3468_v30, 4 }
 0x75e   : > { %v3470_v32 = vadd.f32 %v3469_v0, %v3468_v30 }
 0x75f   : > { %v3410_v51 = vpop.f32.mrf.mxu1 }
 0x760   : > { %v3471_v1 = vrot.slane %v3470_v32, 2  ;;  %v3439_v44 = vmul.f32 %v3410_v51, %v2808_v22  ;;  %v2817_v52 = vpop.f32.mrf.mxu0 }
 0x761   : > { %v2818_v54 = vadd.f32 %v2817_v52, %v6458_v41 }
 0x762   : > { %v3472_v24 = vadd.f32 %v3471_v1, %v3470_v32 }
 0x764   : > { %v3473_v12 = vrot.slane %v3472_v24, 1 }
 0x766   : > { %v3474_v35 = vadd.f32 %v3473_v12, %v3472_v24 }
 0x767   : > { %v3412_v2 = vpop.f32.mrf.mxu1 }
 0x768   : > { %v3513_v36 = vsel %vm2528_vm2, %v3474_v35, %v3512_v17  ;;  %v3440_v14 = vmul.f32 %v3412_v2, %v2810_v59  ;;  %v2819_v23 = vpop.f32.mrf.mxu0 }
 0x769   : > { %v2820_v49 = vadd.f32 %v2819_v23, %v6458_v41 }
 0x76a   : > { %v3475_v28 = vadd.f32 %v3440_v14, %v3439_v44 }
 0x76c   : > { %v3476_v13 = vrot.slane %v3475_v28, 4 }
 0x76e   : > { %v3477_v25 = vadd.f32 %v3476_v13, %v3475_v28 }
 0x76f   : > { %v3415_v60 = vpop.f32.mrf.mxu1 }
 0x770   : > { %v3478_v50 = vrot.slane %v3477_v25, 2  ;;  %v3441_v16 = vmul.f32 %v3415_v60, %v2813_v26  ;;  %v2822_v5 = vpop.f32.mrf.mxu0 }
 0x771   : > { %v2823_v17 = vadd.f32 %v2822_v5, %v6458_v41 }
 0x772   : > { %v3479_v55 = vadd.f32 %v3478_v50, %v3477_v25 }
 0x774   : > { %v3480_v56 = vrot.slane %v3479_v55, 1 }
 0x776   : > { %v3481_v3 = vadd.f32 %v3480_v56, %v3479_v55 }
 0x777   : > { %v3417_v39 = vpop.f32.mrf.mxu1 }
 0x778   : > { %v3514_v53 = vsel %vm2530_vm3, %v3481_v3, %v3513_v36  ;;  %v3442_v62 = vmul.f32 %v3417_v39, %v2815_v21  ;;  %v2824_v43 = vpop.f32.mrf.mxu0  ;;  %v3961_v36 = vld [vmem:[%s6863_s9] ss:$0 sm:$0xff] }
 0x779   : > { %v2825_v15 = vadd.f32 %v2824_v43, %v6458_v41 }
 0x77a   : > { %v3482_v4 = vadd.f32 %v3442_v62, %v3441_v16 }
 0x77c   : > { %v3483_v20 = vrot.slane %v3482_v4, 4 }
 0x77e   : > { %v3484_v37 = vadd.f32 %v3483_v20, %v3482_v4 }
 0x77f   : > { %v3420_v11 = vpop.f32.mrf.mxu1 }
 0x780   : > { %v3485_v61 = vrot.slane %v3484_v37, 2  ;;  %v3443_v19 = vmul.f32 %v3420_v11, %v2818_v54 }
 0x782   : > { %v3486_v27 = vadd.f32 %v3485_v61, %v3484_v37 }
 0x784   : > { %v3487_v63 = vrot.slane %v3486_v27, 1 }
 0x786   : > { %v3488_v10 = vadd.f32 %v3487_v63, %v3486_v27 }
 0x787   : > { %v3422_v33 = vpop.f32.mrf.mxu1 }
 0x788   : > { %v3515_v58 = vsel %vm2532_vm4, %v3488_v10, %v3514_v53  ;;  %v3444_v9 = vmul.f32 %v3422_v33, %v2820_v49 }
 0x78a   : > { %v3489_v46 = vadd.f32 %v3444_v9, %v3443_v19 }
 0x78c   : > { %v3490_v34 = vrot.slane %v3489_v46, 4 }
 0x78e   : > { %v3491_v6 = vadd.f32 %v3490_v34, %v3489_v46 }
 0x78f   : > { %v3425_v8 = vpop.f32.mrf.mxu1 }
 0x790   : > { %v3492_v38 = vrot.slane %v3491_v6, 2  ;;  %v3445_v30 = vmul.f32 %v3425_v8, %v2823_v17 }
 0x792   : > { %v3493_v7 = vadd.f32 %v3492_v38, %v3491_v6 }
 0x794   : > { %v3494_v40 = vrot.slane %v3493_v7, 1 }
 0x796   : > { %v3495_v48 = vadd.f32 %v3494_v40, %v3493_v7 }
 0x797   : > { %v3427_v45 = vpop.f32.mrf.mxu1 }
 0x798   : > { %v3446_v0 = vmul.f32 %v3427_v45, %v2825_v15  ;;  %v3516_v32 = vsel %vm2534_vm5, %v3495_v48, %v3515_v58 }
 0x79a   : > { %v3496_v51 = vadd.f32 %v3446_v0, %v3445_v30 }
 0x79c   : > { %v3497_v1 = vrot.slane %v3496_v51, 4 }
 0x79e   : > { %v3498_v42 = vadd.f32 %v3497_v1, %v3496_v51 }
 0x7a0   : > { %v3499_v24 = vrot.slane %v3498_v42, 2 }
 0x7a2   : > { %v3500_v12 = vadd.f32 %v3499_v24, %v3498_v42 }
 0x7a4   : > { %v3501_v22 = vrot.slane %v3500_v12, 1 }
 0x7a6   : > { %v3502_v59 = vadd.f32 %v3501_v22, %v3500_v12 }
 0x7a8   : > { %v3517_v35 = vsel %vm2536_vm6, %v3502_v59, %v3516_v32 }
 0x7a9   : > { %v3519_v2 = vadd.f32 %v3517_v35, %v6768_v18 }
 0x7ab   : > { %v3520_v41 = vpack.c.bf16 %v3519_v2, %v3519_v2 }
 0x7ad   : > { %3597 = vmatmul.bf16.vlgmr.msra.gmra.mxu3 %v3520_v41 }
 0x830   : > { %v3598_v44 = vpop.f32.mrf.mxu3 }
 0x831   : > { %v3599_v14 = vadd.f32 %v3961_v36, %v3598_v44 }
 0x833   : > { %3602 = vst [vmem:[%s409_s18] sm:$0xff] %v3599_v14 }
 0x834   : > { %4153 = shalt.err (!%p4150_p3)
}
 0x835   : > { %3900 = dma.vmem_to_hbm [thread:$0]  (%p4291_p5), %s3617_s19, 128, %s3619_s25, %s3604_s26  }
 0x838   : > { %v3600_v18 = vpop.f32.mrf.mxu3 }
 0x839 PF: > { %p3906_p4 = scmp.ge.s32.totalorder %s4188_s24, 2  ;;  %s3630_s20 = sand.u32 1, %s4176_s21  }
 0x83a   : > { %s3631_s29 = scalar_lea.sflag [#allocation3], %s3630_s20 }
 0x83b   : > { %p3903_p7 = pnand %p3906_p4, %p4295_p6 }
 0x83d   : > { %p3904_p8 = pneg %p3903_p7 }
 0x83f   : > { %4171 = dma.done.wait (%p3904_p8), %s3631_s29, 128  }
 0x840   : > { %4173 = vsyncadd (%p3904_p8), %s3631_s29, 4294967168  ;;  %p22_p9 = scmp.ge.s32.totalorder %s4279_s27, 4   ;;  %s7133_s21 = smov %s4180_s22 }
 0x841   : > { %s7134_s22 = smov %s4184_s23  ;;  %s7135_s23 = smov %s4289_s30 }
 0x842   : > { %s7136_s24 = smov %s4279_s27  ;;  %24 = sbr.rel (!%p22_p9) target bundleno = 8 (0x8), region = 103 }
 0x847   :  { %3637 = vsyncpa [#allocation3], 1 }
 0x848   :  { %3639 = vsyncpa [#allocation3 + $0x1], 1 }

</bundles_post_ra>
